<compile_context>
chip_gen: v7x
topology: tpu7x:2x2x1
jax: 0.10.0
libtpu: 0.0.40
codegen_flags: <defaults>
</compile_context>

<pallas_src>
import functools

import jax
import jax.numpy as jnp
from jax.experimental import pallas as pl
from jax.experimental.pallas import tpu as pltpu

_LN_EPS = 1e-5  # torch.nn.LayerNorm default


def _round_up(n, m):
    return ((n + m - 1) // m) * m


def _vmem_capacity_bytes():
    try:
        return int(pltpu.get_tpu_info().vmem_capacity_bytes)
    except Exception:  # interpret mode / older jax: assume the smallest part (v7x)
        return 64 * 2**20


# --------------------------------------------------------------------------- #
# Kernels
# --------------------------------------------------------------------------- #
def _match_kernel(x_ref, w_ref, b_ref, gamma_ref, beta_ref, o_ref, *,
                  d_out, d_pad):
    """Fused  x @ [W_fc^T | W_match^T]  ->  LN + SiLU on fc half + residual."""
    # One lane-full MXU matmul; f32 accumulation via preferred_element_type.
    res = (jnp.dot(x_ref[...], w_ref[...], preferred_element_type=jnp.float32)
           + b_ref[...])
    # Lane-aligned (d_pad % 128 == 0) register split -- no VMEM scratch round trip.
    fc = res[:, :d_pad]
    residual = res[:, d_pad:]
    # Padded fc columns are exactly 0 (zero weight/bias padding), so summing over
    # the padded axis and dividing by the true d_out gives correct LN statistics;
    # the padded columns contribute mean^2 each to the centered sum of squares.
    n_pad = d_pad - d_out
    inv_n = 1.0 / d_out
    mean = jnp.sum(fc, axis=-1, keepdims=True) * inv_n
    centered = fc - mean
    var = (jnp.sum(centered * centered, axis=-1, keepdims=True)
           - n_pad * (mean * mean)) * inv_n
    ln = centered * jax.lax.rsqrt(var + _LN_EPS)
    ln = ln * gamma_ref[...] + beta_ref[...]     # padded cols -> 0 (gamma/beta pad = 0)
    out = ln * jax.nn.sigmoid(ln) + residual     # padded cols stay 0
    if n_pad:
        out = out[:, :d_out]                     # store only the real columns
    o_ref[...] = out.astype(o_ref.dtype)


def _identity_kernel(x_ref, w_ref, b_ref, gamma_ref, beta_ref, o_ref):
    """D_in == D_out: single matmul, identity residual."""
    x = x_ref[...]
    fc = (jnp.dot(x, w_ref[...], preferred_element_type=jnp.float32)
          + b_ref[...])
    mean = jnp.mean(fc, axis=-1, keepdims=True)
    centered = fc - mean
    var = jnp.mean(centered * centered, axis=-1, keepdims=True)
    ln = centered * jax.lax.rsqrt(var + _LN_EPS)
    ln = ln * gamma_ref[...] + beta_ref[...]
    o_ref[...] = (ln * jax.nn.sigmoid(ln)
                  + x.astype(jnp.float32)).astype(o_ref.dtype)


# --------------------------------------------------------------------------- #
# One-time parameter preparation (NOT per forward)
# --------------------------------------------------------------------------- #
def residual_block_prepare(w_fc, b_fc, gamma, beta, w_match=None, b_match=None,
                           *, weight_dtype=None):
    """Pre-transpose / concatenate / zero-pad the weights once.

    weight_dtype=jnp.bfloat16 halves weight + activation DMA bytes (f32
    accumulation is kept inside the kernel via preferred_element_type).
    """
    f32 = jnp.float32
    d_out, d_in = w_fc.shape
    use_match = w_match is not None
    if not use_match:
        assert d_in == d_out, "identity residual requires input_dim == output_dim"
        w = jnp.asarray(w_fc, f32).T
        if weight_dtype is not None:
            w = w.astype(weight_dtype)
        return dict(kind="identity", d_in=d_in, d_out=d_out, d_pad=d_out,
                    w=w,
                    b=jnp.asarray(b_fc, f32).reshape(1, d_out),
                    gamma=jnp.asarray(gamma, f32).reshape(1, d_out),
                    beta=jnp.asarray(beta, f32).reshape(1, d_out))

    # Pad each half to a 128-lane boundary so the in-kernel split is vreg aligned.
    d_pad = _round_up(d_out, 128)
    pad = d_pad - d_out

    def pad_cols(w_t):                                  # (d_in, d_out) -> (d_in, d_pad)
        return jnp.pad(jnp.asarray(w_t, f32), ((0, 0), (0, pad)))

    w_cat = jnp.concatenate([pad_cols(w_fc.T), pad_cols(w_match.T)], axis=1)
    if weight_dtype is not None:
        w_cat = w_cat.astype(weight_dtype)
    b_cat = jnp.concatenate([jnp.pad(jnp.asarray(b_fc, f32), (0, pad)),
                             jnp.pad(jnp.asarray(b_match, f32), (0, pad))]
                            ).reshape(1, 2 * d_pad)
    return dict(kind="match", d_in=d_in, d_out=d_out, d_pad=d_pad,
                w=w_cat, b=b_cat,
                gamma=jnp.pad(jnp.asarray(gamma, f32), (0, pad)).reshape(1, d_pad),
                beta=jnp.pad(jnp.asarray(beta, f32), (0, pad)).reshape(1, d_pad))


# --------------------------------------------------------------------------- #
# Forward wrapper
# --------------------------------------------------------------------------- #
def _pick_tm(batch, bytes_per_row, tile_budget, target=512):
    """Largest multiple-of-8 row tile <= target fitting the VMEM budget,
    preferring an even number of grid steps (v7x has 2 TensorCores)."""
    cap = int(tile_budget // max(bytes_per_row, 1))
    cap = max(8, (cap // 8) * 8)
    target = max(8, min(target, cap))
    if batch <= target:
        return batch                        # one tile: no serial-step overhead
    best = None
    t = (target // 8) * 8
    while t >= 8:
        if batch % t == 0:
            if (batch // t) % 2 == 0:
                return t                    # even step count balances v7x's 2 TCs
            if best is None:
                best = t
        t -= 8
    if best is not None:
        return best
    return (target // 8) * 8                # no clean divisor: batch gets zero-padded


def residual_block_apply(x, params, *, tm=None):
    """ResidualBlock forward with pre-prepared params (see residual_block_prepare)."""
    B, D_in = x.shape
    assert D_in == params["d_in"]
    d_out, d_pad = params["d_out"], params["d_pad"]
    use_match = params["kind"] == "match"
    w, b, gamma, beta = params["w"], params["b"], params["gamma"], params["beta"]
    w_cols = w.shape[1]

    out_dtype = x.dtype
    if w.dtype == jnp.bfloat16 and x.dtype == jnp.float32:
        x = x.astype(jnp.bfloat16)          # halve activation DMA; f32 acc in-kernel

    x_isz = jnp.dtype(x.dtype).itemsize
    o_isz = jnp.dtype(out_dtype).itemsize
    const_bytes = (w.size * jnp.dtype(w.dtype).itemsize
                   + (b.size + gamma.size + beta.size) * 4)

    vmem_cap = _vmem_capacity_bytes()
    vmem_ceiling = min(vmem_cap * 5 // 8, 48 * 2**20)   # ~40 MiB on 64-MiB v7x parts
    # Row-tile budget: double-buffered x/out tiles + headroom for the (tm, w_cols)
    # f32 epilogue intermediates (register spill), after reserving the weights.
    bytes_per_row = 2 * (D_in * x_isz + d_out * o_isz) + 3 * w_cols * 4
    tile_budget = max(2 * 2**20, vmem_ceiling - 2 * const_bytes - 4 * 2**20)
    if tm is None:
        tm = _pick_tm(B, bytes_per_row, tile_budget)

    grid_n = pl.cdiv(B, tm)
    b_pad = grid_n * tm
    x_in = jnp.pad(x, ((0, b_pad - B), (0, 0))) if b_pad != B else x

    row_spec = pl.BlockSpec((tm, D_in), lambda i: (i, 0))
    out_spec = pl.BlockSpec((tm, d_out), lambda i: (i, 0))

    if use_match:
        kernel = functools.partial(_match_kernel, d_out=d_out, d_pad=d_pad)
        vec_w = d_pad
    else:
        kernel = _identity_kernel
        vec_w = d_out
    operands = (x_in, w, b, gamma, beta)

    flops = 2 * b_pad * D_in * w_cols + 12 * b_pad * d_pad
    bytes_accessed = b_pad * D_in * x_isz + const_bytes + b_pad * d_out * o_isz
    cost = pl.CostEstimate(flops=int(flops),
                           transcendentals=int(b_pad * d_pad),    # sigmoid
                           bytes_accessed=int(bytes_accessed))

    def call(single_buffer_consts):
        def const_spec(shape):
            if single_buffer_consts:
                # Constant-index operands: one resident copy, fetched once.
                return pl.BlockSpec(shape, lambda i: (0, 0),
                                    pipeline_mode=pl.Buffered(1))
            return pl.BlockSpec(shape, lambda i: (0, 0))

        in_specs = [row_spec,
                    const_spec((D_in, w_cols)),
                    const_spec((1, w_cols)),
                    const_spec((1, vec_w)),
                    const_spec((1, vec_w))]

        n_w_buf = 1 if single_buffer_consts else 2
        est_vmem = (2 * tm * (D_in * x_isz + d_out * o_isz)
                    + n_w_buf * const_bytes
                    + 4 * tm * w_cols * 4)            # epilogue / spill headroom
        vmem_limit = int(min(max(est_vmem + 4 * 2**20, 16 * 2**20), vmem_ceiling))
        # TODO(synk): for weight slabs approaching the VMEM ceiling (very large
        # D_in/D_out) add K/N grid axes with a pl.when-gated f32 accumulator
        # instead of keeping the full fused weight matrix resident.

        return pl.pallas_call(
            kernel,
            out_shape=jax.ShapeDtypeStruct((b_pad, d_out), out_dtype),
            grid_spec=pltpu.PrefetchScalarGridSpec(
                num_scalar_prefetch=0,
                grid=(grid_n,),
                in_specs=in_specs,
                out_specs=out_spec),
            compiler_params=pltpu.CompilerParams(
                dimension_semantics=("parallel",),
                vmem_limit_bytes=vmem_limit),
            cost_estimate=cost,
        )(*operands)

    try:
        out = call(True)
    except Exception:
        # pl.Buffered(1) unsupported on this jax version -> default double buffering.
        out = call(False)

    return out[:B] if b_pad != B else out


def residual_block(x, w_fc, b_fc, gamma, beta, w_match=None, b_match=None, *,
                   weight_dtype=None, tm=None):
    """Convenience one-shot wrapper.  For production, call
    residual_block_prepare() once and residual_block_apply() per forward."""
    params = residual_block_prepare(w_fc, b_fc, gamma, beta, w_match, b_match,
                                    weight_dtype=weight_dtype)
    return residual_block_apply(x, params, tm=tm)


# --------------------------------------------------------------------------- #
# Reference + self-test
# --------------------------------------------------------------------------- #
def _reference(x, w_fc, b_fc, gamma, beta, w_match=None, b_match=None):
    """Pure-JAX reference mirroring the PyTorch forward (f32, HIGHEST precision)."""
    hp = jax.lax.Precision.HIGHEST
    out = jnp.dot(x, w_fc.T, precision=hp) + b_fc
    mean = jnp.mean(out, axis=-1, keepdims=True)
    var = jnp.mean((out - mean) ** 2, axis=-1, keepdims=True)
    out = (out - mean) / jnp.sqrt(var + _LN_EPS)
    out = out * gamma + beta
    out = out * jax.nn.sigmoid(out)
    residual = (jnp.dot(x, w_match.T, precision=hp) + b_match
                if w_match is not None else x)
    return out + residual


if __name__ == "__main__":
    key = jax.random.PRNGKey(0)

    def init_linear(k, d_in, d_out):
        k_w, k_b = jax.random.split(k)
        bound = 1.0 / jnp.sqrt(jnp.float32(d_in))
        w = jax.random.uniform(k_w, (d_out, d_in), jnp.float32, -bound, bound)
        b = jax.random.uniform(k_b, (d_out,), jnp.float32, -bound, bound)
        return w, b

    # Default MXU matmul precision may use bf16 passes for f32 inputs, so compare
    # against a HIGHEST-precision reference with a correspondingly loose tolerance.
    TOL = dict(atol=2e-3, rtol=2e-3)

    # --- case 1: input_dim != output_dim (match_dim branch, D_out padded to 128)
    B, D_in, D_out = 256, 32, 64
    k_x, k_fc, k_m, key = jax.random.split(key, 4)
    x = jax.random.normal(k_x, (B, D_in), dtype=jnp.float32)
    w_fc, b_fc = init_linear(k_fc, D_in, D_out)
    w_m, b_m = init_linear(k_m, D_in, D_out)
    gamma = jnp.ones((D_out,), jnp.float32)
    beta = jnp.zeros((D_out,), jnp.float32)

    params = residual_block_prepare(w_fc, b_fc, gamma, beta, w_m, b_m)  # once
    out = jax.block_until_ready(residual_block_apply(x, params))
    ref = _reference(x, w_fc, b_fc, gamma, beta, w_m, b_m)
    assert out.shape == (B, D_out)
    assert jnp.allclose(out, ref, **TOL), "match-dim path mismatch"

    # --- case 2: input_dim == output_dim (identity residual) -----------------
    B2, D2 = 96, 64
    k_x2, k_fc2, key = jax.random.split(key, 3)
    x2 = jax.random.normal(k_x2, (B2, D2), dtype=jnp.float32)
    w_fc2, b_fc2 = init_linear(k_fc2, D2, D2)
    gamma_i = jnp.ones((D2,), jnp.float32)
    beta_i = jnp.zeros((D2,), jnp.float32)

    params2 = residual_block_prepare(w_fc2, b_fc2, gamma_i, beta_i)
    out2 = jax.block_until_ready(residual_block_apply(x2, params2))
    ref2 = _reference(x2, w_fc2, b_fc2, gamma_i, beta_i)
    assert out2.shape == (B2, D2)
    assert jnp.allclose(out2, ref2, **TOL), "identity path mismatch"

    # --- case 3: batch not a multiple of 8 (full-dim single-tile path) -------
    B3 = 50
    k_x3, key = jax.random.split(key)
    x3 = jax.random.normal(k_x3, (B3, D_in), dtype=jnp.float32)
    out3 = jax.block_until_ready(residual_block_apply(x3, params))
    ref3 = _reference(x3, w_fc, b_fc, gamma, beta, w_m, b_m)
    assert out3.shape == (B3, D_out)
    assert jnp.allclose(out3, ref3, **TOL), "ragged-batch path mismatch"

    print("KERNEL_OK")
</pallas_src>

<mosaic_0001>
module attributes {stable_mosaic.version = 11 : i64} {
  func.func @_match_kernel(%arg0: i32, %arg1: memref<256x32xf32, #tpu.memory_space<vmem>>, %arg2: memref<32x256xf32, #tpu.memory_space<vmem>>, %arg3: memref<1x256xf32, #tpu.memory_space<vmem>>, %arg4: memref<1x128xf32, #tpu.memory_space<vmem>>, %arg5: memref<1x128xf32, #tpu.memory_space<vmem>>, %arg6: memref<256x64xf32, #tpu.memory_space<vmem>>) attributes {dimension_semantics = [#tpu.dimension_semantics<parallel>], iteration_bounds = array<i64: 1>, scalar_prefetch = 0 : i64, scratch_operands = 0 : i64, tpu.core_type = #tpu.core_type<tc>, window_params = [{transform_indices = @transform_0, window_bounds = array<i64: 256, 32>}, {pipeline_mode = #tpu.pipeline_mode<synchronous>, transform_indices = @transform_1, window_bounds = array<i64: 32, 256>}, {pipeline_mode = #tpu.pipeline_mode<synchronous>, transform_indices = @transform_2, window_bounds = array<i64: 1, 256>}, {pipeline_mode = #tpu.pipeline_mode<synchronous>, transform_indices = @transform_3, window_bounds = array<i64: 1, 128>}, {pipeline_mode = #tpu.pipeline_mode<synchronous>, transform_indices = @transform_4, window_bounds = array<i64: 1, 128>}, {transform_indices = @transform_5, window_bounds = array<i64: 256, 64>}]} {
    %c0 = arith.constant 0 : index
    %c0_0 = arith.constant 0 : index
    %0 = vector.load %arg1[%c0, %c0_0] : memref<256x32xf32, #tpu.memory_space<vmem>>, vector<256x32xf32>
    %c0_1 = arith.constant 0 : index
    %c0_2 = arith.constant 0 : index
    %1 = vector.load %arg2[%c0_1, %c0_2] : memref<32x256xf32, #tpu.memory_space<vmem>>, vector<32x256xf32>
    %cst = arith.constant dense<0.000000e+00> : vector<256x256xf32>
    %2 = tpu.matmul %0, %1, %cst {dimension_numbers = #tpu.dot_dimension_numbers<[1], [0], [0], [1], [0, 0, 1, 1], [], []>} : vector<256x32xf32>, vector<32x256xf32>, vector<256x256xf32> -> vector<256x256xf32>
    %c0_3 = arith.constant 0 : index
    %c0_4 = arith.constant 0 : index
    %3 = vector.load %arg3[%c0_3, %c0_4] : memref<1x256xf32, #tpu.memory_space<vmem>>, vector<1x256xf32>
    %4 = vector.broadcast %3 : vector<1x256xf32> to vector<256x256xf32>
    %5 = arith.addf %2, %4 : vector<256x256xf32>
    %6 = vector.extract_strided_slice %5 {offsets = [0, 0], sizes = [256, 128], strides = [1, 1]} : vector<256x256xf32> to vector<256x128xf32>
    %7 = vector.extract_strided_slice %5 {offsets = [0, 128], sizes = [256, 128], strides = [1, 1]} : vector<256x256xf32> to vector<256x128xf32>
    %cst_5 = arith.constant dense<0.000000e+00> : vector<256xf32>
    %8 = vector.multi_reduction <add>, %6, %cst_5 [1] : vector<256x128xf32> to vector<256xf32>
    %9 = vector.shape_cast %8 : vector<256xf32> to vector<256x1xf32>
    %cst_6 = arith.constant 1.562500e-02 : f32
    %10 = vector.broadcast %cst_6 : f32 to vector<256x1xf32>
    %11 = arith.mulf %9, %10 : vector<256x1xf32>
    %12 = vector.broadcast %11 : vector<256x1xf32> to vector<256x128xf32>
    %13 = arith.subf %6, %12 : vector<256x128xf32>
    %14 = arith.mulf %13, %13 : vector<256x128xf32>
    %cst_7 = arith.constant dense<0.000000e+00> : vector<256xf32>
    %15 = vector.multi_reduction <add>, %14, %cst_7 [1] : vector<256x128xf32> to vector<256xf32>
    %16 = vector.shape_cast %15 : vector<256xf32> to vector<256x1xf32>
    %17 = arith.mulf %11, %11 : vector<256x1xf32>
    %cst_8 = arith.constant 6.400000e+01 : f32
    %18 = vector.broadcast %cst_8 : f32 to vector<256x1xf32>
    %19 = arith.mulf %18, %17 : vector<256x1xf32>
    %20 = arith.subf %16, %19 : vector<256x1xf32>
    %cst_9 = arith.constant 1.562500e-02 : f32
    %21 = vector.broadcast %cst_9 : f32 to vector<256x1xf32>
    %22 = arith.mulf %20, %21 : vector<256x1xf32>
    %cst_10 = arith.constant 9.99999974E-6 : f32
    %23 = vector.broadcast %cst_10 : f32 to vector<256x1xf32>
    %24 = arith.addf %22, %23 : vector<256x1xf32>
    %25 = math.rsqrt %24 : vector<256x1xf32>
    %26 = vector.broadcast %25 : vector<256x1xf32> to vector<256x128xf32>
    %27 = arith.mulf %13, %26 : vector<256x128xf32>
    %c0_11 = arith.constant 0 : index
    %c0_12 = arith.constant 0 : index
    %28 = vector.load %arg4[%c0_11, %c0_12] : memref<1x128xf32, #tpu.memory_space<vmem>>, vector<1x128xf32>
    %29 = vector.broadcast %28 : vector<1x128xf32> to vector<256x128xf32>
    %30 = arith.mulf %27, %29 : vector<256x128xf32>
    %c0_13 = arith.constant 0 : index
    %c0_14 = arith.constant 0 : index
    %31 = vector.load %arg5[%c0_13, %c0_14] : memref<1x128xf32, #tpu.memory_space<vmem>>, vector<1x128xf32>
    %32 = vector.broadcast %31 : vector<1x128xf32> to vector<256x128xf32>
    %33 = arith.addf %30, %32 : vector<256x128xf32>
    %34 = arith.negf %33 : vector<256x128xf32>
    %35 = math.exp %34 : vector<256x128xf32>
    %cst_15 = arith.constant 1.000000e+00 : f32
    %36 = vector.broadcast %cst_15 : f32 to vector<256x128xf32>
    %37 = arith.addf %36, %35 : vector<256x128xf32>
    %38 = arith.divf %36, %37 : vector<256x128xf32>
    %39 = arith.mulf %33, %38 : vector<256x128xf32>
    %40 = arith.addf %39, %7 : vector<256x128xf32>
    %41 = vector.extract_strided_slice %40 {offsets = [0, 0], sizes = [256, 64], strides = [1, 1]} : vector<256x128xf32> to vector<256x64xf32>
    %c0_16 = arith.constant 0 : index
    %c0_17 = arith.constant 0 : index
    %42 = vector.load %arg6[%c0_16, %c0_17] : memref<256x64xf32, #tpu.memory_space<vmem>>, vector<256x64xf32>
    tpu.vector_store %arg6[%c0_16, %c0_17], %41 {strides = array<i32>} : memref<256x64xf32, #tpu.memory_space<vmem>>, vector<256x64xf32>,
    return
  }
  func.func @transform_0(%arg0: i32) -> (i32, i32) {
    %c0_i32 = arith.constant 0 : i32
    %c0_i32_0 = arith.constant 0 : i32
    return %arg0, %c0_i32 : i32, i32
  }
  func.func @transform_1(%arg0: i32) -> (i32, i32) {
    %c0_i32 = arith.constant 0 : i32
    %c0_i32_0 = arith.constant 0 : i32
    %c0_i32_1 = arith.constant 0 : i32
    return %c0_i32, %c0_i32_0 : i32, i32
  }
  func.func @transform_2(%arg0: i32) -> (i32, i32) {
    %c0_i32 = arith.constant 0 : i32
    %c0_i32_0 = arith.constant 0 : i32
    %c0_i32_1 = arith.constant 0 : i32
    return %c0_i32, %c0_i32_0 : i32, i32
  }
  func.func @transform_3(%arg0: i32) -> (i32, i32) {
    %c0_i32 = arith.constant 0 : i32
    %c0_i32_0 = arith.constant 0 : i32
    %c0_i32_1 = arith.constant 0 : i32
    return %c0_i32, %c0_i32_0 : i32, i32
  }
  func.func @transform_4(%arg0: i32) -> (i32, i32) {
    %c0_i32 = arith.constant 0 : i32
    %c0_i32_0 = arith.constant 0 : i32
    %c0_i32_1 = arith.constant 0 : i32
    return %c0_i32, %c0_i32_0 : i32, i32
  }
  func.func @transform_5(%arg0: i32) -> (i32, i32) {
    %c0_i32 = arith.constant 0 : i32
    %c0_i32_0 = arith.constant 0 : i32
    return %arg0, %c0_i32 : i32, i32
  }
}

module attributes {stable_mosaic.version = 11 : i64} {
  func.func @_match_kernel(%arg0: i32, %arg1: memref<256x32xf32, #tpu.memory_space<vmem>>, %arg2: memref<32x256xf32, #tpu.memory_space<vmem>>, %arg3: memref<1x256xf32, #tpu.memory_space<vmem>>, %arg4: memref<1x128xf32, #tpu.memory_space<vmem>>, %arg5: memref<1x128xf32, #tpu.memory_space<vmem>>, %arg6: memref<256x64xf32, #tpu.memory_space<vmem>>) attributes {dimension_semantics = [#tpu.dimension_semantics<parallel>], iteration_bounds = array<i64: 1>, scalar_prefetch = 0 : i64, scratch_operands = 0 : i64, tpu.core_type = #tpu.core_type<tc>, window_params = [{transform_indices = @transform_0, window_bounds = array<i64: 256, 32>}, {pipeline_mode = #tpu.pipeline_mode<synchronous>, transform_indices = @transform_1, window_bounds = array<i64: 32, 256>}, {pipeline_mode = #tpu.pipeline_mode<synchronous>, transform_indices = @transform_2, window_bounds = array<i64: 1, 256>}, {pipeline_mode = #tpu.pipeline_mode<synchronous>, transform_indices = @transform_3, window_bounds = array<i64: 1, 128>}, {pipeline_mode = #tpu.pipeline_mode<synchronous>, transform_indices = @transform_4, window_bounds = array<i64: 1, 128>}, {transform_indices = @transform_5, window_bounds = array<i64: 256, 64>}]} {
    %c0 = arith.constant 0 : index
    %c0_0 = arith.constant 0 : index
    %0 = vector.load %arg1[%c0, %c0_0] : memref<256x32xf32, #tpu.memory_space<vmem>>, vector<256x32xf32>
    %c0_1 = arith.constant 0 : index
    %c0_2 = arith.constant 0 : index
    %1 = vector.load %arg2[%c0_1, %c0_2] : memref<32x256xf32, #tpu.memory_space<vmem>>, vector<32x256xf32>
    %cst = arith.constant dense<0.000000e+00> : vector<256x256xf32>
    %2 = tpu.matmul %0, %1, %cst {dimension_numbers = #tpu.dot_dimension_numbers<[1], [0], [0], [1], [0, 0, 1, 1], [], []>} : vector<256x32xf32>, vector<32x256xf32>, vector<256x256xf32> -> vector<256x256xf32>
    %c0_3 = arith.constant 0 : index
    %c0_4 = arith.constant 0 : index
    %3 = vector.load %arg3[%c0_3, %c0_4] : memref<1x256xf32, #tpu.memory_space<vmem>>, vector<1x256xf32>
    %4 = vector.broadcast %3 : vector<1x256xf32> to vector<256x256xf32>
    %5 = arith.addf %2, %4 : vector<256x256xf32>
    %6 = vector.extract_strided_slice %5 {offsets = [0, 0], sizes = [256, 128], strides = [1, 1]} : vector<256x256xf32> to vector<256x128xf32>
    %7 = vector.extract_strided_slice %5 {offsets = [0, 128], sizes = [256, 128], strides = [1, 1]} : vector<256x256xf32> to vector<256x128xf32>
    %cst_5 = arith.constant dense<0.000000e+00> : vector<256xf32>
    %8 = vector.multi_reduction <add>, %6, %cst_5 [1] : vector<256x128xf32> to vector<256xf32>
    %9 = vector.shape_cast %8 : vector<256xf32> to vector<256x1xf32>
    %cst_6 = arith.constant 1.562500e-02 : f32
    %10 = vector.broadcast %cst_6 : f32 to vector<256x1xf32>
    %11 = arith.mulf %9, %10 : vector<256x1xf32>
    %12 = vector.broadcast %11 : vector<256x1xf32> to vector<256x128xf32>
    %13 = arith.subf %6, %12 : vector<256x128xf32>
    %14 = arith.mulf %13, %13 : vector<256x128xf32>
    %cst_7 = arith.constant dense<0.000000e+00> : vector<256xf32>
    %15 = vector.multi_reduction <add>, %14, %cst_7 [1] : vector<256x128xf32> to vector<256xf32>
    %16 = vector.shape_cast %15 : vector<256xf32> to vector<256x1xf32>
    %17 = arith.mulf %11, %11 : vector<256x1xf32>
    %cst_8 = arith.constant 6.400000e+01 : f32
    %18 = vector.broadcast %cst_8 : f32 to vector<256x1xf32>
    %19 = arith.mulf %18, %17 : vector<256x1xf32>
    %20 = arith.subf %16, %19 : vector<256x1xf32>
    %cst_9 = arith.constant 1.562500e-02 : f32
    %21 = vector.broadcast %cst_9 : f32 to vector<256x1xf32>
    %22 = arith.mulf %20, %21 : vector<256x1xf32>
    %cst_10 = arith.constant 9.99999974E-6 : f32
    %23 = vector.broadcast %cst_10 : f32 to vector<256x1xf32>
    %24 = arith.addf %22, %23 : vector<256x1xf32>
    %25 = math.rsqrt %24 : vector<256x1xf32>
    %26 = vector.broadcast %25 : vector<256x1xf32> to vector<256x128xf32>
    %27 = arith.mulf %13, %26 : vector<256x128xf32>
    %c0_11 = arith.constant 0 : index
    %c0_12 = arith.constant 0 : index
    %28 = vector.load %arg4[%c0_11, %c0_12] : memref<1x128xf32, #tpu.memory_space<vmem>>, vector<1x128xf32>
    %29 = vector.broadcast %28 : vector<1x128xf32> to vector<256x128xf32>
    %30 = arith.mulf %27, %29 : vector<256x128xf32>
    %c0_13 = arith.constant 0 : index
    %c0_14 = arith.constant 0 : index
    %31 = vector.load %arg5[%c0_13, %c0_14] : memref<1x128xf32, #tpu.memory_space<vmem>>, vector<1x128xf32>
    %32 = vector.broadcast %31 : vector<1x128xf32> to vector<256x128xf32>
    %33 = arith.addf %30, %32 : vector<256x128xf32>
    %34 = arith.negf %33 : vector<256x128xf32>
    %35 = math.exp %34 : vector<256x128xf32>
    %cst_15 = arith.constant 1.000000e+00 : f32
    %36 = vector.broadcast %cst_15 : f32 to vector<256x128xf32>
    %37 = arith.addf %36, %35 : vector<256x128xf32>
    %38 = arith.divf %36, %37 : vector<256x128xf32>
    %39 = arith.mulf %33, %38 : vector<256x128xf32>
    %40 = arith.addf %39, %7 : vector<256x128xf32>
    %41 = vector.extract_strided_slice %40 {offsets = [0, 0], sizes = [256, 64], strides = [1, 1]} : vector<256x128xf32> to vector<256x64xf32>
    %c0_16 = arith.constant 0 : index
    %c0_17 = arith.constant 0 : index
    %42 = vector.load %arg6[%c0_16, %c0_17] : memref<256x64xf32, #tpu.memory_space<vmem>>, vector<256x64xf32>
    tpu.vector_store %arg6[%c0_16, %c0_17], %41 {strides = array<i32>} : memref<256x64xf32, #tpu.memory_space<vmem>>, vector<256x64xf32>,
    return
  }
  func.func @transform_0(%arg0: i32) -> (i32, i32) {
    %c0_i32 = arith.constant 0 : i32
    %c0_i32_0 = arith.constant 0 : i32
    return %arg0, %c0_i32 : i32, i32
  }
  func.func @transform_1(%arg0: i32) -> (i32, i32) {
    %c0_i32 = arith.constant 0 : i32
    %c0_i32_0 = arith.constant 0 : i32
    %c0_i32_1 = arith.constant 0 : i32
    return %c0_i32, %c0_i32_0 : i32, i32
  }
  func.func @transform_2(%arg0: i32) -> (i32, i32) {
    %c0_i32 = arith.constant 0 : i32
    %c0_i32_0 = arith.constant 0 : i32
    %c0_i32_1 = arith.constant 0 : i32
    return %c0_i32, %c0_i32_0 : i32, i32
  }
  func.func @transform_3(%arg0: i32) -> (i32, i32) {
    %c0_i32 = arith.constant 0 : i32
    %c0_i32_0 = arith.constant 0 : i32
    %c0_i32_1 = arith.constant 0 : i32
    return %c0_i32, %c0_i32_0 : i32, i32
  }
  func.func @transform_4(%arg0: i32) -> (i32, i32) {
    %c0_i32 = arith.constant 0 : i32
    %c0_i32_0 = arith.constant 0 : i32
    %c0_i32_1 = arith.constant 0 : i32
    return %c0_i32, %c0_i32_0 : i32, i32
  }
  func.func @transform_5(%arg0: i32) -> (i32, i32) {
    %c0_i32 = arith.constant 0 : i32
    %c0_i32_0 = arith.constant 0 : i32
    return %arg0, %c0_i32 : i32, i32
  }
}

</mosaic_0001>

<bundles_post_ra>
// kernel: tpu_custom_call.1
= control target key start
LH: loop header
LB: loop body
LE: loop exit
PB: predicated region body
PF: predicated region fallthrough
CT: control target
= control target key end

     0   :  { %v1518_v3 = vmov 0.0   ;;  %vm72_vm0 = vcmask 261120   ;;  %v62_v45 = vlaneseq  ;;  %vm1208_vm1 = vcmask 523264   ;;  %s2819_s1 = inlined_call_operand.vmem [shape: f32[32,256], index: 1, kind: input, shape index: {}]   ;;  %s2820_s0 = inlined_call_operand.vmem [shape: f32[256,32], index: 0, kind: input, shape index: {}]   ;;  %s2821_s2 = inlined_call_operand.vmem [shape: f32[1,256], index: 2, kind: input, shape index: {}]   ;;  %s2822_s3 = inlined_call_operand.vmem [shape: f32[1,128], index: 3, kind: input, shape index: {}]   ;;  %s2823_s4 = inlined_call_operand.vmem [shape: f32[1,128], index: 4, kind: input, shape index: {}]   ;;  %s2824_s5 = inlined_call_operand.vmem [shape: f32[256,64], index: 5, kind: output, shape index: {}]  }
   0x1   :  { %v53_v0 = vld [vmem:[%s2819_s1 + $0x8] sm:$0xff]  ;;  %v55_v1 = vld [vmem:[%s2819_s1 + $0x18] sm:$0xff]  ;;  %v52_v2 = vld [vmem:[%s2819_s1] sm:$0xff]  ;;  %233 = vmatprep.mubr.f32.mxu0 %v1518_v3  ;;  %329 = vmatprep.mubr.f32.mxu1 %v1518_v3 }
   0x2   :  { %v1311_v4 = vpack.c.bf16 %v55_v1, %v53_v0  ;;  %v54_v5 = vld [vmem:[%s2819_s1 + $0x10] sm:$0xff]  ;;  %v57_v6 = vld [vmem:[%s2819_s1 + $0x28] sm:$0xff]  ;;  %v59_v7 = vld [vmem:[%s2819_s1 + $0x38] sm:$0xff]  ;;  %v1733_v46 = vshrl.u32 %v62_v45, 7 }
   0x3   :  { %v1313_v8 = vpack.c.bf16 %v54_v5, %v52_v2  ;;  %v1315_v9 = vpack.c.bf16 %v59_v7, %v57_v6  ;;  %v56_v10 = vld [vmem:[%s2819_s1 + $0x20] sm:$0xff]  ;;  %v58_v11 = vld [vmem:[%s2819_s1 + $0x30] sm:$0xff]  ;;  %v21_v15 = vld [vmem:[%s2820_s0 + $0x8] sm:$0xff] }
   0x4   :  { %1312 = vmatprep.subr.bf16.mxu0 %v1311_v4  ;;  %1319 = vmatprep.subr.bf16.mxu1 %v1311_v4  ;;  %v1317_v12 = vpack.c.bf16 %v58_v11, %v56_v10  ;;  %v20_v13 = vld [vmem:[%s2820_s0] sm:$0xff]  ;;  %v37_v16 = vld [vmem:[%s2820_s0 + $0x88] sm:$0xff]  ;;  %v22_v17 = vld [vmem:[%s2820_s0 + $0x10] sm:$0xff]  ;;  %v64_v47 = vsub.s32 0, %v1733_v46 }
   0x5   :  { %1314 = vmatpush1.bf16.msra.mxu0 %v1313_v8  ;;  %1321 = vmatpush1.bf16.msra.mxu1 %v1313_v8  ;;  %v36_v14 = vld [vmem:[%s2820_s0 + $0x80] sm:$0xff]  ;;  %v38_v18 = vld [vmem:[%s2820_s0 + $0x90] sm:$0xff]  ;;  %v23_v19 = vld [vmem:[%s2820_s0 + $0x18] sm:$0xff] }
   0x6   :  { %1316 = vmatprep.subr.bf16.mxu0 %v1315_v9  ;;  %1320 = vmatprep.subr.bf16.mxu1 %v1315_v9  ;;  %v39_v20 = vld [vmem:[%s2820_s0 + $0x98] sm:$0xff]  ;;  %v24_v21 = vld [vmem:[%s2820_s0 + $0x20] sm:$0xff]  ;;  %v25_v23 = vld [vmem:[%s2820_s0 + $0x28] sm:$0xff] }
   0x7   :  { %v40_v22 = vld [vmem:[%s2820_s0 + $0xa0] sm:$0xff]  ;;  %v41_v24 = vld [vmem:[%s2820_s0 + $0xa8] sm:$0xff]  ;;  %v26_v25 = vld [vmem:[%s2820_s0 + $0x30] sm:$0xff] }
   0x8   :  { %v42_v26 = vld [vmem:[%s2820_s0 + $0xb0] sm:$0xff]  ;;  %v27_v27 = vld [vmem:[%s2820_s0 + $0x38] sm:$0xff]  ;;  %v28_v29 = vld [vmem:[%s2820_s0 + $0x40] sm:$0xff] }
   0x9   :  { %1318 = vmatpush1.bf16.msra.mxu0 %v1317_v12  ;;  %1322 = vmatpush1.bf16.msra.mxu1 %v1317_v12  ;;  %v43_v28 = vld [vmem:[%s2820_s0 + $0xb8] sm:$0xff]  ;;  %v44_v30 = vld [vmem:[%s2820_s0 + $0xc0] sm:$0xff]  ;;  %v29_v31 = vld [vmem:[%s2820_s0 + $0x48] sm:$0xff] }
   0xa   :  { %v45_v32 = vld [vmem:[%s2820_s0 + $0xc8] sm:$0xff]  ;;  %v30_v33 = vld [vmem:[%s2820_s0 + $0x50] sm:$0xff]  ;;  %v31_v35 = vld [vmem:[%s2820_s0 + $0x58] sm:$0xff] }
   0xb   :  { %v46_v34 = vld [vmem:[%s2820_s0 + $0xd0] sm:$0xff]  ;;  %v47_v36 = vld [vmem:[%s2820_s0 + $0xd8] sm:$0xff]  ;;  %v32_v37 = vld [vmem:[%s2820_s0 + $0x60] sm:$0xff] }
   0xc   :  { %1245 = vmatmul.mubr.msk.f32.vlgmr.msra.gmra.mrb[0].mxu0 %vm72_vm0, %v20_v13  ;;  %1261 = vmatmul.mubr.msk.f32.vlgmr.msra.gmra.mrb[0].mxu1 %vm72_vm0, %v36_v14  ;;  %v48_v38 = vld [vmem:[%s2820_s0 + $0xe0] sm:$0xff]  ;;  %v33_v39 = vld [vmem:[%s2820_s0 + $0x68] sm:$0xff]  ;;  %v34_v41 = vld [vmem:[%s2820_s0 + $0x70] sm:$0xff] }
   0xd   :  { %239 = vmatprep.mubr.f32.mxu0 %v1518_v3  ;;  %335 = vmatprep.mubr.f32.mxu1 %v1518_v3  ;;  %v49_v40 = vld [vmem:[%s2820_s0 + $0xe8] sm:$0xff]  ;;  %v50_v42 = vld [vmem:[%s2820_s0 + $0xf0] sm:$0xff]  ;;  %v35_v43 = vld [vmem:[%s2820_s0 + $0x78] sm:$0xff] }
   0xe   :  { %v51_v44 = vld [vmem:[%s2820_s0 + $0xf8] sm:$0xff]  ;;  %v1739_v48 = vld [vmem:[%s2821_s2] sm:$0x3] }
   0xf   :  { %v1742_v49 = vrot.slane %v1739_v48, %v64_v47 }
  0x10   :  { %1246 = vmatmul.mubr.msk.f32.gmra.mrb[2].mxu0 %vm72_vm0, %v21_v15  ;;  %1262 = vmatmul.mubr.msk.f32.gmra.mrb[2].mxu1 %vm72_vm0, %v37_v16 }
  0x11   :  { %245 = vmatprep.mubr.f32.mxu0 %v1518_v3  ;;  %341 = vmatprep.mubr.f32.mxu1 %v1518_v3 }
  0x14   :  { %1247 = vmatmul.mubr.msk.f32.gmra.mrb[4].mxu0 %vm72_vm0, %v22_v17  ;;  %1263 = vmatmul.mubr.msk.f32.gmra.mrb[4].mxu1 %vm72_vm0, %v38_v18 }
  0x15   :  { %251 = vmatprep.mubr.f32.mxu0 %v1518_v3  ;;  %347 = vmatprep.mubr.f32.mxu1 %v1518_v3 }
  0x18   :  { %1248 = vmatmul.mubr.msk.f32.gmra.mrb[6].mxu0 %vm72_vm0, %v23_v19  ;;  %1264 = vmatmul.mubr.msk.f32.gmra.mrb[6].mxu1 %vm72_vm0, %v39_v20 }
  0x19   :  { %257 = vmatprep.mubr.f32.mxu0 %v1518_v3  ;;  %353 = vmatprep.mubr.f32.mxu1 %v1518_v3 }
  0x1c   :  { %1249 = vmatmul.mubr.msk.f32.gmra.mrb[8].mxu0 %vm72_vm0, %v24_v21  ;;  %1265 = vmatmul.mubr.msk.f32.gmra.mrb[8].mxu1 %vm72_vm0, %v40_v22 }
  0x1d   :  { %263 = vmatprep.mubr.f32.mxu0 %v1518_v3  ;;  %359 = vmatprep.mubr.f32.mxu1 %v1518_v3 }
  0x20   :  { %1250 = vmatmul.mubr.msk.f32.gmra.mrb[10].mxu0 %vm72_vm0, %v25_v23  ;;  %1266 = vmatmul.mubr.msk.f32.gmra.mrb[10].mxu1 %vm72_vm0, %v41_v24 }
  0x21   :  { %269 = vmatprep.mubr.f32.mxu0 %v1518_v3  ;;  %365 = vmatprep.mubr.f32.mxu1 %v1518_v3 }
  0x24   :  { %1251 = vmatmul.mubr.msk.f32.gmra.mrb[12].mxu0 %vm72_vm0, %v26_v25  ;;  %1267 = vmatmul.mubr.msk.f32.gmra.mrb[12].mxu1 %vm72_vm0, %v42_v26 }
  0x25   :  { %275 = vmatprep.mubr.f32.mxu0 %v1518_v3  ;;  %371 = vmatprep.mubr.f32.mxu1 %v1518_v3 }
  0x28   :  { %1252 = vmatmul.mubr.msk.f32.gmra.mrb[14].mxu0 %vm72_vm0, %v27_v27  ;;  %1268 = vmatmul.mubr.msk.f32.gmra.mrb[14].mxu1 %vm72_vm0, %v43_v28 }
  0x29   :  { %281 = vmatprep.mubr.f32.mxu0 %v1518_v3  ;;  %377 = vmatprep.mubr.f32.mxu1 %v1518_v3 }
  0x2c   :  { %1253 = vmatmul.mubr.msk.f32.gmra.mrb[16].mxu0 %vm72_vm0, %v28_v29  ;;  %1269 = vmatmul.mubr.msk.f32.gmra.mrb[16].mxu1 %vm72_vm0, %v44_v30 }
  0x2d   :  { %287 = vmatprep.mubr.f32.mxu0 %v1518_v3  ;;  %383 = vmatprep.mubr.f32.mxu1 %v1518_v3 }
  0x30   :  { %1254 = vmatmul.mubr.msk.f32.gmra.mrb[18].mxu0 %vm72_vm0, %v29_v31  ;;  %1270 = vmatmul.mubr.msk.f32.gmra.mrb[18].mxu1 %vm72_vm0, %v45_v32 }
  0x31   :  { %293 = vmatprep.mubr.f32.mxu0 %v1518_v3  ;;  %389 = vmatprep.mubr.f32.mxu1 %v1518_v3 }
  0x34   :  { %1255 = vmatmul.mubr.msk.f32.gmra.mrb[20].mxu0 %vm72_vm0, %v30_v33  ;;  %1271 = vmatmul.mubr.msk.f32.gmra.mrb[20].mxu1 %vm72_vm0, %v46_v34 }
  0x35   :  { %299 = vmatprep.mubr.f32.mxu0 %v1518_v3  ;;  %395 = vmatprep.mubr.f32.mxu1 %v1518_v3 }
  0x38   :  { %1256 = vmatmul.mubr.msk.f32.gmra.mrb[22].mxu0 %vm72_vm0, %v31_v35  ;;  %1272 = vmatmul.mubr.msk.f32.gmra.mrb[22].mxu1 %vm72_vm0, %v47_v36 }
  0x39   :  { %305 = vmatprep.mubr.f32.mxu0 %v1518_v3  ;;  %401 = vmatprep.mubr.f32.mxu1 %v1518_v3 }
  0x3c   :  { %1257 = vmatmul.mubr.msk.f32.gmra.mrb[24].mxu0 %vm72_vm0, %v32_v37  ;;  %1273 = vmatmul.mubr.msk.f32.gmra.mrb[24].mxu1 %vm72_vm0, %v48_v38 }
  0x3d   :  { %311 = vmatprep.mubr.f32.mxu0 %v1518_v3  ;;  %407 = vmatprep.mubr.f32.mxu1 %v1518_v3 }
  0x40   :  { %1258 = vmatmul.mubr.msk.f32.gmra.mrb[26].mxu0 %vm72_vm0, %v33_v39  ;;  %1274 = vmatmul.mubr.msk.f32.gmra.mrb[26].mxu1 %vm72_vm0, %v49_v40  ;;  %v68_v40 = vsub.s32 1, %v1733_v46 }
  0x41   :  { %317 = vmatprep.mubr.f32.mxu0 %v1518_v3  ;;  %413 = vmatprep.mubr.f32.mxu1 %v1518_v3 }
  0x44   :  { %1259 = vmatmul.mubr.msk.f32.gmra.mrb[28].mxu0 %vm72_vm0, %v34_v41  ;;  %1275 = vmatmul.mubr.msk.f32.gmra.mrb[28].mxu1 %vm72_vm0, %v50_v42 }
  0x45   :  { %323 = vmatprep.mubr.f32.mxu0 %v1518_v3  ;;  %419 = vmatprep.mubr.f32.mxu1 %v1518_v3 }
  0x48   :  { %1260 = vmatmul.mubr.msk.f32.gmra.mrb[30].mxu0 %vm72_vm0, %v35_v43  ;;  %1276 = vmatmul.mubr.msk.f32.gmra.mrb[30].mxu1 %vm72_vm0, %v51_v44 }
  0xdf   :  { %v235_v50 = vpop.f32.mrb[0].mxu0  ;;  %v331_v51 = vpop.f32.mrb[0].mxu1 }
  0xe0   :  { %v1745_v52 = vadd.f32 %v235_v50, %v1742_v49  ;;  %v1747_v53 = vpop.f32.mrb[1].mxu0  ;;  %v1749_v54 = vpop.f32.mrb[1].mxu1  ;;  %v1752_v55 = vadd.f32 %v331_v51, %v1742_v49  ;;  %v1865_v50 = vrot.slane %v1739_v48, %v68_v40 }
  0xe2   :  { %426 = vadd.xlane.f32.xlu0 %v1745_v52  ;;  %2862 = vst [vmem:[#allocation7_spill] sm:$0xff] %v1865_v50 }
  0xe3   :  { %v337_v56 = vpop.f32.mrb[2].mxu1  ;;  %v241_v57 = vpop.f32.mrb[2].mxu0 }
  0xe4   :  { %v1756_v58 = vadd.f32 %v337_v56, %v1742_v49  ;;  %v1758_v59 = vpop.f32.mrb[3].mxu0  ;;  %v1760_v60 = vpop.f32.mrb[3].mxu1  ;;  %v1763_v61 = vadd.f32 %v241_v57, %v1742_v49 }
  0xe6   :  { %460 = vadd.xlane.f32.xlu1 %v1756_v58  ;;  %458 = vadd.xlane.f32.xlu0 %v1752_v55 }
  0xe7   :  { %v247_v62 = vpop.f32.mrb[4].mxu0  ;;  %v343_v63 = vpop.f32.mrb[4].mxu1 }
  0xe8   :  { %v1768_v0 = vadd.f32 %v247_v62, %v1742_v49  ;;  %v1770_v1 = vpop.f32.mrb[5].mxu0  ;;  %v1772_v2 = vpop.f32.mrb[5].mxu1  ;;  %v1777_v3 = vadd.f32 %v343_v63, %v1742_v49 }
  0xea   :  { %430 = vadd.xlane.f32.xlu1 %v1768_v0  ;;  %428 = vadd.xlane.f32.xlu0 %v1763_v61 }
  0xeb   :  { %v253_v4 = vpop.f32.mrb[6].mxu0  ;;  %v349_v5 = vpop.f32.mrb[6].mxu1 }
  0xec   :  { %v1780_v6 = vadd.f32 %v253_v4, %v1742_v49  ;;  %v1782_v7 = vpop.f32.mrb[7].mxu0  ;;  %v1784_v8 = vpop.f32.mrb[7].mxu1  ;;  %v1789_v9 = vadd.f32 %v349_v5, %v1742_v49 }
  0xee   :  { %432 = vadd.xlane.f32.xlu1 %v1780_v6  ;;  %462 = vadd.xlane.f32.xlu0 %v1777_v3 }
  0xef   :  { %v259_v10 = vpop.f32.mrb[8].mxu0  ;;  %v355_v11 = vpop.f32.mrb[8].mxu1 }
  0xf0   :  { %v1792_v12 = vadd.f32 %v259_v10, %v1742_v49  ;;  %v1794_v13 = vpop.f32.mrb[9].mxu0  ;;  %v1796_v14 = vpop.f32.mrb[9].mxu1  ;;  %v1801_v15 = vadd.f32 %v355_v11, %v1742_v49 }
  0xf2   :  { %464 = vadd.xlane.f32.xlu1 %v1789_v9  ;;  %434 = vadd.xlane.f32.xlu0 %v1792_v12 }
  0xf3   :  { %v265_v16 = vpop.f32.mrb[10].mxu0  ;;  %v361_v17 = vpop.f32.mrb[10].mxu1 }
  0xf4   :  { %v1804_v18 = vadd.f32 %v265_v16, %v1742_v49  ;;  %v1806_v19 = vpop.f32.mrb[11].mxu0  ;;  %v1808_v20 = vpop.f32.mrb[11].mxu1  ;;  %v1813_v21 = vadd.f32 %v361_v17, %v1742_v49 }
  0xf6   :  { %436 = vadd.xlane.f32.xlu1 %v1804_v18  ;;  %466 = vadd.xlane.f32.xlu0 %v1801_v15 }
  0xf7   :  { %v271_v22 = vpop.f32.mrb[12].mxu0  ;;  %v367_v23 = vpop.f32.mrb[12].mxu1 }
  0xf8   :  { %v1816_v24 = vadd.f32 %v271_v22, %v1742_v49  ;;  %v1818_v25 = vpop.f32.mrb[13].mxu0  ;;  %v1820_v26 = vpop.f32.mrb[13].mxu1  ;;  %v1825_v27 = vadd.f32 %v367_v23, %v1742_v49 }
  0xfa   :  { %468 = vadd.xlane.f32.xlu1 %v1813_v21  ;;  %438 = vadd.xlane.f32.xlu0 %v1816_v24 }
  0xfb   :  { %v277_v28 = vpop.f32.mrb[14].mxu0  ;;  %v373_v29 = vpop.f32.mrb[14].mxu1 }
  0xfc   :  { %v1828_v30 = vadd.f32 %v277_v28, %v1742_v49  ;;  %v1830_v31 = vpop.f32.mrb[15].mxu0  ;;  %v1832_v32 = vpop.f32.mrb[15].mxu1  ;;  %v1837_v33 = vadd.f32 %v373_v29, %v1742_v49 }
  0xfd   :  { %2857 = vst [vmem:[#allocation2_spill] sm:$0xff] %v1832_v32 }
  0xfe   :  { %440 = vadd.xlane.f32.xlu1 %v1828_v30  ;;  %470 = vadd.xlane.f32.xlu0 %v1825_v27 }
  0xff   :  { %v283_v34 = vpop.f32.mrb[16].mxu0  ;;  %v379_v35 = vpop.f32.mrb[16].mxu1 }
 0x100   :  { %v1840_v36 = vadd.f32 %v283_v34, %v1742_v49  ;;  %v1842_v37 = vpop.f32.mrb[17].mxu0  ;;  %v1844_v38 = vpop.f32.mrb[17].mxu1  ;;  %v1849_v39 = vadd.f32 %v379_v35, %v1742_v49 }
 0x101   :  { %2858 = vst [vmem:[#allocation3_spill] sm:$0xff] %v1842_v37  ;;  %2859 = vst [vmem:[#allocation4_spill] sm:$0xff] %v1844_v38 }
 0x102   :  { %472 = vadd.xlane.f32.xlu1 %v1837_v33  ;;  %442 = vadd.xlane.f32.xlu0 %v1840_v36 }
 0x103   :  { %v289_v41 = vpop.f32.mrb[18].mxu0  ;;  %v385_v42 = vpop.f32.mrb[18].mxu1 }
 0x104   :  { %v1853_v43 = vadd.f32 %v289_v41, %v1742_v49  ;;  %v1855_v44 = vpop.f32.mrb[19].mxu0  ;;  %v1857_v45 = vpop.f32.mrb[19].mxu1  ;;  %v1862_v47 = vadd.f32 %v385_v42, %v1742_v49 }
 0x105   :  { %2860 = vst [vmem:[#allocation5_spill] sm:$0xff] %v1855_v44  ;;  %2861 = vst [vmem:[#allocation6_spill] sm:$0xff] %v1857_v45 }
 0x106   :  { %444 = vadd.xlane.f32.xlu1 %v1853_v43  ;;  %474 = vadd.xlane.f32.xlu0 %v1849_v39 }
 0x107   :  { %v295_v46 = vpop.f32.mrb[20].mxu0  ;;  %v391_v51 = vpop.f32.mrb[20].mxu1 }
 0x108   :  { %v1868_v56 = vadd.f32 %v295_v46, %v1742_v49  ;;  %v1870_v57 = vpop.f32.mrb[21].mxu0  ;;  %v393_v62 = vpop.f32.mrb[21].mxu1  ;;  %v1878_v4 = vadd.f32 %v391_v51, %v1742_v49 }
 0x109   :  { %2863 = vst [vmem:[#allocation8_spill] sm:$0xff] %v1870_v57  ;;  %v1873_v63 = vadd.f32 %v393_v62, %v1865_v50 }
 0x10a   :  { %476 = vadd.xlane.f32.xlu1 %v1862_v47  ;;  %446 = vadd.xlane.f32.xlu0 %v1868_v56 }
 0x10b   :  { %2864 = vst [vmem:[#allocation9_spill] sm:$0xff] %v1873_v63  ;;  %v301_v48 = vpop.f32.mrb[22].mxu0  ;;  %v397_v5 = vpop.f32.mrb[22].mxu1 }
 0x10c   :  { %v1881_v10 = vadd.f32 %v301_v48, %v1742_v49  ;;  %v303_v11 = vpop.f32.mrb[23].mxu0  ;;  %v399_v16 = vpop.f32.mrb[23].mxu1  ;;  %v1892_v23 = vadd.f32 %v397_v5, %v1742_v49 }
 0x10d   :  { %v1884_v17 = vadd.f32 %v303_v11, %v1865_v50  ;;  %v1887_v22 = vadd.f32 %v399_v16, %v1865_v50 }
 0x10e   :  { %448 = vadd.xlane.f32.xlu1 %v1881_v10  ;;  %478 = vadd.xlane.f32.xlu0 %v1878_v4 }
 0x10f   :  { %2865 = vst [vmem:[#allocation10_spill] sm:$0xff] %v1884_v17  ;;  %2866 = vst [vmem:[#allocation11_spill] sm:$0xff] %v1887_v22  ;;  %v307_v28 = vpop.f32.mrb[24].mxu0  ;;  %v403_v29 = vpop.f32.mrb[24].mxu1 }
 0x110   :  { %v1895_v34 = vadd.f32 %v307_v28, %v1742_v49  ;;  %v309_v35 = vpop.f32.mrb[25].mxu0  ;;  %v405_v40 = vpop.f32.mrb[25].mxu1  ;;  %v1906_v46 = vadd.f32 %v403_v29, %v1742_v49 }
 0x111   :  { %v1898_v41 = vadd.f32 %v309_v35, %v1865_v50  ;;  %v1901_v42 = vadd.f32 %v405_v40, %v1865_v50 }
 0x112   :  { %480 = vadd.xlane.f32.xlu1 %v1892_v23  ;;  %450 = vadd.xlane.f32.xlu0 %v1895_v34 }
 0x113   :  { %2867 = vst [vmem:[#allocation12_spill] sm:$0xff] %v1898_v41  ;;  %2868 = vst [vmem:[#allocation13_spill] sm:$0xff] %v1901_v42  ;;  %v313_v51 = vpop.f32.mrb[26].mxu0  ;;  %v409_v62 = vpop.f32.mrb[26].mxu1 }
 0x114   :  { %v1909_v48 = vadd.f32 %v313_v51, %v1742_v49  ;;  %v315_v5 = vpop.f32.mrb[27].mxu0  ;;  %v411_v11 = vpop.f32.mrb[27].mxu1  ;;  %v1920_v29 = vadd.f32 %v409_v62, %v1742_v49 }
 0x115   :  { %v1912_v16 = vadd.f32 %v315_v5, %v1865_v50  ;;  %v1915_v28 = vadd.f32 %v411_v11, %v1865_v50 }
 0x116   :  { %452 = vadd.xlane.f32.xlu1 %v1909_v48  ;;  %482 = vadd.xlane.f32.xlu0 %v1906_v46 }
 0x117   :  { %2869 = vst [vmem:[#allocation14_spill] sm:$0xff] %v1912_v16  ;;  %2870 = vst [vmem:[#allocation15_spill] sm:$0xff] %v1915_v28  ;;  %v319_v35 = vpop.f32.mrb[28].mxu0  ;;  %v415_v40 = vpop.f32.mrb[28].mxu1 }
 0x118   :  { %v1923_v51 = vadd.f32 %v319_v35, %v1742_v49  ;;  %v321_v42 = vpop.f32.mrb[29].mxu0  ;;  %v417_v22 = vpop.f32.mrb[29].mxu1  ;;  %v1934_v62 = vadd.f32 %v415_v40, %v1742_v49 }
 0x119   :  { %v1926_v5 = vadd.f32 %v321_v42, %v1865_v50  ;;  %v1929_v11 = vadd.f32 %v417_v22, %v1865_v50 }
 0x11a   :  { %484 = vadd.xlane.f32.xlu1 %v1920_v29  ;;  %454 = vadd.xlane.f32.xlu0 %v1923_v51 }
 0x11b   :  { %2871 = vst [vmem:[#allocation16_spill] sm:$0xff] %v1926_v5  ;;  %2872 = vst [vmem:[#allocation17_spill] sm:$0xff] %v1929_v11  ;;  %v325_v28 = vpop.f32.mrb[30].mxu0  ;;  %v421_v16 = vpop.f32.mrb[30].mxu1 }
 0x11c   :  { %v1937_v35 = vadd.f32 %v325_v28, %v1742_v49  ;;  %v327_v41 = vpop.f32.mrb[31].mxu0  ;;  %v1940_v17 = vadd.f32 %v421_v16, %v1742_v49  ;;  %v423_v42 = vpop.f32.mrb[31].mxu1 }
 0x11d   :  { %v1943_v22 = vadd.f32 %v327_v41, %v1865_v50  ;;  %v1946_v11 = vadd.f32 %v423_v42, %v1865_v50 }
 0x11e   :  { %456 = vadd.xlane.f32.xlu1 %v1937_v35  ;;  %486 = vadd.xlane.f32.xlu0 %v1934_v62 }
 0x11f   :  { %2873 = vst [vmem:[#allocation18_spill] sm:$0xff] %v1943_v22  ;;  %2874 = vst [vmem:[#allocation19_spill] sm:$0xff] %v1946_v11 }
 0x122   :  { %488 = vadd.xlane.f32.xlu1 %v1940_v17 }
 0x16f   :  { %v427_v40 = vpop.xlane.xlu0 %426 }
 0x170   :  { %v1951_v28 = vmul.f32 0.015625, %v427_v40 }
 0x172   :  { %v1955_v49 = vsub.f32 %v1745_v52, %v1951_v28 }
 0x173   :  { %v461_v16 = vpop.xlane.xlu1 %460  ;;  %v459_v5 = vpop.xlane.xlu0 %458 }
 0x174   :  { %v1957_v41 = vmul.f32 0.015625, %v459_v5  ;;  %v554_v42 = vmul.f32 %v1955_v49, %v1955_v49  ;;  %v1971_v57 = vmul.f32 0.015625, %v461_v16 }
 0x176   :  { %v1963_v11 = vsub.f32 %v1752_v55, %v1957_v41  ;;  %586 = vadd.xlane.f32.xlu0 %v554_v42  ;;  %v1989_v38 = vsub.f32 %v1756_v58, %v1971_v57 }
 0x177   :  { %v431_v22 = vpop.xlane.xlu1 %430  ;;  %v429_v63 = vpop.xlane.xlu0 %428 }
 0x178   :  { %v1965_v40 = vmul.f32 0.015625, %v431_v22  ;;  %v1967_v45 = vmul.f32 0.015625, %v429_v63  ;;  %v570_v52 = vmul.f32 %v1963_v11, %v1963_v11  ;;  %2876 = vst [vmem:[#allocation21_spill] sm:$0xff] %v1989_v38 }
 0x17a   :  { %v1975_v5 = vsub.f32 %v1768_v0, %v1965_v40  ;;  %v1979_v55 = vsub.f32 %v1763_v61, %v1967_v45  ;;  %618 = vadd.xlane.f32.xlu0 %v570_v52 }
 0x17b   :  { %v433_v42 = vpop.xlane.xlu1 %432  ;;  %v463_v44 = vpop.xlane.xlu0 %462 }
 0x17c   :  { %2875 = vst [vmem:[#allocation20_spill] sm:$0xff] %v1979_v55  ;;  %v1981_v22 = vmul.f32 0.015625, %v463_v44  ;;  %v556_v63 = vmul.f32 %v1975_v5, %v1975_v5  ;;  %v555_v16 = vmul.f32 %v1979_v55, %v1979_v55  ;;  %v1991_v0 = vmul.f32 0.015625, %v433_v42 }
 0x17d   :  { %v571_v42 = vmul.f32 %v1989_v38, %v1989_v38 }
 0x17e   :  { %v1995_v61 = vsub.f32 %v1777_v3, %v1981_v22  ;;  %590 = vadd.xlane.f32.xlu0 %v556_v63  ;;  %588 = vadd.xlane.f32.xlu1 %v555_v16  ;;  %v2003_v55 = vsub.f32 %v1780_v6, %v1991_v0 }
 0x17f   :  { %v465_v44 = vpop.xlane.xlu1 %464  ;;  %v435_v52 = vpop.xlane.xlu0 %434 }
 0x180   :  { %2877 = vst [vmem:[#allocation22_spill] sm:$0xff] %v1995_v61  ;;  %v1997_v32 = vmul.f32 0.015625, %v435_v52  ;;  %v572_v37 = vmul.f32 %v1995_v61, %v1995_v61  ;;  %2878 = vst [vmem:[#allocation23_spill] sm:$0xff] %v2003_v55  ;;  %v2005_v58 = vmul.f32 0.015625, %v465_v44  ;;  %v557_v38 = vmul.f32 %v2003_v55, %v2003_v55 }
 0x182   :  { %v2011_v3 = vsub.f32 %v1792_v12, %v1997_v32  ;;  %622 = vadd.xlane.f32.xlu0 %v572_v37  ;;  %620 = vadd.xlane.f32.xlu1 %v571_v42  ;;  %v2019_v6 = vsub.f32 %v1789_v9, %v2005_v58 }
 0x183   :  { %v437_v63 = vpop.xlane.xlu1 %436  ;;  %v467_v16 = vpop.xlane.xlu0 %466 }
 0x184   :  { %2879 = vst [vmem:[#allocation24_spill] sm:$0xff] %v2011_v3  ;;  %v2013_v52 = vmul.f32 0.015625, %v467_v16  ;;  %v558_v61 = vmul.f32 %v2011_v3, %v2011_v3  ;;  %2880 = vst [vmem:[#allocation25_spill] sm:$0xff] %v2019_v6  ;;  %v2021_v44 = vmul.f32 0.015625, %v437_v63  ;;  %v573_v55 = vmul.f32 %v2019_v6, %v2019_v6 }
 0x186   :  { %v2027_v12 = vsub.f32 %v1801_v15, %v2013_v52  ;;  %594 = vadd.xlane.f32.xlu0 %v558_v61  ;;  %592 = vadd.xlane.f32.xlu1 %v557_v38  ;;  %v2035_v9 = vsub.f32 %v1804_v18, %v2021_v44 }
 0x187   :  { %v469_v37 = vpop.xlane.xlu1 %468  ;;  %v439_v42 = vpop.xlane.xlu0 %438 }
 0x188   :  { %2881 = vst [vmem:[#allocation26_spill] sm:$0xff] %v2027_v12  ;;  %v2029_v16 = vmul.f32 0.015625, %v439_v42  ;;  %v574_v3 = vmul.f32 %v2027_v12, %v2027_v12  ;;  %2882 = vst [vmem:[#allocation27_spill] sm:$0xff] %v2035_v9  ;;  %v2037_v63 = vmul.f32 0.015625, %v469_v37  ;;  %v559_v6 = vmul.f32 %v2035_v9, %v2035_v9 }
 0x18a   :  { %v2043_v15 = vsub.f32 %v1816_v24, %v2029_v16  ;;  %626 = vadd.xlane.f32.xlu0 %v574_v3  ;;  %624 = vadd.xlane.f32.xlu1 %v573_v55  ;;  %v2051_v18 = vsub.f32 %v1813_v21, %v2037_v63 }
 0x18b   :  { %v441_v38 = vpop.xlane.xlu1 %440  ;;  %v471_v61 = vpop.xlane.xlu0 %470 }
 0x18c   :  { %2883 = vst [vmem:[#allocation28_spill] sm:$0xff] %v2043_v15  ;;  %v2045_v42 = vmul.f32 0.015625, %v471_v61  ;;  %v560_v12 = vmul.f32 %v2043_v15, %v2043_v15  ;;  %2884 = vst [vmem:[#allocation29_spill] sm:$0xff] %v2051_v18  ;;  %v2053_v37 = vmul.f32 0.015625, %v441_v38  ;;  %v575_v9 = vmul.f32 %v2051_v18, %v2051_v18 }
 0x18e   :  { %v2059_v24 = vsub.f32 %v1825_v27, %v2045_v42  ;;  %598 = vadd.xlane.f32.xlu0 %v560_v12  ;;  %596 = vadd.xlane.f32.xlu1 %v559_v6  ;;  %v2067_v21 = vsub.f32 %v1828_v30, %v2053_v37 }
 0x18f   :  { %v473_v55 = vpop.xlane.xlu1 %472  ;;  %v443_v3 = vpop.xlane.xlu0 %442 }
 0x190   :  { %2885 = vst [vmem:[#allocation30_spill] sm:$0xff] %v2059_v24  ;;  %v2061_v61 = vmul.f32 0.015625, %v443_v3  ;;  %v576_v15 = vmul.f32 %v2059_v24, %v2059_v24  ;;  %2886 = vst [vmem:[#allocation31_spill] sm:$0xff] %v2067_v21  ;;  %v2069_v38 = vmul.f32 0.015625, %v473_v55  ;;  %v561_v18 = vmul.f32 %v2067_v21, %v2067_v21 }
 0x192   :  { %v2075_v27 = vsub.f32 %v1840_v36, %v2061_v61  ;;  %630 = vadd.xlane.f32.xlu0 %v576_v15  ;;  %628 = vadd.xlane.f32.xlu1 %v575_v9  ;;  %v2083_v30 = vsub.f32 %v1837_v33, %v2069_v38 }
 0x193   :  { %v445_v6 = vpop.xlane.xlu1 %444  ;;  %v475_v12 = vpop.xlane.xlu0 %474 }
 0x194   :  { %2887 = vst [vmem:[#allocation32_spill] sm:$0xff] %v2075_v27  ;;  %v2077_v3 = vmul.f32 0.015625, %v475_v12  ;;  %v562_v24 = vmul.f32 %v2075_v27, %v2075_v27  ;;  %2888 = vst [vmem:[#allocation33_spill] sm:$0xff] %v2083_v30  ;;  %v2085_v55 = vmul.f32 0.015625, %v445_v6  ;;  %v577_v21 = vmul.f32 %v2083_v30, %v2083_v30 }
 0x196   :  { %v2091_v36 = vsub.f32 %v1849_v39, %v2077_v3  ;;  %602 = vadd.xlane.f32.xlu0 %v562_v24  ;;  %600 = vadd.xlane.f32.xlu1 %v561_v18  ;;  %v2099_v33 = vsub.f32 %v1853_v43, %v2085_v55 }
 0x197   :  { %v477_v9 = vpop.xlane.xlu1 %476  ;;  %v447_v15 = vpop.xlane.xlu0 %446 }
 0x198   :  { %2889 = vst [vmem:[#allocation34_spill] sm:$0xff] %v2091_v36  ;;  %v2093_v12 = vmul.f32 0.015625, %v447_v15  ;;  %v578_v27 = vmul.f32 %v2091_v36, %v2091_v36  ;;  %2890 = vst [vmem:[#allocation35_spill] sm:$0xff] %v2099_v33  ;;  %v2101_v6 = vmul.f32 0.015625, %v477_v9  ;;  %v563_v30 = vmul.f32 %v2099_v33, %v2099_v33 }
 0x19a   :  { %v2107_v39 = vsub.f32 %v1868_v56, %v2093_v12  ;;  %634 = vadd.xlane.f32.xlu0 %v578_v27  ;;  %632 = vadd.xlane.f32.xlu1 %v577_v21  ;;  %v2115_v43 = vsub.f32 %v1862_v47, %v2101_v6 }
 0x19b   :  { %v449_v18 = vpop.xlane.xlu1 %448  ;;  %v479_v24 = vpop.xlane.xlu0 %478 }
 0x19c   :  { %2891 = vst [vmem:[#allocation36_spill] sm:$0xff] %v2107_v39  ;;  %v2109_v15 = vmul.f32 0.015625, %v479_v24  ;;  %v564_v36 = vmul.f32 %v2107_v39, %v2107_v39  ;;  %2892 = vst [vmem:[#allocation37_spill] sm:$0xff] %v2115_v43  ;;  %v2117_v9 = vmul.f32 0.015625, %v449_v18  ;;  %v579_v33 = vmul.f32 %v2115_v43, %v2115_v43 }
 0x19e   :  { %v2123_v56 = vsub.f32 %v1878_v4, %v2109_v15  ;;  %606 = vadd.xlane.f32.xlu0 %v564_v36  ;;  %604 = vadd.xlane.f32.xlu1 %v563_v30  ;;  %v2131_v47 = vsub.f32 %v1881_v10, %v2117_v9 }
 0x19f   :  { %v481_v21 = vpop.xlane.xlu1 %480  ;;  %v451_v27 = vpop.xlane.xlu0 %450 }
 0x1a0   :  { %2893 = vst [vmem:[#allocation38_spill] sm:$0xff] %v2123_v56  ;;  %v2125_v24 = vmul.f32 0.015625, %v451_v27  ;;  %v580_v39 = vmul.f32 %v2123_v56, %v2123_v56  ;;  %2894 = vst [vmem:[#allocation39_spill] sm:$0xff] %v2131_v47  ;;  %v2133_v18 = vmul.f32 0.015625, %v481_v21  ;;  %v565_v43 = vmul.f32 %v2131_v47, %v2131_v47 }
 0x1a2   :  { %v2139_v4 = vsub.f32 %v1895_v34, %v2125_v24  ;;  %638 = vadd.xlane.f32.xlu0 %v580_v39  ;;  %636 = vadd.xlane.f32.xlu1 %v579_v33  ;;  %v2147_v10 = vsub.f32 %v1892_v23, %v2133_v18 }
 0x1a3   :  { %v453_v30 = vpop.xlane.xlu1 %452  ;;  %v483_v36 = vpop.xlane.xlu0 %482 }
 0x1a4   :  { %2895 = vst [vmem:[#allocation40_spill] sm:$0xff] %v2139_v4  ;;  %v2141_v27 = vmul.f32 0.015625, %v483_v36  ;;  %v566_v56 = vmul.f32 %v2139_v4, %v2139_v4  ;;  %2896 = vst [vmem:[#allocation41_spill] sm:$0xff] %v2147_v10  ;;  %v2149_v21 = vmul.f32 0.015625, %v453_v30  ;;  %v581_v47 = vmul.f32 %v2147_v10, %v2147_v10 }
 0x1a6   :  { %v2155_v34 = vsub.f32 %v1906_v46, %v2141_v27  ;;  %610 = vadd.xlane.f32.xlu0 %v566_v56  ;;  %608 = vadd.xlane.f32.xlu1 %v565_v43  ;;  %v2163_v23 = vsub.f32 %v1909_v48, %v2149_v21 }
 0x1a7   :  { %v485_v33 = vpop.xlane.xlu1 %484  ;;  %v455_v39 = vpop.xlane.xlu0 %454 }
 0x1a8   :  { %2897 = vst [vmem:[#allocation42_spill] sm:$0xff] %v2155_v34  ;;  %v2157_v36 = vmul.f32 0.015625, %v455_v39  ;;  %v582_v4 = vmul.f32 %v2155_v34, %v2155_v34  ;;  %2898 = vst [vmem:[#allocation43_spill] sm:$0xff] %v2163_v23  ;;  %v2165_v30 = vmul.f32 0.015625, %v485_v33  ;;  %v567_v10 = vmul.f32 %v2163_v23, %v2163_v23 }
 0x1aa   :  { %v2171_v46 = vsub.f32 %v1923_v51, %v2157_v36  ;;  %642 = vadd.xlane.f32.xlu0 %v582_v4  ;;  %640 = vadd.xlane.f32.xlu1 %v581_v47  ;;  %v2179_v48 = vsub.f32 %v1920_v29, %v2165_v30 }
 0x1ab   :  { %v457_v43 = vpop.xlane.xlu1 %456  ;;  %v487_v56 = vpop.xlane.xlu0 %486 }
 0x1ac   :  { %2899 = vst [vmem:[#allocation44_spill] sm:$0xff] %v2171_v46  ;;  %v2173_v39 = vmul.f32 0.015625, %v487_v56  ;;  %v568_v34 = vmul.f32 %v2171_v46, %v2171_v46  ;;  %2900 = vst [vmem:[#allocation45_spill] sm:$0xff] %v2179_v48  ;;  %v2181_v33 = vmul.f32 0.015625, %v457_v43  ;;  %v583_v43 = vmul.f32 %v2179_v48, %v2179_v48 }
 0x1ae   :  { %v2187_v51 = vsub.f32 %v1934_v62, %v2173_v39  ;;  %614 = vadd.xlane.f32.xlu0 %v568_v34  ;;  %612 = vadd.xlane.f32.xlu1 %v567_v10  ;;  %v2193_v56 = vsub.f32 %v1937_v35, %v2181_v33  ;;  %v650_v35 = vmul.f32 %v1951_v28, %v1951_v28 }
 0x1af   :  { %v489_v47 = vpop.xlane.xlu1 %488  ;;  %v2245_v28 = vadd.f32 %v1794_v13, %v1865_v50  ;;  %v652_v13 = vmul.f32 %v1965_v40, %v1965_v40  ;;  %v654_v40 = vmul.f32 %v1997_v32, %v1997_v32  ;;  %v671_v32 = vmul.f32 %v2037_v63, %v2037_v63 }
 0x1b0   :  { %2901 = vst [vmem:[#allocation46_spill] sm:$0xff] %v2187_v51  ;;  %v584_v4 = vmul.f32 %v2187_v51, %v2187_v51  ;;  %2902 = vst [vmem:[#allocation47_spill] sm:$0xff] %v2193_v56  ;;  %v2195_v29 = vmul.f32 0.015625, %v489_v47  ;;  %v569_v10 = vmul.f32 %v2193_v56, %v2193_v56  ;;  %v2211_v47 = vadd.f32 %v1747_v53, %v1865_v50 }
 0x1b1   :  { %v2231_v53 = vadd.f32 %v1782_v7, %v1865_v50  ;;  %v667_v7 = vmul.f32 %v1971_v57, %v1971_v57  ;;  %v2271_v57 = vadd.f32 %v1820_v26, %v1865_v50  ;;  %v669_v56 = vmul.f32 %v2005_v58, %v2005_v58 }
 0x1b2   :  { %2903 = vst [vmem:[#allocation48_spill] sm:$0xff] %v2195_v29  ;;  %646 = vadd.xlane.f32.xlu0 %v584_v4  ;;  %644 = vadd.xlane.f32.xlu1 %v583_v43  ;;  %v2201_v62 = vsub.f32 %v1940_v17, %v2195_v29  ;;  %v2215_v4 = vadd.f32 %v1749_v54, %v1865_v50  ;;  %v684_v48 = vmul.f32 64.0, %v652_v13 }
 0x1b3   :  { %v2219_v17 = vadd.f32 %v1758_v59, %v1865_v50  ;;  %v2223_v43 = vadd.f32 %v1760_v60, %v1865_v50  ;;  %v2235_v54 = vadd.f32 %v1772_v2, %v1865_v50  ;;  %v2239_v59 = vadd.f32 %v1784_v8, %v1865_v50  ;;  %2905 = vst [vmem:[#allocation50_spill] sm:$0xff] %v2271_v57 }
 0x1b4   :  { %2904 = vst [vmem:[#allocation49_spill] sm:$0xff] %v2201_v62  ;;  %v585_v34 = vmul.f32 %v2201_v62, %v2201_v62  ;;  %v666_v60 = vmul.f32 %v1957_v41, %v1957_v41  ;;  %v682_v2 = vmul.f32 64.0, %v650_v35  ;;  %v2259_v8 = vadd.f32 %v1808_v20, %v1865_v50 }
 0x1b5   :  { %v651_v41 = vmul.f32 %v1967_v45, %v1967_v45  ;;  %v2267_v62 = vadd.f32 %v1818_v25, %v1865_v50  ;;  %v2277_v35 = vadd.f32 %v1830_v31, %v1865_v50  ;;  %v653_v45 = vmul.f32 %v1991_v0, %v1991_v0 }
 0x1b6   :  { %616 = vadd.xlane.f32.xlu1 %v569_v10  ;;  %v2227_v10 = vadd.f32 %v1770_v1, %v1865_v50  ;;  %v2249_v1 = vadd.f32 %v1796_v14, %v1865_v50  ;;  %v698_v25 = vmul.f32 64.0, %v666_v60  ;;  %v670_v26 = vmul.f32 %v2013_v52, %v2013_v52 }
 0x1b7   :  { %2906 = vst [vmem:[#allocation51_spill] sm:$0xff] %v2277_v35  ;;  %v656_v31 = vmul.f32 %v2029_v16, %v2029_v16  ;;  %v683_v0 = vmul.f32 64.0, %v651_v41  ;;  %v657_v52 = vmul.f32 %v2053_v37, %v2053_v37  ;;  %v2301_v41 = vmul.f32 64.0, %v669_v56 }
 0x1b8   :  { %v2303_v13 = vmul.f32 64.0, %v670_v26  ;;  %v673_v63 = vmul.f32 %v2069_v38, %v2069_v38  ;;  %v659_v26 = vmul.f32 %v2085_v55, %v2085_v55 }
 0x1ba   :  { %648 = vadd.xlane.f32.xlu1 %v585_v34  ;;  %v2255_v34 = vadd.f32 %v1806_v19, %v1865_v50  ;;  %v668_v19 = vmul.f32 %v1981_v22, %v1981_v22  ;;  %v699_v22 = vmul.f32 64.0, %v667_v7  ;;  %v672_v7 = vmul.f32 %v2045_v42, %v2045_v42 }
 0x1bb   :  { %v2311_v42 = vmul.f32 64.0, %v656_v31  ;;  %v660_v31 = vmul.f32 %v2093_v12, %v2093_v12  ;;  %v2331_v55 = vmul.f32 64.0, %v673_v63  ;;  %v662_v12 = vmul.f32 %v2125_v24, %v2125_v24 }
 0x1bc   :  { %v700_v58 = vmul.f32 64.0, %v668_v19  ;;  %v678_v24 = vmul.f32 %v2141_v27, %v2141_v27  ;;  %v663_v27 = vmul.f32 %v2149_v21, %v2149_v21  ;;  %v679_v21 = vmul.f32 %v2165_v30, %v2165_v30 }
 0x203   :  { %v587_v14 = vpop.xlane.xlu0 %586 }
 0x204   :  { %v714_v20 = vsub.f32 %v587_v14, %v682_v2  ;;  %v655_v2 = vmul.f32 %v2021_v44, %v2021_v44  ;;  %v2299_v44 = vmul.f32 64.0, %v654_v40 }
 0x206   :  { %v746_v51 = vmul.f32 0.015625, %v714_v20  ;;  %v2297_v20 = vmul.f32 64.0, %v653_v45  ;;  %v2309_v19 = vmul.f32 64.0, %v655_v2  ;;  %v674_v45 = vmul.f32 %v2077_v3, %v2077_v3 }
 0x207   :  { %v619_v14 = vpop.xlane.xlu0 %618  ;;  %v675_v2 = vmul.f32 %v2101_v6, %v2101_v6 }
 0x208   :  { %v778_v60 = vadd.f32 1e-05, %v746_v51  ;;  %v730_v50 = vsub.f32 %v619_v14, %v698_v25  ;;  %v658_v51 = vmul.f32 %v2061_v61, %v2061_v61  ;;  %v2315_v25 = vmul.f32 64.0, %v671_v32 }
 0x209   :  { %v2319_v14 = vmul.f32 64.0, %v672_v7  ;;  %v2321_v61 = vmul.f32 64.0, %v657_v52  ;;  %v2343_v63 = vmul.f32 64.0, %v675_v2 }
 0x20a   :  { %1324 = vrsqrt.f32 %v778_v60  ;;  %v762_v16 = vmul.f32 0.015625, %v730_v50 }
 0x20b   :  { %v591_v37 = vpop.xlane.xlu0 %590  ;;  %v589_v50 = vpop.xlane.xlu1 %588 }
 0x20c   :  { %v794_v40 = vadd.f32 1e-05, %v762_v16  ;;  %v716_v56 = vsub.f32 %v591_v37, %v684_v48  ;;  %v715_v38 = vsub.f32 %v589_v50, %v683_v0  ;;  %v676_v48 = vmul.f32 %v2109_v15, %v2109_v15 }
 0x20d   :  { %v2329_v16 = vmul.f32 64.0, %v658_v51  ;;  %v661_v0 = vmul.f32 %v2117_v9, %v2117_v9  ;;  %v2335_v37 = vmul.f32 64.0, %v674_v45  ;;  %v2339_v15 = vmul.f32 64.0, %v659_v26 }
 0x20e   :  { %1326 = vrsqrt.f32 %v794_v40  ;;  %v748_v3 = vmul.f32 0.015625, %v716_v56  ;;  %v747_v32 = vmul.f32 0.015625, %v715_v38  ;;  %v2341_v56 = vmul.f32 64.0, %v660_v31 }
 0x20f   :  { %v623_v60 = vpop.xlane.xlu0 %622  ;;  %v621_v7 = vpop.xlane.xlu1 %620  ;;  %v677_v9 = vmul.f32 %v2133_v18, %v2133_v18  ;;  %v2347_v38 = vmul.f32 64.0, %v676_v48 }
 0x210   :  { %v780_v52 = vadd.f32 1e-05, %v748_v3  ;;  %v732_v6 = vsub.f32 %v623_v60, %v700_v58  ;;  %v779_v40 = vadd.f32 1e-05, %v747_v32  ;;  %v731_v50 = vsub.f32 %v621_v7, %v699_v22  ;;  %v2354_v22 = vld [vmem:[%s2822_s3] ss:$0 sm:$0xff] }
 0x211   :  { %v2357_v32 = vmul.f32 64.0, %v661_v0  ;;  %v664_v7 = vmul.f32 %v2157_v36, %v2157_v36 }
 0x212   :  { %1328 = vrsqrt.f32 %v780_v52  ;;  %v764_v51 = vmul.f32 0.015625, %v732_v6  ;;  %v763_v58 = vmul.f32 0.015625, %v731_v50  ;;  %v2361_v52 = vmul.f32 64.0, %v662_v12  ;;  %v2370_v6 = vld [vmem:[%s2823_s4] ss:$0 sm:$0xff] }
 0x213   :  { %1330 = vrsqrt.f32 %v779_v40  ;;  %v595_v45 = vpop.xlane.xlu0 %594  ;;  %v593_v2 = vpop.xlane.xlu1 %592  ;;  %v2373_v12 = vmul.f32 64.0, %v677_v9 }
 0x214   :  { %v1325_v3 = vpop.eup %1324  ;;  %v796_v26 = vadd.f32 1e-05, %v764_v51  ;;  %v718_v31 = vsub.f32 %v595_v45, %v2299_v44  ;;  %v795_v60 = vadd.f32 1e-05, %v763_v58  ;;  %v717_v48 = vsub.f32 %v593_v2, %v2297_v20 }
 0x215   :  { %v842_v18 = vmul.f32 %v1325_v3, %v1955_v49  ;;  %v2378_v58 = vmul.f32 64.0, %v678_v24 }
 0x216   :  { %1332 = vrsqrt.f32 %v796_v26  ;;  %v750_v44 = vmul.f32 0.015625, %v718_v31  ;;  %v749_v0 = vmul.f32 0.015625, %v717_v48  ;;  %v2385_v31 = vmul.f32 64.0, %v663_v27 }
 0x217   :  { %v881_v49 = vmul.f32 %v2354_v22, %v842_v18  ;;  %1334 = vrsqrt.f32 %v795_v60  ;;  %v627_v20 = vpop.xlane.xlu0 %626  ;;  %v625_v36 = vpop.xlane.xlu1 %624  ;;  %v2387_v18 = vmul.f32 64.0, %v664_v7  ;;  %v2396_v27 = vmul.f32 64.0, %v679_v21 }
 0x218   :  { %v1327_v40 = vpop.eup %1326  ;;  %v782_v50 = vadd.f32 1e-05, %v750_v44  ;;  %v734_v51 = vsub.f32 %v627_v20, %v2303_v13  ;;  %v781_v26 = vadd.f32 1e-05, %v749_v0  ;;  %v733_v2 = vsub.f32 %v625_v36, %v2301_v41 }
 0x219   :  { %v2381_v45 = vadd.f32 %v2370_v6, %v881_v49  ;;  %v858_v3 = vmul.f32 %v1327_v40, %v1963_v11  ;;  %v2393_v11 = vmul.f32 %v2181_v33, %v2181_v33 }
 0x21a   :  { %1336 = vrsqrt.f32 %v782_v50  ;;  %v766_v9 = vmul.f32 0.015625, %v734_v51  ;;  %v765_v24 = vmul.f32 0.015625, %v733_v2  ;;  %v2907_v50 = vld [vmem:[#allocation20_spill] sm:$0xff] }
 0x21b   :  { %v1279_v30 = vmul.f32 -1.442695, %v2381_v45  ;;  %v897_v13 = vmul.f32 %v2354_v22, %v858_v3  ;;  %1338 = vrsqrt.f32 %v781_v26  ;;  %v599_v60 = vpop.xlane.xlu0 %598  ;;  %v597_v41 = vpop.xlane.xlu1 %596  ;;  %v2406_v3 = vmul.f32 %v2173_v39, %v2173_v39  ;;  %v2908_v39 = vld [vmem:[#allocation22_spill] sm:$0xff] }
 0x21c   :  { %v1329_v48 = vpop.eup %1328  ;;  %v798_v44 = vadd.f32 1e-05, %v766_v9  ;;  %v720_v49 = vsub.f32 %v599_v60, %v2311_v42  ;;  %v797_v40 = vadd.f32 1e-05, %v765_v24  ;;  %v719_v33 = vsub.f32 %v597_v41, %v2309_v19 }
 0x21d   :  { %v1331_v7 = vpop.eup %1330  ;;  %1340 = vpow2.f32 %v1279_v30  ;;  %v2399_v0 = vadd.f32 %v2370_v6, %v897_v13  ;;  %v844_v20 = vmul.f32 %v1329_v48, %v1975_v5 }
 0x21e   :  { %v843_v36 = vmul.f32 %v1331_v7, %v2907_v50  ;;  %1342 = vrsqrt.f32 %v798_v44  ;;  %v752_v51 = vmul.f32 0.015625, %v720_v49  ;;  %v751_v9 = vmul.f32 0.015625, %v719_v33  ;;  %v2909_v49 = vld [vmem:[#allocation21_spill] sm:$0xff] }
 0x21f   :  { %v1295_v42 = vmul.f32 -1.442695, %v2399_v0  ;;  %v883_v21 = vmul.f32 %v2354_v22, %v844_v20  ;;  %1344 = vrsqrt.f32 %v797_v40  ;;  %v631_v26 = vpop.xlane.xlu0 %630  ;;  %v629_v13 = vpop.xlane.xlu1 %628 }
 0x220   :  { %v1333_v2 = vpop.eup %1332  ;;  %v882_v5 = vmul.f32 %v2354_v22, %v843_v36  ;;  %v784_v30 = vadd.f32 1e-05, %v752_v51  ;;  %v736_v24 = vsub.f32 %v631_v26, %v2319_v14  ;;  %v735_v44 = vsub.f32 %v629_v13, %v2315_v25 }
 0x221   :  { %v1335_v19 = vpop.eup %1334  ;;  %1346 = vpow2.f32 %v1295_v42  ;;  %v2413_v60 = vadd.f32 %v2370_v6, %v883_v21  ;;  %v860_v48 = vmul.f32 %v1333_v2, %v2908_v39  ;;  %v783_v20 = vadd.f32 1e-05, %v751_v9  ;;  %v2910_v9 = vld [vmem:[#allocation24_spill] sm:$0xff] }
 0x222   :  { %v2418_v41 = vadd.f32 %v2370_v6, %v882_v5  ;;  %v859_v7 = vmul.f32 %v1335_v19, %v2909_v49  ;;  %1348 = vrsqrt.f32 %v784_v30  ;;  %v767_v50 = vmul.f32 0.015625, %v735_v44  ;;  %v2911_v19 = vld [vmem:[#allocation23_spill] sm:$0xff] }
 0x223   :  { %v1281_v40 = vmul.f32 -1.442695, %v2413_v60  ;;  %v899_v14 = vmul.f32 %v2354_v22, %v860_v48  ;;  %v768_v36 = vmul.f32 0.015625, %v736_v24  ;;  %v603_v33 = vpop.xlane.xlu0 %602  ;;  %1350 = vrsqrt.f32 %v783_v20  ;;  %v601_v25 = vpop.xlane.xlu1 %600 }
 0x224   :  { %v1337_v51 = vpop.eup %1336  ;;  %v1280_v42 = vmul.f32 -1.442695, %v2418_v41  ;;  %v898_v21 = vmul.f32 %v2354_v22, %v859_v7  ;;  %v722_v26 = vsub.f32 %v603_v33, %v2329_v16  ;;  %v799_v13 = vadd.f32 1e-05, %v767_v50 }
 0x225   :  { %v1339_v2 = vpop.eup %1338  ;;  %1352 = vpow2.f32 %v1281_v40  ;;  %v2427_v5 = vadd.f32 %v2370_v6, %v899_v14  ;;  %v846_v30 = vmul.f32 %v1337_v51, %v2910_v9  ;;  %v800_v48 = vadd.f32 1e-05, %v768_v36 }
 0x226   :  { %1354 = vpow2.f32 %v1280_v42  ;;  %v2431_v24 = vadd.f32 %v2370_v6, %v898_v21  ;;  %v845_v39 = vmul.f32 %v1339_v2, %v2911_v19  ;;  %v721_v7 = vsub.f32 %v601_v25, %v2321_v61  ;;  %v2912_v42 = vld [vmem:[#allocation26_spill] sm:$0xff]  ;;  %v2913_v25 = vld [vmem:[#allocation25_spill] sm:$0xff] }
 0x227   :  { %v1341_v44 = vpop.eup %1340  ;;  %v1297_v49 = vmul.f32 -1.442695, %v2427_v5  ;;  %v885_v16 = vmul.f32 %v2354_v22, %v846_v30  ;;  %1356 = vrsqrt.f32 %v799_v13  ;;  %v633_v33 = vpop.xlane.xlu1 %632  ;;  %v754_v13 = vmul.f32 0.015625, %v722_v26  ;;  %v2914_v26 = vld [vmem:[#allocation28_spill] sm:$0xff] }
 0x228   :  { %v1343_v20 = vpop.eup %1342  ;;  %v1048_v40 = vadd.f32 1.0, %v1341_v44  ;;  %v1296_v14 = vmul.f32 -1.442695, %v2431_v24  ;;  %v884_v50 = vmul.f32 %v2354_v22, %v845_v39  ;;  %1358 = vrsqrt.f32 %v800_v48  ;;  %v635_v9 = vpop.xlane.xlu0 %634 }
 0x229   :  { %v1345_v51 = vpop.eup %1344  ;;  %1360 = vpow2.f32 %v1297_v49  ;;  %v2440_v36 = vadd.f32 %v2370_v6, %v885_v16  ;;  %v862_v21 = vmul.f32 %v1343_v20, %v2912_v42  ;;  %v753_v2 = vmul.f32 0.015625, %v721_v7 }
 0x22a   :  { %1362 = vrcp.f32 %v1048_v40  ;;  %v2444_v61 = vadd.f32 %v2370_v6, %v884_v50  ;;  %v861_v30 = vmul.f32 %v1345_v51, %v2913_v25  ;;  %v2451_v40 = vadd.f32 1e-05, %v754_v13 }
 0x22b   :  { %v1347_v19 = vpop.eup %1346  ;;  %1364 = vpow2.f32 %v1296_v14  ;;  %v1283_v39 = vmul.f32 -1.442695, %v2440_v36  ;;  %v901_v48 = vmul.f32 %v2354_v22, %v862_v21  ;;  %v785_v44 = vadd.f32 1e-05, %v753_v2  ;;  %v605_v50 = vpop.xlane.xlu1 %604 }
 0x22c   :  { %v1349_v49 = vpop.eup %1348  ;;  %v1064_v16 = vadd.f32 1.0, %v1347_v19  ;;  %v1282_v20 = vmul.f32 -1.442695, %v2444_v61  ;;  %v900_v7 = vmul.f32 %v2354_v22, %v861_v30  ;;  %v737_v42 = vsub.f32 %v633_v33, %v2331_v55 }
 0x22d   :  { %1366 = vpow2.f32 %v1283_v39  ;;  %v2454_v51 = vadd.f32 %v2370_v6, %v901_v48  ;;  %v848_v14 = vmul.f32 %v1349_v49, %v2914_v26  ;;  %v1351_v25 = vpop.eup %1350  ;;  %v738_v2 = vsub.f32 %v635_v9, %v2335_v37  ;;  %v2915_v39 = vld [vmem:[#allocation27_spill] sm:$0xff]  ;;  %v607_v26 = vpop.xlane.xlu0 %606 }
 0x22e   :  { %1368 = vrcp.f32 %v1064_v16  ;;  %v2459_v21 = vadd.f32 %v2370_v6, %v900_v7  ;;  %v723_v30 = vsub.f32 %v605_v50, %v2339_v15  ;;  %v847_v48 = vmul.f32 %v1351_v25, %v2915_v39 }
 0x22f   :  { %v1353_v13 = vpop.eup %1352  ;;  %1370 = vpow2.f32 %v1282_v20  ;;  %v1299_v19 = vmul.f32 -1.442695, %v2454_v51  ;;  %v887_v49 = vmul.f32 %v2354_v22, %v848_v14  ;;  %v769_v7 = vmul.f32 0.015625, %v737_v42  ;;  %v2916_v20 = vld [vmem:[#allocation29_spill] sm:$0xff] }
 0x230   :  { %v1355_v55 = vpop.eup %1354  ;;  %v1050_v33 = vadd.f32 1.0, %v1353_v13  ;;  %v1298_v16 = vmul.f32 -1.442695, %v2459_v21  ;;  %1372 = vrsqrt.f32 %v785_v44  ;;  %v886_v37 = vmul.f32 %v2354_v22, %v847_v48  ;;  %v637_v48 = vpop.xlane.xlu1 %636 }
 0x231   :  { %v1357_v46 = vpop.eup %1356  ;;  %v1049_v35 = vadd.f32 1.0, %v1355_v55  ;;  %1374 = vpow2.f32 %v1299_v19  ;;  %v2469_v15 = vadd.f32 %v2370_v6, %v887_v49  ;;  %v2472_v14 = vadd.f32 1e-05, %v769_v7  ;;  %v2917_v19 = vld [vmem:[#allocation30_spill] sm:$0xff] }
 0x232   :  { %v1359_v9 = vpop.eup %1358  ;;  %1376 = vrcp.f32 %v1050_v33  ;;  %v863_v50 = vmul.f32 %v1357_v46, %v2916_v20  ;;  %v770_v25 = vmul.f32 0.015625, %v738_v2  ;;  %v2475_v44 = vadd.f32 %v2370_v6, %v886_v37  ;;  %v639_v37 = vpop.xlane.xlu0 %638 }
 0x233   :  { %v1361_v13 = vpop.eup %1360  ;;  %1378 = vrcp.f32 %v1049_v35  ;;  %v1285_v42 = vmul.f32 -1.442695, %v2469_v15  ;;  %v864_v39 = vmul.f32 %v1359_v9, %v2917_v19 }
 0x234   :  { %v1363_v55 = vpop.eup %1362  ;;  %v1066_v49 = vadd.f32 1.0, %v1361_v13  ;;  %1380 = vpow2.f32 %v1298_v16  ;;  %v902_v33 = vmul.f32 %v2354_v22, %v863_v50  ;;  %v2480_v23 = vadd.f32 1e-05, %v770_v25 }
 0x235   :  { %v1365_v46 = vpop.eup %1364  ;;  %v1144_v2 = vmul.f32 %v1363_v55, %v2381_v45  ;;  %v1284_v35 = vmul.f32 -1.442695, %v2475_v44  ;;  %1382 = vpow2.f32 %v1285_v42  ;;  %v903_v7 = vmul.f32 %v2354_v22, %v864_v39 }
 0x236   :  { %v1065_v20 = vadd.f32 1.0, %v1365_v46  ;;  %1384 = vrcp.f32 %v1066_v49  ;;  %v2486_v9 = vadd.f32 %v2370_v6, %v902_v33  ;;  %v755_v13 = vmul.f32 0.015625, %v723_v30 }
 0x237   :  { %v1367_v16 = vpop.eup %1366  ;;  %v1176_v50 = vadd.f32 %v1144_v2, %v2211_v47  ;;  %1386 = vpow2.f32 %v1284_v35  ;;  %v2490_v25 = vadd.f32 %v2370_v6, %v903_v7  ;;  %v724_v45 = vsub.f32 %v607_v26, %v2341_v56  ;;  %v609_v26 = vpop.xlane.xlu1 %608 }
 0x238   :  { %v1369_v19 = vpop.eup %1368  ;;  %1388 = vrcp.f32 %v1065_v20  ;;  %v1052_v42 = vadd.f32 1.0, %v1367_v16  ;;  %v1300_v39 = vmul.f32 -1.442695, %v2486_v9  ;;  %v2494_v55 = vadd.f32 1e-05, %v755_v13  ;;  %v2918_v13 = vld [vmem:[#allocation31_spill] sm:$0xff] }
 0x239   :  { %v1371_v49 = vpop.eup %1370  ;;  %1209 = vst.msk [vmem:[%s2824_s5] sm:$0xff] %vm1208_vm1, %v1176_v50  ;;  %v1160_v47 = vmul.f32 %v1369_v19, %v2399_v0  ;;  %v1301_v30 = vmul.f32 -1.442695, %v2490_v25  ;;  %1390 = vrsqrt.f32 %v2451_v40  ;;  %v756_v56 = vmul.f32 0.015625, %v724_v45  ;;  %v611_v50 = vpop.xlane.xlu0 %610 }
 0x23a   :  { %v1373_v33 = vpop.eup %1372  ;;  %v1051_v46 = vadd.f32 1.0, %v1371_v49  ;;  %1392 = vrcp.f32 %v1052_v42  ;;  %v739_v2 = vsub.f32 %v637_v48, %v2343_v63  ;;  %v740_v35 = vsub.f32 %v639_v37, %v2347_v38 }
 0x23b   :  { %v1375_v7 = vpop.eup %1374  ;;  %v1192_v20 = vadd.f32 %v1160_v47, %v2215_v4  ;;  %1394 = vpow2.f32 %v1300_v39  ;;  %v849_v16 = vmul.f32 %v1373_v33, %v2918_v13  ;;  %v788_v0 = vadd.f32 1e-05, %v756_v56 }
 0x23c   :  { %v1377_v19 = vpop.eup %1376  ;;  %1396 = vrcp.f32 %v1051_v46  ;;  %v1068_v40 = vadd.f32 1.0, %v1375_v7  ;;  %v771_v45 = vmul.f32 0.015625, %v739_v2  ;;  %v772_v57 = vmul.f32 0.015625, %v740_v35 }
 0x23d   :  { %v1379_v29 = vpop.eup %1378  ;;  %1225 = vst.msk [vmem:[%s2824_s5 + $0x80] sm:$0xff] %vm1208_vm1, %v1192_v20  ;;  %v1146_v63 = vmul.f32 %v1377_v19, %v2413_v60  ;;  %1398 = vpow2.f32 %v1301_v30  ;;  %v888_v4 = vmul.f32 %v2354_v22, %v849_v16  ;;  %v725_v38 = vsub.f32 %v609_v26, %v2357_v32  ;;  %v641_v60 = vpop.xlane.xlu1 %640  ;;  %v2919_v16 = vld [vmem:[#allocation32_spill] sm:$0xff] }
 0x23e   :  { %v1381_v48 = vpop.eup %1380  ;;  %v1145_v37 = vmul.f32 %v1379_v29, %v2418_v41  ;;  %1400 = vrcp.f32 %v1068_v40  ;;  %v803_v42 = vadd.f32 1e-05, %v771_v45  ;;  %v2515_v39 = vadd.f32 1e-05, %v772_v57  ;;  %v643_v46 = vpop.xlane.xlu0 %642 }
 0x23f   :  { %v1383_v49 = vpop.eup %1382  ;;  %v1178_v47 = vadd.f32 %v1146_v63, %v2227_v10  ;;  %v1067_v56 = vadd.f32 1.0, %v1381_v48  ;;  %v2519_v33 = vadd.f32 %v2370_v6, %v888_v4  ;;  %1402 = vrsqrt.f32 %v2472_v14 }
 0x240   :  { %v1385_v30 = vpop.eup %1384  ;;  %v1177_v32 = vadd.f32 %v1145_v37, %v2219_v17  ;;  %v1054_v26 = vadd.f32 1.0, %v1383_v49  ;;  %1404 = vrsqrt.f32 %v2480_v23  ;;  %v757_v29 = vmul.f32 0.015625, %v725_v38 }
 0x241   :  { %v1387_v41 = vpop.eup %1386  ;;  %1211 = vst.msk [vmem:[%s2824_s5 + $0x10] sm:$0xff] %vm1208_vm1, %v1178_v47  ;;  %v1162_v10 = vmul.f32 %v1385_v30, %v2427_v5  ;;  %1406 = vrcp.f32 %v1067_v56  ;;  %v1286_v57 = vmul.f32 -1.442695, %v2519_v33  ;;  %v726_v14 = vsub.f32 %v611_v50, %v2361_v52 }
 0x242   :  { %v1389_v2 = vpop.eup %1388  ;;  %1210 = vst.msk [vmem:[%s2824_s5 + $0x8] sm:$0xff] %vm1208_vm1, %v1177_v32  ;;  %v1053_v23 = vadd.f32 1.0, %v1387_v41  ;;  %1408 = vrcp.f32 %v1054_v26  ;;  %v789_v17 = vadd.f32 1e-05, %v757_v29  ;;  %v741_v35 = vsub.f32 %v641_v60, %v2373_v12  ;;  %v615_v60 = vpop.xlane.xlu0 %614  ;;  %v2920_v29 = vld [vmem:[#allocation33_spill] sm:$0xff] }
 0x243   :  { %v1391_v7 = vpop.eup %1390  ;;  %v1161_v5 = vmul.f32 %v1389_v2, %v2431_v24  ;;  %v1194_v20 = vadd.f32 %v1162_v10, %v2235_v54  ;;  %1410 = vpow2.f32 %v1286_v57  ;;  %v758_v13 = vmul.f32 0.015625, %v726_v14  ;;  %v613_v24 = vpop.xlane.xlu1 %612  ;;  %v2921_v57 = vld [vmem:[#allocation34_spill] sm:$0xff] }
 0x244   :  { %v1393_v52 = vpop.eup %1392  ;;  %1412 = vrcp.f32 %v1053_v23  ;;  %v850_v50 = vmul.f32 %v1391_v7, %v2919_v16  ;;  %v773_v19 = vmul.f32 0.015625, %v741_v35  ;;  %v742_v40 = vsub.f32 %v643_v46, %v2378_v58 }
 0x245   :  { %v1395_v45 = vpop.eup %1394  ;;  %v1193_v63 = vadd.f32 %v1161_v5, %v2223_v43  ;;  %1227 = vst.msk [vmem:[%s2824_s5 + $0x90] sm:$0xff] %vm1208_vm1, %v1194_v20  ;;  %v1148_v12 = vmul.f32 %v1393_v52, %v2440_v36  ;;  %1414 = vrsqrt.f32 %v2494_v55  ;;  %v790_v54 = vadd.f32 1e-05, %v758_v13 }
 0x246   :  { %v1397_v4 = vpop.eup %1396  ;;  %v1069_v38 = vadd.f32 1.0, %v1395_v45  ;;  %v889_v48 = vmul.f32 %v2354_v22, %v850_v50  ;;  %1416 = vrsqrt.f32 %v788_v0  ;;  %v805_v58 = vadd.f32 1e-05, %v773_v19  ;;  %v2922_v19 = vld [vmem:[#allocation35_spill] sm:$0xff] }
 0x247   :  { %v1399_v37 = vpop.eup %1398  ;;  %1226 = vst.msk [vmem:[%s2824_s5 + $0x88] sm:$0xff] %vm1208_vm1, %v1193_v63  ;;  %v1147_v43 = vmul.f32 %v1397_v4, %v2444_v61  ;;  %v1180_v36 = vadd.f32 %v1148_v12, %v2245_v28  ;;  %1418 = vrsqrt.f32 %v803_v42  ;;  %v774_v55 = vmul.f32 0.015625, %v742_v40  ;;  %v2923_v12 = vld [vmem:[#allocation36_spill] sm:$0xff] }
 0x248   :  { %v1401_v49 = vpop.eup %1400  ;;  %1420 = vrcp.f32 %v1069_v38  ;;  %v1070_v47 = vadd.f32 1.0, %v1399_v37  ;;  %v2555_v56 = vadd.f32 %v2370_v6, %v889_v48  ;;  %v727_v0 = vsub.f32 %v613_v24, %v2385_v31  ;;  %v2924_v38 = vld [vmem:[#allocation37_spill] sm:$0xff] }
 0x249   :  { %v1403_v30 = vpop.eup %1402  ;;  %v1179_v32 = vadd.f32 %v1147_v43, %v2231_v53  ;;  %1213 = vst.msk [vmem:[%s2824_s5 + $0x20] sm:$0xff] %vm1208_vm1, %v1180_v36  ;;  %v1164_v28 = vmul.f32 %v1401_v49, %v2454_v51  ;;  %1422 = vrsqrt.f32 %v2515_v39  ;;  %v806_v61 = vadd.f32 1e-05, %v774_v55 }
 0x24a   :  { %v1405_v42 = vpop.eup %1404  ;;  %1424 = vrcp.f32 %v1070_v47  ;;  %v1287_v26 = vmul.f32 -1.442695, %v2555_v56  ;;  %v865_v31 = vmul.f32 %v1403_v30, %v2920_v29  ;;  %v759_v41 = vmul.f32 0.015625, %v727_v0  ;;  %v2925_v0 = vld [vmem:[#allocation38_spill] sm:$0xff] }
 0x24b   :  { %v1407_v10 = vpop.eup %1406  ;;  %1212 = vst.msk [vmem:[%s2824_s5 + $0x18] sm:$0xff] %vm1208_vm1, %v1179_v32  ;;  %v1196_v53 = vadd.f32 %v1164_v28, %v2249_v1  ;;  %v866_v51 = vmul.f32 %v1405_v42, %v2921_v57  ;;  %1426 = vrsqrt.f32 %v789_v17  ;;  %v728_v39 = vsub.f32 %v615_v60, %v2387_v18 }
 0x24c   :  { %v1409_v14 = vpop.eup %1408  ;;  %v1163_v46 = vmul.f32 %v1407_v10, %v2459_v21  ;;  %1428 = vpow2.f32 %v1287_v26  ;;  %v904_v2 = vmul.f32 %v2354_v22, %v865_v31  ;;  %v791_v23 = vadd.f32 1e-05, %v759_v41  ;;  %v2926_v31 = vld [vmem:[#allocation39_spill] sm:$0xff] }
 0x24d   :  { %v1411_v35 = vpop.eup %1410  ;;  %1229 = vst.msk [vmem:[%s2824_s5 + $0xa0] sm:$0xff] %vm1208_vm1, %v1196_v53  ;;  %v1150_v1 = vmul.f32 %v1409_v14, %v2469_v15  ;;  %v905_v7 = vmul.f32 %v2354_v22, %v866_v51  ;;  %1430 = vrsqrt.f32 %v790_v54  ;;  %v760_v17 = vmul.f32 0.015625, %v728_v39  ;;  %v2927_v53 = vld [vmem:[#allocation48_spill] sm:$0xff] }
 0x24e   :  { %v1413_v18 = vpop.eup %1412  ;;  %v1195_v5 = vadd.f32 %v1163_v46, %v2239_v59  ;;  %v1055_v21 = vadd.f32 1.0, %v1411_v35  ;;  %v2584_v20 = vadd.f32 %v2370_v6, %v904_v2  ;;  %1432 = vrsqrt.f32 %v805_v58  ;;  %v645_v58 = vpop.xlane.xlu1 %644  ;;  %v2929_v35 = vld [vmem:[#allocation40_spill] sm:$0xff] }
 0x24f   :  { %v1415_v13 = vpop.eup %1414  ;;  %v1149_v52 = vmul.f32 %v1413_v18, %v2475_v44  ;;  %v1182_v16 = vadd.f32 %v1150_v1, %v2267_v62  ;;  %v2589_v50 = vadd.f32 %v2370_v6, %v905_v7  ;;  %1434 = vrsqrt.f32 %v806_v61  ;;  %v2930_v7 = vld [vmem:[#allocation41_spill] sm:$0xff] }
 0x250   :  { %v1417_v15 = vpop.eup %1416  ;;  %1228 = vst.msk [vmem:[%s2824_s5 + $0x98] sm:$0xff] %vm1208_vm1, %v1195_v5  ;;  %1436 = vrcp.f32 %v1055_v21  ;;  %v1302_v59 = vmul.f32 -1.442695, %v2584_v20  ;;  %v851_v40 = vmul.f32 %v1415_v13, %v2922_v19  ;;  %v792_v45 = vadd.f32 1e-05, %v760_v17 }
 0x251   :  { %v1419_v63 = vpop.eup %1418  ;;  %v1181_v44 = vadd.f32 %v1149_v52, %v2255_v34  ;;  %1215 = vst.msk [vmem:[%s2824_s5 + $0x30] sm:$0xff] %vm1208_vm1, %v1182_v16  ;;  %v1303_v62 = vmul.f32 -1.442695, %v2589_v50  ;;  %v852_v54 = vmul.f32 %v1417_v15, %v2923_v12  ;;  %1438 = vrsqrt.f32 %v791_v23  ;;  %v2931_v52 = vld [vmem:[#allocation42_spill] sm:$0xff] }
 0x252   :  { %v1421_v24 = vpop.eup %1420  ;;  %1440 = vpow2.f32 %v1302_v59  ;;  %v890_v4 = vmul.f32 %v2354_v22, %v851_v40  ;;  %v867_v48 = vmul.f32 %v1419_v63, %v2924_v38  ;;  %v2607_v37 = vmul.f32 64.0, %v2406_v3 }
 0x253   :  { %v1423_v34 = vpop.eup %1422  ;;  %1214 = vst.msk [vmem:[%s2824_s5 + $0x28] sm:$0xff] %vm1208_vm1, %v1181_v44  ;;  %v1165_v43 = vmul.f32 %v1421_v24, %v2486_v9  ;;  %1442 = vpow2.f32 %v1303_v62  ;;  %v891_v36 = vmul.f32 %v2354_v22, %v852_v54  ;;  %v2616_v55 = vmul.f32 64.0, %v2393_v11  ;;  %v2932_v62 = vld [vmem:[#allocation43_spill] sm:$0xff]  ;;  %v617_v54 = vpop.xlane.xlu1 %616 }
 0x254   :  { %v1425_v49 = vpop.eup %1424  ;;  %v2619_v47 = vadd.f32 %v2370_v6, %v890_v4  ;;  %v906_v3 = vmul.f32 %v2354_v22, %v867_v48  ;;  %v868_v60 = vmul.f32 %v1423_v34, %v2925_v0  ;;  %1444 = vrsqrt.f32 %v792_v45  ;;  %v2933_v4 = vld [vmem:[#allocation51_spill] sm:$0xff]  ;;  %v647_v34 = vpop.xlane.xlu0 %646 }
 0x255   :  { %v1427_v30 = vpop.eup %1426  ;;  %v1197_v32 = vadd.f32 %v1165_v43, %v2259_v8  ;;  %v1166_v9 = vmul.f32 %v1425_v49, %v2490_v25  ;;  %v2626_v28 = vadd.f32 %v2370_v6, %v891_v36  ;;  %v743_v11 = vsub.f32 %v645_v58, %v2396_v27  ;;  %v2928_v27 = vld [vmem:[#allocation50_spill] sm:$0xff] }
 0x256   :  { %v1429_v61 = vpop.eup %1428  ;;  %v1288_v42 = vmul.f32 -1.442695, %v2619_v47  ;;  %v2631_v26 = vadd.f32 %v2370_v6, %v906_v3  ;;  %v907_v29 = vmul.f32 %v2354_v22, %v868_v60  ;;  %v853_v41 = vmul.f32 %v1427_v30, %v2926_v31  ;;  %v2934_v30 = vld [vmem:[#allocation44_spill] sm:$0xff] }
 0x257   :  { %v1431_v10 = vpop.eup %1430  ;;  %v2637_v8 = vmul.f32 %v2927_v53, %v2927_v53  ;;  %1230 = vst.msk [vmem:[%s2824_s5 + $0xa8] sm:$0xff] %vm1208_vm1, %v1197_v32  ;;  %v1198_v25 = vadd.f32 %v1166_v9, %v2928_v27  ;;  %v1056_v57 = vadd.f32 1.0, %v1429_v61  ;;  %v1289_v51 = vmul.f32 -1.442695, %v2626_v28  ;;  %v649_v53 = vpop.xlane.xlu1 %648 }
 0x258   :  { %v1433_v39 = vpop.eup %1432  ;;  %1446 = vpow2.f32 %v1288_v42  ;;  %v1304_v14 = vmul.f32 -1.442695, %v2631_v26  ;;  %v2647_v46 = vadd.f32 %v2370_v6, %v907_v29  ;;  %v892_v2 = vmul.f32 %v2354_v22, %v853_v41 }
 0x259   :  { %v1435_v23 = vpop.eup %1434  ;;  %1231 = vst.msk [vmem:[%s2824_s5 + $0xb0] sm:$0xff] %vm1208_vm1, %v1198_v25  ;;  %1448 = vrcp.f32 %v1056_v57  ;;  %v854_v1 = vmul.f32 %v1431_v10, %v2929_v35  ;;  %v869_v17 = vmul.f32 %v1433_v39, %v2930_v7  ;;  %v775_v18 = vmul.f32 0.015625, %v743_v11  ;;  %v2935_v39 = vld [vmem:[#allocation7_spill] sm:$0xff] }
 0x25a   :  { %v1437_v5 = vpop.eup %1436  ;;  %1450 = vpow2.f32 %v1289_v51  ;;  %v1305_v21 = vmul.f32 -1.442695, %v2647_v46  ;;  %v2658_v13 = vadd.f32 %v2370_v6, %v892_v2  ;;  %v870_v16 = vmul.f32 %v1435_v23, %v2931_v52 }
 0x25b   :  { %v1439_v15 = vpop.eup %1438  ;;  %v1151_v59 = vmul.f32 %v1437_v5, %v2519_v33  ;;  %1452 = vpow2.f32 %v1304_v14  ;;  %v893_v19 = vmul.f32 %v2354_v22, %v854_v1  ;;  %v908_v40 = vmul.f32 %v2354_v22, %v869_v17  ;;  %v2936_v14 = vld [vmem:[#allocation3_spill] sm:$0xff] }
 0x25c   :  { %v1441_v45 = vpop.eup %1440  ;;  %1454 = vpow2.f32 %v1305_v21  ;;  %v1290_v63 = vmul.f32 -1.442695, %v2658_v13  ;;  %v909_v44 = vmul.f32 %v2354_v22, %v870_v16  ;;  %v855_v12 = vmul.f32 %v1439_v15, %v2932_v62 }
 0x25d   :  { %v1443_v24 = vpop.eup %1442  ;;  %v1183_v38 = vadd.f32 %v1151_v59, %v2933_v4  ;;  %v1071_v48 = vadd.f32 1.0, %v1441_v45  ;;  %v2669_v33 = vadd.f32 %v2370_v6, %v893_v19  ;;  %v2672_v58 = vadd.f32 %v2370_v6, %v908_v40  ;;  %v2937_v45 = vld [vmem:[#allocation2_spill] sm:$0xff] }
 0x25e   :  { %v1445_v43 = vpop.eup %1444  ;;  %v1072_v36 = vadd.f32 1.0, %v1443_v24  ;;  %1456 = vpow2.f32 %v1290_v63  ;;  %v2675_v49 = vadd.f32 %v2370_v6, %v909_v44  ;;  %v894_v3 = vmul.f32 %v2354_v22, %v855_v12 }
 0x25f   :  { %1216 = vst.msk [vmem:[%s2824_s5 + $0x38] sm:$0xff] %vm1208_vm1, %v1183_v38  ;;  %1458 = vrcp.f32 %v1071_v48  ;;  %v1291_v0 = vmul.f32 -1.442695, %v2669_v33  ;;  %v1306_v60 = vmul.f32 -1.442695, %v2672_v58  ;;  %v856_v32 = vmul.f32 %v1445_v43, %v2934_v30 }
 0x260   :  { %1460 = vrcp.f32 %v1072_v36  ;;  %v1307_v9 = vmul.f32 -1.442695, %v2675_v49  ;;  %v2687_v11 = vadd.f32 %v2370_v6, %v894_v3  ;;  %v744_v61 = vsub.f32 %v647_v34, %v2607_v37 }
 0x261   :  { %1462 = vpow2.f32 %v1291_v0  ;;  %v895_v42 = vmul.f32 %v2354_v22, %v856_v32  ;;  %v729_v29 = vsub.f32 %v617_v54, %v2616_v55  ;;  %v807_v10 = vadd.f32 1e-05, %v775_v18  ;;  %v2938_v54 = vld [vmem:[#allocation4_spill] sm:$0xff] }
 0x262   :  { %v1447_v31 = vpop.eup %1446  ;;  %1464 = vpow2.f32 %v1306_v60  ;;  %v1292_v41 = vmul.f32 -1.442695, %v2687_v11  ;;  %v713_v51 = vmul.f32 64.0, %v2637_v8  ;;  %v286_v2 = vadd.f32 %v2936_v14, %v2935_v39  ;;  %v2942_v14 = vld [vmem:[#allocation6_spill] sm:$0xff] }
 0x263   :  { %v1449_v27 = vpop.eup %1448  ;;  %v1057_v25 = vadd.f32 1.0, %v1447_v31  ;;  %1466 = vpow2.f32 %v1307_v9  ;;  %v2694_v57 = vadd.f32 %v2370_v6, %v895_v42  ;;  %v776_v23 = vmul.f32 0.015625, %v744_v61  ;;  %v2939_v9 = vld [vmem:[#allocation5_spill] sm:$0xff] }
 0x264   :  { %v1451_v37 = vpop.eup %1450  ;;  %v1152_v55 = vmul.f32 %v1449_v27, %v2555_v56  ;;  %1468 = vpow2.f32 %v1292_v41  ;;  %v761_v7 = vmul.f32 0.015625, %v729_v29  ;;  %v745_v17 = vsub.f32 %v649_v53, %v713_v51  ;;  %v2940_v31 = vld [vmem:[#allocation45_spill] sm:$0xff]  ;;  %v2941_v53 = vld [vmem:[#allocation8_spill] sm:$0xff] }
 0x265   :  { %v1453_v35 = vpop.eup %1452  ;;  %1470 = vrcp.f32 %v1057_v25  ;;  %v1058_v1 = vadd.f32 1.0, %v1451_v37  ;;  %v1293_v52 = vmul.f32 -1.442695, %v2694_v57  ;;  %v808_v56 = vadd.f32 1e-05, %v776_v23 }
 0x266   :  { %v1455_v18 = vpop.eup %1454  ;;  %v1184_v5 = vadd.f32 %v1152_v55, %v286_v2  ;;  %v1073_v21 = vadd.f32 1.0, %v1453_v35  ;;  %1472 = vrsqrt.f32 %v807_v10  ;;  %v793_v19 = vadd.f32 1e-05, %v761_v7 }
 0x267   :  { %1474 = vrcp.f32 %v1058_v1  ;;  %v1074_v8 = vadd.f32 1.0, %v1455_v18  ;;  %v376_v63 = vadd.f32 %v2937_v45, %v2935_v39  ;;  %v777_v62 = vmul.f32 0.015625, %v745_v17  ;;  %v1516_v45 = vld [vmem:[%s2822_s3] ss:$0 sm:$0xff] }
 0x268   :  { %v1457_v16 = vpop.eup %1456  ;;  %1217 = vst.msk [vmem:[%s2824_s5 + $0x40] sm:$0xff] %vm1208_vm1, %v1184_v5  ;;  %1476 = vrcp.f32 %v1073_v21  ;;  %v382_v24 = vadd.f32 %v2938_v54, %v2935_v39  ;;  %v292_v61 = vadd.f32 %v2939_v9, %v2935_v39  ;;  %v298_v27 = vadd.f32 %v2941_v53, %v2935_v39 }
 0x269   :  { %v1459_v15 = vpop.eup %1458  ;;  %1478 = vrcp.f32 %v1074_v8  ;;  %v1059_v59 = vadd.f32 1.0, %v1457_v16  ;;  %v809_v60 = vadd.f32 1e-05, %v777_v62  ;;  %v388_v2 = vadd.f32 %v2942_v14, %v2935_v39 }
 0x26a   :  { %v1461_v40 = vpop.eup %1460  ;;  %v1167_v44 = vmul.f32 %v1459_v15, %v2584_v20  ;;  %1480 = vpow2.f32 %v1293_v52  ;;  %v2944_v52 = vld [vmem:[#allocation46_spill] sm:$0xff] }
 0x26b   :  { %v1463_v12 = vpop.eup %1462  ;;  %v1168_v4 = vmul.f32 %v1461_v40, %v2589_v50  ;;  %1482 = vrcp.f32 %v1059_v59 }
 0x26c   :  { %v1465_v38 = vpop.eup %1464  ;;  %v1199_v48 = vadd.f32 %v1167_v44, %v376_v63  ;;  %v1060_v34 = vadd.f32 1.0, %v1463_v12  ;;  %1484 = vrsqrt.f32 %v808_v56  ;;  %v2945_v56 = vld [vmem:[#allocation10_spill] sm:$0xff] }
 0x26d   :  { %v1467_v43 = vpop.eup %1466  ;;  %v1200_v36 = vadd.f32 %v1168_v4, %v382_v24  ;;  %v1075_v3 = vadd.f32 1.0, %v1465_v38  ;;  %1486 = vrsqrt.f32 %v793_v19  ;;  %v2947_v24 = vld [vmem:[#allocation12_spill] sm:$0xff] }
 0x26e   :  { %v1469_v0 = vpop.eup %1468  ;;  %1232 = vst.msk [vmem:[%s2824_s5 + $0xb8] sm:$0xff] %vm1208_vm1, %v1199_v48  ;;  %1488 = vrcp.f32 %v1060_v34  ;;  %v1076_v20 = vadd.f32 1.0, %v1467_v43  ;;  %v2948_v34 = vld [vmem:[#allocation11_spill] sm:$0xff] }
 0x26f   :  { %v1471_v30 = vpop.eup %1470  ;;  %1233 = vst.msk [vmem:[%s2824_s5 + $0xc0] sm:$0xff] %vm1208_vm1, %v1200_v36  ;;  %1490 = vrcp.f32 %v1075_v3  ;;  %v1061_v50 = vadd.f32 1.0, %v1469_v0  ;;  %v1517_v3 = vld [vmem:[%s2823_s4] ss:$0 sm:$0xff] }
 0x270   :  { %v1473_v32 = vpop.eup %1472  ;;  %v1153_v42 = vmul.f32 %v1471_v30, %v2619_v47  ;;  %1492 = vrcp.f32 %v1076_v20 }
 0x271   :  { %v1475_v29 = vpop.eup %1474  ;;  %1494 = vrcp.f32 %v1061_v50  ;;  %v871_v41 = vmul.f32 %v1473_v32, %v2940_v31 }
 0x272   :  { %v1477_v10 = vpop.eup %1476  ;;  %v1185_v25 = vadd.f32 %v1153_v42, %v292_v61  ;;  %v1154_v51 = vmul.f32 %v1475_v29, %v2626_v28  ;;  %1496 = vrsqrt.f32 %v809_v60  ;;  %v2950_v60 = vld [vmem:[#allocation49_spill] sm:$0xff] }
 0x273   :  { %v1479_v37 = vpop.eup %1478  ;;  %v1169_v55 = vmul.f32 %v1477_v10, %v2631_v26  ;;  %v910_v47 = vmul.f32 %v2354_v22, %v871_v41  ;;  %v2943_v22 = vld [vmem:[#allocation9_spill] sm:$0xff]  ;;  %v2952_v41 = vld [vmem:[#allocation16_spill] sm:$0xff] }
 0x274   :  { %v1481_v23 = vpop.eup %1480  ;;  %1218 = vst.msk [vmem:[%s2824_s5 + $0x48] sm:$0xff] %vm1208_vm1, %v1185_v25  ;;  %v1186_v35 = vadd.f32 %v1154_v51, %v298_v27  ;;  %v1170_v1 = vmul.f32 %v1479_v37, %v2647_v46 }
 0x275   :  { %v1483_v7 = vpop.eup %1482  ;;  %v1201_v28 = vadd.f32 %v1169_v55, %v388_v2  ;;  %v1062_v17 = vadd.f32 1.0, %v1481_v23  ;;  %v2736_v18 = vadd.f32 %v2370_v6, %v910_v47  ;;  %v2953_v47 = vld [vmem:[#allocation15_spill] sm:$0xff] }
 0x276   :  { %v1485_v39 = vpop.eup %1484  ;;  %1219 = vst.msk [vmem:[%s2824_s5 + $0x50] sm:$0xff] %vm1208_vm1, %v1186_v35  ;;  %v1202_v26 = vadd.f32 %v1170_v1, %v2943_v22  ;;  %v1155_v5 = vmul.f32 %v1483_v7, %v2658_v13  ;;  %v2946_v13 = vld [vmem:[#allocation47_spill] sm:$0xff]  ;;  %v2955_v22 = vld [vmem:[#allocation18_spill] sm:$0xff] }
 0x277   :  { %v1487_v21 = vpop.eup %1486  ;;  %1234 = vst.msk [vmem:[%s2824_s5 + $0xc8] sm:$0xff] %vm1208_vm1, %v1201_v28  ;;  %1498 = vrcp.f32 %v1062_v17  ;;  %v1308_v46 = vmul.f32 -1.442695, %v2736_v18  ;;  %v872_v8 = vmul.f32 %v1485_v39, %v2944_v52  ;;  %v2954_v17 = vld [vmem:[#allocation17_spill] sm:$0xff] }
 0x278   :  { %v1489_v16 = vpop.eup %1488  ;;  %1235 = vst.msk [vmem:[%s2824_s5 + $0xd0] sm:$0xff] %vm1208_vm1, %v1202_v26  ;;  %v1187_v15 = vadd.f32 %v1155_v5, %v2945_v56  ;;  %v857_v59 = vmul.f32 %v1487_v21, %v2946_v13  ;;  %v2956_v21 = vld [vmem:[#allocation19_spill] sm:$0xff] }
 0x279   :  { %v1491_v19 = vpop.eup %1490  ;;  %v1156_v40 = vmul.f32 %v1489_v16, %v2669_v33  ;;  %1500 = vpow2.f32 %v1308_v46  ;;  %v911_v63 = vmul.f32 %v1516_v45, %v872_v8 }
 0x27a   :  { %v1493_v44 = vpop.eup %1492  ;;  %1220 = vst.msk [vmem:[%s2824_s5 + $0x58] sm:$0xff] %vm1208_vm1, %v1187_v15  ;;  %v1171_v62 = vmul.f32 %v1491_v19, %v2672_v58  ;;  %v896_v12 = vmul.f32 %v1516_v45, %v857_v59  ;;  %v2949_v58 = vld [vmem:[#allocation13_spill] sm:$0xff] }
 0x27b   :  { %v1495_v54 = vpop.eup %1494  ;;  %v1188_v4 = vadd.f32 %v1156_v40, %v2947_v24  ;;  %v1172_v33 = vmul.f32 %v1493_v44, %v2675_v49  ;;  %v950_v38 = vadd.f32 %v2370_v6, %v911_v63 }
 0x27c   :  { %v1497_v48 = vpop.eup %1496  ;;  %v1203_v43 = vadd.f32 %v1171_v62, %v2948_v34  ;;  %v1157_v36 = vmul.f32 %v1495_v54, %v2687_v11  ;;  %v935_v0 = vadd.f32 %v1517_v3, %v896_v12  ;;  %v2951_v11 = vld [vmem:[#allocation14_spill] sm:$0xff] }
 0x27d   :  { %1221 = vst.msk [vmem:[%s2824_s5 + $0x60] sm:$0xff] %vm1208_vm1, %v1188_v4  ;;  %v1204_v20 = vadd.f32 %v1172_v33, %v2949_v58  ;;  %v1309_v49 = vmul.f32 -1.442695, %v950_v38  ;;  %v873_v6 = vmul.f32 %v1497_v48, %v2950_v60 }
 0x27e   :  { %1236 = vst.msk [vmem:[%s2824_s5 + $0xd8] sm:$0xff] %vm1208_vm1, %v1203_v43  ;;  %v1189_v30 = vadd.f32 %v1157_v36, %v2951_v11  ;;  %v1294_v50 = vmul.f32 -1.442695, %v935_v0 }
 0x27f   :  { %1237 = vst.msk [vmem:[%s2824_s5 + $0xe0] sm:$0xff] %vm1208_vm1, %v1204_v20  ;;  %1502 = vpow2.f32 %v1309_v49  ;;  %v912_v32 = vmul.f32 %v1516_v45, %v873_v6 }
 0x280   :  { %1222 = vst.msk [vmem:[%s2824_s5 + $0x68] sm:$0xff] %vm1208_vm1, %v1189_v30  ;;  %1504 = vpow2.f32 %v1294_v50 }
 0x281   :  { %v1499_v9 = vpop.eup %1498  ;;  %v951_v61 = vadd.f32 %v1517_v3, %v912_v32 }
 0x282   :  { %v1158_v42 = vmul.f32 %v1499_v9, %v2694_v57 }
 0x283   :  { %v1501_v29 = vpop.eup %1500  ;;  %v1310_v31 = vmul.f32 -1.442695, %v951_v61 }
 0x284   :  { %v1190_v10 = vadd.f32 %v1158_v42, %v2952_v41  ;;  %v1077_v53 = vadd.f32 1.0, %v1501_v29 }
 0x285   :  { %1506 = vpow2.f32 %v1310_v31 }
 0x286   :  { %1223 = vst.msk [vmem:[%s2824_s5 + $0x70] sm:$0xff] %vm1208_vm1, %v1190_v10  ;;  %1508 = vrcp.f32 %v1077_v53 }
 0x289   :  { %v1503_v27 = vpop.eup %1502 }
 0x28a   :  { %v1505_v25 = vpop.eup %1504  ;;  %v1078_v51 = vadd.f32 1.0, %v1503_v27 }
 0x28b   :  { %v1063_v37 = vadd.f32 1.0, %v1505_v25 }
 0x28c   :  { %1510 = vrcp.f32 %v1078_v51 }
 0x28d   :  { %1512 = vrcp.f32 %v1063_v37 }
 0x28f   :  { %v1507_v14 = vpop.eup %1506 }
 0x290   :  { %v1509_v57 = vpop.eup %1508  ;;  %v1079_v2 = vadd.f32 1.0, %v1507_v14 }
 0x291   :  { %v1173_v55 = vmul.f32 %v1509_v57, %v2736_v18 }
 0x292   :  { %1514 = vrcp.f32 %v1079_v2 }
 0x293   :  { %v1205_v23 = vadd.f32 %v1173_v55, %v2953_v47 }
 0x295   :  { %1238 = vst.msk [vmem:[%s2824_s5 + $0xe8] sm:$0xff] %vm1208_vm1, %v1205_v23 }
 0x296   :  { %v1511_v35 = vpop.eup %1510 }
 0x297   :  { %v1513_v1 = vpop.eup %1512  ;;  %v1174_v7 = vmul.f32 %v1511_v35, %v950_v38 }
 0x298   :  { %v1159_v28 = vmul.f32 %v1513_v1, %v935_v0 }
 0x299   :  { %v1206_v39 = vadd.f32 %v1174_v7, %v2954_v17 }
 0x29a   :  { %v1191_v26 = vadd.f32 %v1159_v28, %v2955_v22 }
 0x29b   :  { %1239 = vst.msk [vmem:[%s2824_s5 + $0xf0] sm:$0xff] %vm1208_vm1, %v1206_v39 }
 0x29c   :  { %v1515_v18 = vpop.eup %1514  ;;  %1224 = vst.msk [vmem:[%s2824_s5 + $0x78] sm:$0xff] %vm1208_vm1, %v1191_v26 }
 0x29d   :  { %v1175_v5 = vmul.f32 %v1515_v18, %v951_v61 }
 0x29f   :  { %v1207_v46 = vadd.f32 %v1175_v5, %v2956_v21 }
 0x2a1   :  { %1240 = vst.msk [vmem:[%s2824_s5 + $0xf8] sm:$0xff] %vm1208_vm1, %v1207_v46 }

// kernel: tpu_custom_call.1
= control target key start
LH: loop header
LB: loop body
LE: loop exit
PB: predicated region body
PF: predicated region fallthrough
CT: control target
= control target key end

     0   :  { %v1518_v3 = vmov 0.0   ;;  %vm72_vm0 = vcmask 261120   ;;  %v62_v45 = vlaneseq  ;;  %vm1208_vm1 = vcmask 523264   ;;  %s2819_s1 = inlined_call_operand.vmem [shape: f32[32,256], index: 1, kind: input, shape index: {}]   ;;  %s2820_s0 = inlined_call_operand.vmem [shape: f32[256,32], index: 0, kind: input, shape index: {}]   ;;  %s2821_s2 = inlined_call_operand.vmem [shape: f32[1,256], index: 2, kind: input, shape index: {}]   ;;  %s2822_s3 = inlined_call_operand.vmem [shape: f32[1,128], index: 3, kind: input, shape index: {}]   ;;  %s2823_s4 = inlined_call_operand.vmem [shape: f32[1,128], index: 4, kind: input, shape index: {}]   ;;  %s2824_s5 = inlined_call_operand.vmem [shape: f32[256,64], index: 5, kind: output, shape index: {}]  }
   0x1   :  { %v53_v0 = vld [vmem:[%s2819_s1 + $0x8] sm:$0xff]  ;;  %v55_v1 = vld [vmem:[%s2819_s1 + $0x18] sm:$0xff]  ;;  %v52_v2 = vld [vmem:[%s2819_s1] sm:$0xff]  ;;  %233 = vmatprep.mubr.f32.mxu0 %v1518_v3  ;;  %329 = vmatprep.mubr.f32.mxu1 %v1518_v3 }
   0x2   :  { %v1311_v4 = vpack.c.bf16 %v55_v1, %v53_v0  ;;  %v54_v5 = vld [vmem:[%s2819_s1 + $0x10] sm:$0xff]  ;;  %v57_v6 = vld [vmem:[%s2819_s1 + $0x28] sm:$0xff]  ;;  %v59_v7 = vld [vmem:[%s2819_s1 + $0x38] sm:$0xff]  ;;  %v1733_v46 = vshrl.u32 %v62_v45, 7 }
   0x3   :  { %v1313_v8 = vpack.c.bf16 %v54_v5, %v52_v2  ;;  %v1315_v9 = vpack.c.bf16 %v59_v7, %v57_v6  ;;  %v56_v10 = vld [vmem:[%s2819_s1 + $0x20] sm:$0xff]  ;;  %v58_v11 = vld [vmem:[%s2819_s1 + $0x30] sm:$0xff]  ;;  %v21_v15 = vld [vmem:[%s2820_s0 + $0x8] sm:$0xff] }
   0x4   :  { %1312 = vmatprep.subr.bf16.mxu0 %v1311_v4  ;;  %1319 = vmatprep.subr.bf16.mxu1 %v1311_v4  ;;  %v1317_v12 = vpack.c.bf16 %v58_v11, %v56_v10  ;;  %v20_v13 = vld [vmem:[%s2820_s0] sm:$0xff]  ;;  %v37_v16 = vld [vmem:[%s2820_s0 + $0x88] sm:$0xff]  ;;  %v22_v17 = vld [vmem:[%s2820_s0 + $0x10] sm:$0xff]  ;;  %v64_v47 = vsub.s32 0, %v1733_v46 }
   0x5   :  { %1314 = vmatpush1.bf16.msra.mxu0 %v1313_v8  ;;  %1321 = vmatpush1.bf16.msra.mxu1 %v1313_v8  ;;  %v36_v14 = vld [vmem:[%s2820_s0 + $0x80] sm:$0xff]  ;;  %v38_v18 = vld [vmem:[%s2820_s0 + $0x90] sm:$0xff]  ;;  %v23_v19 = vld [vmem:[%s2820_s0 + $0x18] sm:$0xff] }
   0x6   :  { %1316 = vmatprep.subr.bf16.mxu0 %v1315_v9  ;;  %1320 = vmatprep.subr.bf16.mxu1 %v1315_v9  ;;  %v39_v20 = vld [vmem:[%s2820_s0 + $0x98] sm:$0xff]  ;;  %v24_v21 = vld [vmem:[%s2820_s0 + $0x20] sm:$0xff]  ;;  %v25_v23 = vld [vmem:[%s2820_s0 + $0x28] sm:$0xff] }
   0x7   :  { %v40_v22 = vld [vmem:[%s2820_s0 + $0xa0] sm:$0xff]  ;;  %v41_v24 = vld [vmem:[%s2820_s0 + $0xa8] sm:$0xff]  ;;  %v26_v25 = vld [vmem:[%s2820_s0 + $0x30] sm:$0xff] }
   0x8   :  { %v42_v26 = vld [vmem:[%s2820_s0 + $0xb0] sm:$0xff]  ;;  %v27_v27 = vld [vmem:[%s2820_s0 + $0x38] sm:$0xff]  ;;  %v28_v29 = vld [vmem:[%s2820_s0 + $0x40] sm:$0xff] }
   0x9   :  { %1318 = vmatpush1.bf16.msra.mxu0 %v1317_v12  ;;  %1322 = vmatpush1.bf16.msra.mxu1 %v1317_v12  ;;  %v43_v28 = vld [vmem:[%s2820_s0 + $0xb8] sm:$0xff]  ;;  %v44_v30 = vld [vmem:[%s2820_s0 + $0xc0] sm:$0xff]  ;;  %v29_v31 = vld [vmem:[%s2820_s0 + $0x48] sm:$0xff] }
   0xa   :  { %v45_v32 = vld [vmem:[%s2820_s0 + $0xc8] sm:$0xff]  ;;  %v30_v33 = vld [vmem:[%s2820_s0 + $0x50] sm:$0xff]  ;;  %v31_v35 = vld [vmem:[%s2820_s0 + $0x58] sm:$0xff] }
   0xb   :  { %v46_v34 = vld [vmem:[%s2820_s0 + $0xd0] sm:$0xff]  ;;  %v47_v36 = vld [vmem:[%s2820_s0 + $0xd8] sm:$0xff]  ;;  %v32_v37 = vld [vmem:[%s2820_s0 + $0x60] sm:$0xff] }
   0xc   :  { %1245 = vmatmul.mubr.msk.f32.vlgmr.msra.gmra.mrb[0].mxu0 %vm72_vm0, %v20_v13  ;;  %1261 = vmatmul.mubr.msk.f32.vlgmr.msra.gmra.mrb[0].mxu1 %vm72_vm0, %v36_v14  ;;  %v48_v38 = vld [vmem:[%s2820_s0 + $0xe0] sm:$0xff]  ;;  %v33_v39 = vld [vmem:[%s2820_s0 + $0x68] sm:$0xff]  ;;  %v34_v41 = vld [vmem:[%s2820_s0 + $0x70] sm:$0xff] }
   0xd   :  { %239 = vmatprep.mubr.f32.mxu0 %v1518_v3  ;;  %335 = vmatprep.mubr.f32.mxu1 %v1518_v3  ;;  %v49_v40 = vld [vmem:[%s2820_s0 + $0xe8] sm:$0xff]  ;;  %v50_v42 = vld [vmem:[%s2820_s0 + $0xf0] sm:$0xff]  ;;  %v35_v43 = vld [vmem:[%s2820_s0 + $0x78] sm:$0xff] }
   0xe   :  { %v51_v44 = vld [vmem:[%s2820_s0 + $0xf8] sm:$0xff]  ;;  %v1739_v48 = vld [vmem:[%s2821_s2] sm:$0x3] }
   0xf   :  { %v1742_v49 = vrot.slane %v1739_v48, %v64_v47 }
  0x10   :  { %1246 = vmatmul.mubr.msk.f32.gmra.mrb[2].mxu0 %vm72_vm0, %v21_v15  ;;  %1262 = vmatmul.mubr.msk.f32.gmra.mrb[2].mxu1 %vm72_vm0, %v37_v16 }
  0x11   :  { %245 = vmatprep.mubr.f32.mxu0 %v1518_v3  ;;  %341 = vmatprep.mubr.f32.mxu1 %v1518_v3 }
  0x14   :  { %1247 = vmatmul.mubr.msk.f32.gmra.mrb[4].mxu0 %vm72_vm0, %v22_v17  ;;  %1263 = vmatmul.mubr.msk.f32.gmra.mrb[4].mxu1 %vm72_vm0, %v38_v18 }
  0x15   :  { %251 = vmatprep.mubr.f32.mxu0 %v1518_v3  ;;  %347 = vmatprep.mubr.f32.mxu1 %v1518_v3 }
  0x18   :  { %1248 = vmatmul.mubr.msk.f32.gmra.mrb[6].mxu0 %vm72_vm0, %v23_v19  ;;  %1264 = vmatmul.mubr.msk.f32.gmra.mrb[6].mxu1 %vm72_vm0, %v39_v20 }
  0x19   :  { %257 = vmatprep.mubr.f32.mxu0 %v1518_v3  ;;  %353 = vmatprep.mubr.f32.mxu1 %v1518_v3 }
  0x1c   :  { %1249 = vmatmul.mubr.msk.f32.gmra.mrb[8].mxu0 %vm72_vm0, %v24_v21  ;;  %1265 = vmatmul.mubr.msk.f32.gmra.mrb[8].mxu1 %vm72_vm0, %v40_v22 }
  0x1d   :  { %263 = vmatprep.mubr.f32.mxu0 %v1518_v3  ;;  %359 = vmatprep.mubr.f32.mxu1 %v1518_v3 }
  0x20   :  { %1250 = vmatmul.mubr.msk.f32.gmra.mrb[10].mxu0 %vm72_vm0, %v25_v23  ;;  %1266 = vmatmul.mubr.msk.f32.gmra.mrb[10].mxu1 %vm72_vm0, %v41_v24 }
  0x21   :  { %269 = vmatprep.mubr.f32.mxu0 %v1518_v3  ;;  %365 = vmatprep.mubr.f32.mxu1 %v1518_v3 }
  0x24   :  { %1251 = vmatmul.mubr.msk.f32.gmra.mrb[12].mxu0 %vm72_vm0, %v26_v25  ;;  %1267 = vmatmul.mubr.msk.f32.gmra.mrb[12].mxu1 %vm72_vm0, %v42_v26 }
  0x25   :  { %275 = vmatprep.mubr.f32.mxu0 %v1518_v3  ;;  %371 = vmatprep.mubr.f32.mxu1 %v1518_v3 }
  0x28   :  { %1252 = vmatmul.mubr.msk.f32.gmra.mrb[14].mxu0 %vm72_vm0, %v27_v27  ;;  %1268 = vmatmul.mubr.msk.f32.gmra.mrb[14].mxu1 %vm72_vm0, %v43_v28 }
  0x29   :  { %281 = vmatprep.mubr.f32.mxu0 %v1518_v3  ;;  %377 = vmatprep.mubr.f32.mxu1 %v1518_v3 }
  0x2c   :  { %1253 = vmatmul.mubr.msk.f32.gmra.mrb[16].mxu0 %vm72_vm0, %v28_v29  ;;  %1269 = vmatmul.mubr.msk.f32.gmra.mrb[16].mxu1 %vm72_vm0, %v44_v30 }
  0x2d   :  { %287 = vmatprep.mubr.f32.mxu0 %v1518_v3  ;;  %383 = vmatprep.mubr.f32.mxu1 %v1518_v3 }
  0x30   :  { %1254 = vmatmul.mubr.msk.f32.gmra.mrb[18].mxu0 %vm72_vm0, %v29_v31  ;;  %1270 = vmatmul.mubr.msk.f32.gmra.mrb[18].mxu1 %vm72_vm0, %v45_v32 }
  0x31   :  { %293 = vmatprep.mubr.f32.mxu0 %v1518_v3  ;;  %389 = vmatprep.mubr.f32.mxu1 %v1518_v3 }
  0x34   :  { %1255 = vmatmul.mubr.msk.f32.gmra.mrb[20].mxu0 %vm72_vm0, %v30_v33  ;;  %1271 = vmatmul.mubr.msk.f32.gmra.mrb[20].mxu1 %vm72_vm0, %v46_v34 }
  0x35   :  { %299 = vmatprep.mubr.f32.mxu0 %v1518_v3  ;;  %395 = vmatprep.mubr.f32.mxu1 %v1518_v3 }
  0x38   :  { %1256 = vmatmul.mubr.msk.f32.gmra.mrb[22].mxu0 %vm72_vm0, %v31_v35  ;;  %1272 = vmatmul.mubr.msk.f32.gmra.mrb[22].mxu1 %vm72_vm0, %v47_v36 }
  0x39   :  { %305 = vmatprep.mubr.f32.mxu0 %v1518_v3  ;;  %401 = vmatprep.mubr.f32.mxu1 %v1518_v3 }
  0x3c   :  { %1257 = vmatmul.mubr.msk.f32.gmra.mrb[24].mxu0 %vm72_vm0, %v32_v37  ;;  %1273 = vmatmul.mubr.msk.f32.gmra.mrb[24].mxu1 %vm72_vm0, %v48_v38 }
  0x3d   :  { %311 = vmatprep.mubr.f32.mxu0 %v1518_v3  ;;  %407 = vmatprep.mubr.f32.mxu1 %v1518_v3 }
  0x40   :  { %1258 = vmatmul.mubr.msk.f32.gmra.mrb[26].mxu0 %vm72_vm0, %v33_v39  ;;  %1274 = vmatmul.mubr.msk.f32.gmra.mrb[26].mxu1 %vm72_vm0, %v49_v40  ;;  %v68_v40 = vsub.s32 1, %v1733_v46 }
  0x41   :  { %317 = vmatprep.mubr.f32.mxu0 %v1518_v3  ;;  %413 = vmatprep.mubr.f32.mxu1 %v1518_v3 }
  0x44   :  { %1259 = vmatmul.mubr.msk.f32.gmra.mrb[28].mxu0 %vm72_vm0, %v34_v41  ;;  %1275 = vmatmul.mubr.msk.f32.gmra.mrb[28].mxu1 %vm72_vm0, %v50_v42 }
  0x45   :  { %323 = vmatprep.mubr.f32.mxu0 %v1518_v3  ;;  %419 = vmatprep.mubr.f32.mxu1 %v1518_v3 }
  0x48   :  { %1260 = vmatmul.mubr.msk.f32.gmra.mrb[30].mxu0 %vm72_vm0, %v35_v43  ;;  %1276 = vmatmul.mubr.msk.f32.gmra.mrb[30].mxu1 %vm72_vm0, %v51_v44 }
  0xdf   :  { %v235_v50 = vpop.f32.mrb[0].mxu0  ;;  %v331_v51 = vpop.f32.mrb[0].mxu1 }
  0xe0   :  { %v1745_v52 = vadd.f32 %v235_v50, %v1742_v49  ;;  %v1747_v53 = vpop.f32.mrb[1].mxu0  ;;  %v1749_v54 = vpop.f32.mrb[1].mxu1  ;;  %v1752_v55 = vadd.f32 %v331_v51, %v1742_v49  ;;  %v1865_v50 = vrot.slane %v1739_v48, %v68_v40 }
  0xe2   :  { %426 = vadd.xlane.f32.xlu0 %v1745_v52  ;;  %2862 = vst [vmem:[#allocation7_spill] sm:$0xff] %v1865_v50 }
  0xe3   :  { %v337_v56 = vpop.f32.mrb[2].mxu1  ;;  %v241_v57 = vpop.f32.mrb[2].mxu0 }
  0xe4   :  { %v1756_v58 = vadd.f32 %v337_v56, %v1742_v49  ;;  %v1758_v59 = vpop.f32.mrb[3].mxu0  ;;  %v1760_v60 = vpop.f32.mrb[3].mxu1  ;;  %v1763_v61 = vadd.f32 %v241_v57, %v1742_v49 }
  0xe6   :  { %460 = vadd.xlane.f32.xlu1 %v1756_v58  ;;  %458 = vadd.xlane.f32.xlu0 %v1752_v55 }
  0xe7   :  { %v247_v62 = vpop.f32.mrb[4].mxu0  ;;  %v343_v63 = vpop.f32.mrb[4].mxu1 }
  0xe8   :  { %v1768_v0 = vadd.f32 %v247_v62, %v1742_v49  ;;  %v1770_v1 = vpop.f32.mrb[5].mxu0  ;;  %v1772_v2 = vpop.f32.mrb[5].mxu1  ;;  %v1777_v3 = vadd.f32 %v343_v63, %v1742_v49 }
  0xea   :  { %430 = vadd.xlane.f32.xlu1 %v1768_v0  ;;  %428 = vadd.xlane.f32.xlu0 %v1763_v61 }
  0xeb   :  { %v253_v4 = vpop.f32.mrb[6].mxu0  ;;  %v349_v5 = vpop.f32.mrb[6].mxu1 }
  0xec   :  { %v1780_v6 = vadd.f32 %v253_v4, %v1742_v49  ;;  %v1782_v7 = vpop.f32.mrb[7].mxu0  ;;  %v1784_v8 = vpop.f32.mrb[7].mxu1  ;;  %v1789_v9 = vadd.f32 %v349_v5, %v1742_v49 }
  0xee   :  { %432 = vadd.xlane.f32.xlu1 %v1780_v6  ;;  %462 = vadd.xlane.f32.xlu0 %v1777_v3 }
  0xef   :  { %v259_v10 = vpop.f32.mrb[8].mxu0  ;;  %v355_v11 = vpop.f32.mrb[8].mxu1 }
  0xf0   :  { %v1792_v12 = vadd.f32 %v259_v10, %v1742_v49  ;;  %v1794_v13 = vpop.f32.mrb[9].mxu0  ;;  %v1796_v14 = vpop.f32.mrb[9].mxu1  ;;  %v1801_v15 = vadd.f32 %v355_v11, %v1742_v49 }
  0xf2   :  { %464 = vadd.xlane.f32.xlu1 %v1789_v9  ;;  %434 = vadd.xlane.f32.xlu0 %v1792_v12 }
  0xf3   :  { %v265_v16 = vpop.f32.mrb[10].mxu0  ;;  %v361_v17 = vpop.f32.mrb[10].mxu1 }
  0xf4   :  { %v1804_v18 = vadd.f32 %v265_v16, %v1742_v49  ;;  %v1806_v19 = vpop.f32.mrb[11].mxu0  ;;  %v1808_v20 = vpop.f32.mrb[11].mxu1  ;;  %v1813_v21 = vadd.f32 %v361_v17, %v1742_v49 }
  0xf6   :  { %436 = vadd.xlane.f32.xlu1 %v1804_v18  ;;  %466 = vadd.xlane.f32.xlu0 %v1801_v15 }
  0xf7   :  { %v271_v22 = vpop.f32.mrb[12].mxu0  ;;  %v367_v23 = vpop.f32.mrb[12].mxu1 }
  0xf8   :  { %v1816_v24 = vadd.f32 %v271_v22, %v1742_v49  ;;  %v1818_v25 = vpop.f32.mrb[13].mxu0  ;;  %v1820_v26 = vpop.f32.mrb[13].mxu1  ;;  %v1825_v27 = vadd.f32 %v367_v23, %v1742_v49 }
  0xfa   :  { %468 = vadd.xlane.f32.xlu1 %v1813_v21  ;;  %438 = vadd.xlane.f32.xlu0 %v1816_v24 }
  0xfb   :  { %v277_v28 = vpop.f32.mrb[14].mxu0  ;;  %v373_v29 = vpop.f32.mrb[14].mxu1 }
  0xfc   :  { %v1828_v30 = vadd.f32 %v277_v28, %v1742_v49  ;;  %v1830_v31 = vpop.f32.mrb[15].mxu0  ;;  %v1832_v32 = vpop.f32.mrb[15].mxu1  ;;  %v1837_v33 = vadd.f32 %v373_v29, %v1742_v49 }
  0xfd   :  { %2857 = vst [vmem:[#allocation2_spill] sm:$0xff] %v1832_v32 }
  0xfe   :  { %440 = vadd.xlane.f32.xlu1 %v1828_v30  ;;  %470 = vadd.xlane.f32.xlu0 %v1825_v27 }
  0xff   :  { %v283_v34 = vpop.f32.mrb[16].mxu0  ;;  %v379_v35 = vpop.f32.mrb[16].mxu1 }
 0x100   :  { %v1840_v36 = vadd.f32 %v283_v34, %v1742_v49  ;;  %v1842_v37 = vpop.f32.mrb[17].mxu0  ;;  %v1844_v38 = vpop.f32.mrb[17].mxu1  ;;  %v1849_v39 = vadd.f32 %v379_v35, %v1742_v49 }
 0x101   :  { %2858 = vst [vmem:[#allocation3_spill] sm:$0xff] %v1842_v37  ;;  %2859 = vst [vmem:[#allocation4_spill] sm:$0xff] %v1844_v38 }
 0x102   :  { %472 = vadd.xlane.f32.xlu1 %v1837_v33  ;;  %442 = vadd.xlane.f32.xlu0 %v1840_v36 }
 0x103   :  { %v289_v41 = vpop.f32.mrb[18].mxu0  ;;  %v385_v42 = vpop.f32.mrb[18].mxu1 }
 0x104   :  { %v1853_v43 = vadd.f32 %v289_v41, %v1742_v49  ;;  %v1855_v44 = vpop.f32.mrb[19].mxu0  ;;  %v1857_v45 = vpop.f32.mrb[19].mxu1  ;;  %v1862_v47 = vadd.f32 %v385_v42, %v1742_v49 }
 0x105   :  { %2860 = vst [vmem:[#allocation5_spill] sm:$0xff] %v1855_v44  ;;  %2861 = vst [vmem:[#allocation6_spill] sm:$0xff] %v1857_v45 }
 0x106   :  { %444 = vadd.xlane.f32.xlu1 %v1853_v43  ;;  %474 = vadd.xlane.f32.xlu0 %v1849_v39 }
 0x107   :  { %v295_v46 = vpop.f32.mrb[20].mxu0  ;;  %v391_v51 = vpop.f32.mrb[20].mxu1 }
 0x108   :  { %v1868_v56 = vadd.f32 %v295_v46, %v1742_v49  ;;  %v1870_v57 = vpop.f32.mrb[21].mxu0  ;;  %v393_v62 = vpop.f32.mrb[21].mxu1  ;;  %v1878_v4 = vadd.f32 %v391_v51, %v1742_v49 }
 0x109   :  { %2863 = vst [vmem:[#allocation8_spill] sm:$0xff] %v1870_v57  ;;  %v1873_v63 = vadd.f32 %v393_v62, %v1865_v50 }
 0x10a   :  { %476 = vadd.xlane.f32.xlu1 %v1862_v47  ;;  %446 = vadd.xlane.f32.xlu0 %v1868_v56 }
 0x10b   :  { %2864 = vst [vmem:[#allocation9_spill] sm:$0xff] %v1873_v63  ;;  %v301_v48 = vpop.f32.mrb[22].mxu0  ;;  %v397_v5 = vpop.f32.mrb[22].mxu1 }
 0x10c   :  { %v1881_v10 = vadd.f32 %v301_v48, %v1742_v49  ;;  %v303_v11 = vpop.f32.mrb[23].mxu0  ;;  %v399_v16 = vpop.f32.mrb[23].mxu1  ;;  %v1892_v23 = vadd.f32 %v397_v5, %v1742_v49 }
 0x10d   :  { %v1884_v17 = vadd.f32 %v303_v11, %v1865_v50  ;;  %v1887_v22 = vadd.f32 %v399_v16, %v1865_v50 }
 0x10e   :  { %448 = vadd.xlane.f32.xlu1 %v1881_v10  ;;  %478 = vadd.xlane.f32.xlu0 %v1878_v4 }
 0x10f   :  { %2865 = vst [vmem:[#allocation10_spill] sm:$0xff] %v1884_v17  ;;  %2866 = vst [vmem:[#allocation11_spill] sm:$0xff] %v1887_v22  ;;  %v307_v28 = vpop.f32.mrb[24].mxu0  ;;  %v403_v29 = vpop.f32.mrb[24].mxu1 }
 0x110   :  { %v1895_v34 = vadd.f32 %v307_v28, %v1742_v49  ;;  %v309_v35 = vpop.f32.mrb[25].mxu0  ;;  %v405_v40 = vpop.f32.mrb[25].mxu1  ;;  %v1906_v46 = vadd.f32 %v403_v29, %v1742_v49 }
 0x111   :  { %v1898_v41 = vadd.f32 %v309_v35, %v1865_v50  ;;  %v1901_v42 = vadd.f32 %v405_v40, %v1865_v50 }
 0x112   :  { %480 = vadd.xlane.f32.xlu1 %v1892_v23  ;;  %450 = vadd.xlane.f32.xlu0 %v1895_v34 }
 0x113   :  { %2867 = vst [vmem:[#allocation12_spill] sm:$0xff] %v1898_v41  ;;  %2868 = vst [vmem:[#allocation13_spill] sm:$0xff] %v1901_v42  ;;  %v313_v51 = vpop.f32.mrb[26].mxu0  ;;  %v409_v62 = vpop.f32.mrb[26].mxu1 }
 0x114   :  { %v1909_v48 = vadd.f32 %v313_v51, %v1742_v49  ;;  %v315_v5 = vpop.f32.mrb[27].mxu0  ;;  %v411_v11 = vpop.f32.mrb[27].mxu1  ;;  %v1920_v29 = vadd.f32 %v409_v62, %v1742_v49 }
 0x115   :  { %v1912_v16 = vadd.f32 %v315_v5, %v1865_v50  ;;  %v1915_v28 = vadd.f32 %v411_v11, %v1865_v50 }
 0x116   :  { %452 = vadd.xlane.f32.xlu1 %v1909_v48  ;;  %482 = vadd.xlane.f32.xlu0 %v1906_v46 }
 0x117   :  { %2869 = vst [vmem:[#allocation14_spill] sm:$0xff] %v1912_v16  ;;  %2870 = vst [vmem:[#allocation15_spill] sm:$0xff] %v1915_v28  ;;  %v319_v35 = vpop.f32.mrb[28].mxu0  ;;  %v415_v40 = vpop.f32.mrb[28].mxu1 }
 0x118   :  { %v1923_v51 = vadd.f32 %v319_v35, %v1742_v49  ;;  %v321_v42 = vpop.f32.mrb[29].mxu0  ;;  %v417_v22 = vpop.f32.mrb[29].mxu1  ;;  %v1934_v62 = vadd.f32 %v415_v40, %v1742_v49 }
 0x119   :  { %v1926_v5 = vadd.f32 %v321_v42, %v1865_v50  ;;  %v1929_v11 = vadd.f32 %v417_v22, %v1865_v50 }
 0x11a   :  { %484 = vadd.xlane.f32.xlu1 %v1920_v29  ;;  %454 = vadd.xlane.f32.xlu0 %v1923_v51 }
 0x11b   :  { %2871 = vst [vmem:[#allocation16_spill] sm:$0xff] %v1926_v5  ;;  %2872 = vst [vmem:[#allocation17_spill] sm:$0xff] %v1929_v11  ;;  %v325_v28 = vpop.f32.mrb[30].mxu0  ;;  %v421_v16 = vpop.f32.mrb[30].mxu1 }
 0x11c   :  { %v1937_v35 = vadd.f32 %v325_v28, %v1742_v49  ;;  %v327_v41 = vpop.f32.mrb[31].mxu0  ;;  %v1940_v17 = vadd.f32 %v421_v16, %v1742_v49  ;;  %v423_v42 = vpop.f32.mrb[31].mxu1 }
 0x11d   :  { %v1943_v22 = vadd.f32 %v327_v41, %v1865_v50  ;;  %v1946_v11 = vadd.f32 %v423_v42, %v1865_v50 }
 0x11e   :  { %456 = vadd.xlane.f32.xlu1 %v1937_v35  ;;  %486 = vadd.xlane.f32.xlu0 %v1934_v62 }
 0x11f   :  { %2873 = vst [vmem:[#allocation18_spill] sm:$0xff] %v1943_v22  ;;  %2874 = vst [vmem:[#allocation19_spill] sm:$0xff] %v1946_v11 }
 0x122   :  { %488 = vadd.xlane.f32.xlu1 %v1940_v17 }
 0x16f   :  { %v427_v40 = vpop.xlane.xlu0 %426 }
 0x170   :  { %v1951_v28 = vmul.f32 0.015625, %v427_v40 }
 0x172   :  { %v1955_v49 = vsub.f32 %v1745_v52, %v1951_v28 }
 0x173   :  { %v461_v16 = vpop.xlane.xlu1 %460  ;;  %v459_v5 = vpop.xlane.xlu0 %458 }
 0x174   :  { %v1957_v41 = vmul.f32 0.015625, %v459_v5  ;;  %v554_v42 = vmul.f32 %v1955_v49, %v1955_v49  ;;  %v1971_v57 = vmul.f32 0.015625, %v461_v16 }
 0x176   :  { %v1963_v11 = vsub.f32 %v1752_v55, %v1957_v41  ;;  %586 = vadd.xlane.f32.xlu0 %v554_v42  ;;  %v1989_v38 = vsub.f32 %v1756_v58, %v1971_v57 }
 0x177   :  { %v431_v22 = vpop.xlane.xlu1 %430  ;;  %v429_v63 = vpop.xlane.xlu0 %428 }
 0x178   :  { %v1965_v40 = vmul.f32 0.015625, %v431_v22  ;;  %v1967_v45 = vmul.f32 0.015625, %v429_v63  ;;  %v570_v52 = vmul.f32 %v1963_v11, %v1963_v11  ;;  %2876 = vst [vmem:[#allocation21_spill] sm:$0xff] %v1989_v38 }
 0x17a   :  { %v1975_v5 = vsub.f32 %v1768_v0, %v1965_v40  ;;  %v1979_v55 = vsub.f32 %v1763_v61, %v1967_v45  ;;  %618 = vadd.xlane.f32.xlu0 %v570_v52 }
 0x17b   :  { %v433_v42 = vpop.xlane.xlu1 %432  ;;  %v463_v44 = vpop.xlane.xlu0 %462 }
 0x17c   :  { %2875 = vst [vmem:[#allocation20_spill] sm:$0xff] %v1979_v55  ;;  %v1981_v22 = vmul.f32 0.015625, %v463_v44  ;;  %v556_v63 = vmul.f32 %v1975_v5, %v1975_v5  ;;  %v555_v16 = vmul.f32 %v1979_v55, %v1979_v55  ;;  %v1991_v0 = vmul.f32 0.015625, %v433_v42 }
 0x17d   :  { %v571_v42 = vmul.f32 %v1989_v38, %v1989_v38 }
 0x17e   :  { %v1995_v61 = vsub.f32 %v1777_v3, %v1981_v22  ;;  %590 = vadd.xlane.f32.xlu0 %v556_v63  ;;  %588 = vadd.xlane.f32.xlu1 %v555_v16  ;;  %v2003_v55 = vsub.f32 %v1780_v6, %v1991_v0 }
 0x17f   :  { %v465_v44 = vpop.xlane.xlu1 %464  ;;  %v435_v52 = vpop.xlane.xlu0 %434 }
 0x180   :  { %2877 = vst [vmem:[#allocation22_spill] sm:$0xff] %v1995_v61  ;;  %v1997_v32 = vmul.f32 0.015625, %v435_v52  ;;  %v572_v37 = vmul.f32 %v1995_v61, %v1995_v61  ;;  %2878 = vst [vmem:[#allocation23_spill] sm:$0xff] %v2003_v55  ;;  %v2005_v58 = vmul.f32 0.015625, %v465_v44  ;;  %v557_v38 = vmul.f32 %v2003_v55, %v2003_v55 }
 0x182   :  { %v2011_v3 = vsub.f32 %v1792_v12, %v1997_v32  ;;  %622 = vadd.xlane.f32.xlu0 %v572_v37  ;;  %620 = vadd.xlane.f32.xlu1 %v571_v42  ;;  %v2019_v6 = vsub.f32 %v1789_v9, %v2005_v58 }
 0x183   :  { %v437_v63 = vpop.xlane.xlu1 %436  ;;  %v467_v16 = vpop.xlane.xlu0 %466 }
 0x184   :  { %2879 = vst [vmem:[#allocation24_spill] sm:$0xff] %v2011_v3  ;;  %v2013_v52 = vmul.f32 0.015625, %v467_v16  ;;  %v558_v61 = vmul.f32 %v2011_v3, %v2011_v3  ;;  %2880 = vst [vmem:[#allocation25_spill] sm:$0xff] %v2019_v6  ;;  %v2021_v44 = vmul.f32 0.015625, %v437_v63  ;;  %v573_v55 = vmul.f32 %v2019_v6, %v2019_v6 }
 0x186   :  { %v2027_v12 = vsub.f32 %v1801_v15, %v2013_v52  ;;  %594 = vadd.xlane.f32.xlu0 %v558_v61  ;;  %592 = vadd.xlane.f32.xlu1 %v557_v38  ;;  %v2035_v9 = vsub.f32 %v1804_v18, %v2021_v44 }
 0x187   :  { %v469_v37 = vpop.xlane.xlu1 %468  ;;  %v439_v42 = vpop.xlane.xlu0 %438 }
 0x188   :  { %2881 = vst [vmem:[#allocation26_spill] sm:$0xff] %v2027_v12  ;;  %v2029_v16 = vmul.f32 0.015625, %v439_v42  ;;  %v574_v3 = vmul.f32 %v2027_v12, %v2027_v12  ;;  %2882 = vst [vmem:[#allocation27_spill] sm:$0xff] %v2035_v9  ;;  %v2037_v63 = vmul.f32 0.015625, %v469_v37  ;;  %v559_v6 = vmul.f32 %v2035_v9, %v2035_v9 }
 0x18a   :  { %v2043_v15 = vsub.f32 %v1816_v24, %v2029_v16  ;;  %626 = vadd.xlane.f32.xlu0 %v574_v3  ;;  %624 = vadd.xlane.f32.xlu1 %v573_v55  ;;  %v2051_v18 = vsub.f32 %v1813_v21, %v2037_v63 }
 0x18b   :  { %v441_v38 = vpop.xlane.xlu1 %440  ;;  %v471_v61 = vpop.xlane.xlu0 %470 }
 0x18c   :  { %2883 = vst [vmem:[#allocation28_spill] sm:$0xff] %v2043_v15  ;;  %v2045_v42 = vmul.f32 0.015625, %v471_v61  ;;  %v560_v12 = vmul.f32 %v2043_v15, %v2043_v15  ;;  %2884 = vst [vmem:[#allocation29_spill] sm:$0xff] %v2051_v18  ;;  %v2053_v37 = vmul.f32 0.015625, %v441_v38  ;;  %v575_v9 = vmul.f32 %v2051_v18, %v2051_v18 }
 0x18e   :  { %v2059_v24 = vsub.f32 %v1825_v27, %v2045_v42  ;;  %598 = vadd.xlane.f32.xlu0 %v560_v12  ;;  %596 = vadd.xlane.f32.xlu1 %v559_v6  ;;  %v2067_v21 = vsub.f32 %v1828_v30, %v2053_v37 }
 0x18f   :  { %v473_v55 = vpop.xlane.xlu1 %472  ;;  %v443_v3 = vpop.xlane.xlu0 %442 }
 0x190   :  { %2885 = vst [vmem:[#allocation30_spill] sm:$0xff] %v2059_v24  ;;  %v2061_v61 = vmul.f32 0.015625, %v443_v3  ;;  %v576_v15 = vmul.f32 %v2059_v24, %v2059_v24  ;;  %2886 = vst [vmem:[#allocation31_spill] sm:$0xff] %v2067_v21  ;;  %v2069_v38 = vmul.f32 0.015625, %v473_v55  ;;  %v561_v18 = vmul.f32 %v2067_v21, %v2067_v21 }
 0x192   :  { %v2075_v27 = vsub.f32 %v1840_v36, %v2061_v61  ;;  %630 = vadd.xlane.f32.xlu0 %v576_v15  ;;  %628 = vadd.xlane.f32.xlu1 %v575_v9  ;;  %v2083_v30 = vsub.f32 %v1837_v33, %v2069_v38 }
 0x193   :  { %v445_v6 = vpop.xlane.xlu1 %444  ;;  %v475_v12 = vpop.xlane.xlu0 %474 }
 0x194   :  { %2887 = vst [vmem:[#allocation32_spill] sm:$0xff] %v2075_v27  ;;  %v2077_v3 = vmul.f32 0.015625, %v475_v12  ;;  %v562_v24 = vmul.f32 %v2075_v27, %v2075_v27  ;;  %2888 = vst [vmem:[#allocation33_spill] sm:$0xff] %v2083_v30  ;;  %v2085_v55 = vmul.f32 0.015625, %v445_v6  ;;  %v577_v21 = vmul.f32 %v2083_v30, %v2083_v30 }
 0x196   :  { %v2091_v36 = vsub.f32 %v1849_v39, %v2077_v3  ;;  %602 = vadd.xlane.f32.xlu0 %v562_v24  ;;  %600 = vadd.xlane.f32.xlu1 %v561_v18  ;;  %v2099_v33 = vsub.f32 %v1853_v43, %v2085_v55 }
 0x197   :  { %v477_v9 = vpop.xlane.xlu1 %476  ;;  %v447_v15 = vpop.xlane.xlu0 %446 }
 0x198   :  { %2889 = vst [vmem:[#allocation34_spill] sm:$0xff] %v2091_v36  ;;  %v2093_v12 = vmul.f32 0.015625, %v447_v15  ;;  %v578_v27 = vmul.f32 %v2091_v36, %v2091_v36  ;;  %2890 = vst [vmem:[#allocation35_spill] sm:$0xff] %v2099_v33  ;;  %v2101_v6 = vmul.f32 0.015625, %v477_v9  ;;  %v563_v30 = vmul.f32 %v2099_v33, %v2099_v33 }
 0x19a   :  { %v2107_v39 = vsub.f32 %v1868_v56, %v2093_v12  ;;  %634 = vadd.xlane.f32.xlu0 %v578_v27  ;;  %632 = vadd.xlane.f32.xlu1 %v577_v21  ;;  %v2115_v43 = vsub.f32 %v1862_v47, %v2101_v6 }
 0x19b   :  { %v449_v18 = vpop.xlane.xlu1 %448  ;;  %v479_v24 = vpop.xlane.xlu0 %478 }
 0x19c   :  { %2891 = vst [vmem:[#allocation36_spill] sm:$0xff] %v2107_v39  ;;  %v2109_v15 = vmul.f32 0.015625, %v479_v24  ;;  %v564_v36 = vmul.f32 %v2107_v39, %v2107_v39  ;;  %2892 = vst [vmem:[#allocation37_spill] sm:$0xff] %v2115_v43  ;;  %v2117_v9 = vmul.f32 0.015625, %v449_v18  ;;  %v579_v33 = vmul.f32 %v2115_v43, %v2115_v43 }
 0x19e   :  { %v2123_v56 = vsub.f32 %v1878_v4, %v2109_v15  ;;  %606 = vadd.xlane.f32.xlu0 %v564_v36  ;;  %604 = vadd.xlane.f32.xlu1 %v563_v30  ;;  %v2131_v47 = vsub.f32 %v1881_v10, %v2117_v9 }
 0x19f   :  { %v481_v21 = vpop.xlane.xlu1 %480  ;;  %v451_v27 = vpop.xlane.xlu0 %450 }
 0x1a0   :  { %2893 = vst [vmem:[#allocation38_spill] sm:$0xff] %v2123_v56  ;;  %v2125_v24 = vmul.f32 0.015625, %v451_v27  ;;  %v580_v39 = vmul.f32 %v2123_v56, %v2123_v56  ;;  %2894 = vst [vmem:[#allocation39_spill] sm:$0xff] %v2131_v47  ;;  %v2133_v18 = vmul.f32 0.015625, %v481_v21  ;;  %v565_v43 = vmul.f32 %v2131_v47, %v2131_v47 }
 0x1a2   :  { %v2139_v4 = vsub.f32 %v1895_v34, %v2125_v24  ;;  %638 = vadd.xlane.f32.xlu0 %v580_v39  ;;  %636 = vadd.xlane.f32.xlu1 %v579_v33  ;;  %v2147_v10 = vsub.f32 %v1892_v23, %v2133_v18 }
 0x1a3   :  { %v453_v30 = vpop.xlane.xlu1 %452  ;;  %v483_v36 = vpop.xlane.xlu0 %482 }
 0x1a4   :  { %2895 = vst [vmem:[#allocation40_spill] sm:$0xff] %v2139_v4  ;;  %v2141_v27 = vmul.f32 0.015625, %v483_v36  ;;  %v566_v56 = vmul.f32 %v2139_v4, %v2139_v4  ;;  %2896 = vst [vmem:[#allocation41_spill] sm:$0xff] %v2147_v10  ;;  %v2149_v21 = vmul.f32 0.015625, %v453_v30  ;;  %v581_v47 = vmul.f32 %v2147_v10, %v2147_v10 }
 0x1a6   :  { %v2155_v34 = vsub.f32 %v1906_v46, %v2141_v27  ;;  %610 = vadd.xlane.f32.xlu0 %v566_v56  ;;  %608 = vadd.xlane.f32.xlu1 %v565_v43  ;;  %v2163_v23 = vsub.f32 %v1909_v48, %v2149_v21 }
 0x1a7   :  { %v485_v33 = vpop.xlane.xlu1 %484  ;;  %v455_v39 = vpop.xlane.xlu0 %454 }
 0x1a8   :  { %2897 = vst [vmem:[#allocation42_spill] sm:$0xff] %v2155_v34  ;;  %v2157_v36 = vmul.f32 0.015625, %v455_v39  ;;  %v582_v4 = vmul.f32 %v2155_v34, %v2155_v34  ;;  %2898 = vst [vmem:[#allocation43_spill] sm:$0xff] %v2163_v23  ;;  %v2165_v30 = vmul.f32 0.015625, %v485_v33  ;;  %v567_v10 = vmul.f32 %v2163_v23, %v2163_v23 }
 0x1aa   :  { %v2171_v46 = vsub.f32 %v1923_v51, %v2157_v36  ;;  %642 = vadd.xlane.f32.xlu0 %v582_v4  ;;  %640 = vadd.xlane.f32.xlu1 %v581_v47  ;;  %v2179_v48 = vsub.f32 %v1920_v29, %v2165_v30 }
 0x1ab   :  { %v457_v43 = vpop.xlane.xlu1 %456  ;;  %v487_v56 = vpop.xlane.xlu0 %486 }
 0x1ac   :  { %2899 = vst [vmem:[#allocation44_spill] sm:$0xff] %v2171_v46  ;;  %v2173_v39 = vmul.f32 0.015625, %v487_v56  ;;  %v568_v34 = vmul.f32 %v2171_v46, %v2171_v46  ;;  %2900 = vst [vmem:[#allocation45_spill] sm:$0xff] %v2179_v48  ;;  %v2181_v33 = vmul.f32 0.015625, %v457_v43  ;;  %v583_v43 = vmul.f32 %v2179_v48, %v2179_v48 }
 0x1ae   :  { %v2187_v51 = vsub.f32 %v1934_v62, %v2173_v39  ;;  %614 = vadd.xlane.f32.xlu0 %v568_v34  ;;  %612 = vadd.xlane.f32.xlu1 %v567_v10  ;;  %v2193_v56 = vsub.f32 %v1937_v35, %v2181_v33  ;;  %v650_v35 = vmul.f32 %v1951_v28, %v1951_v28 }
 0x1af   :  { %v489_v47 = vpop.xlane.xlu1 %488  ;;  %v2245_v28 = vadd.f32 %v1794_v13, %v1865_v50  ;;  %v652_v13 = vmul.f32 %v1965_v40, %v1965_v40  ;;  %v654_v40 = vmul.f32 %v1997_v32, %v1997_v32  ;;  %v671_v32 = vmul.f32 %v2037_v63, %v2037_v63 }
 0x1b0   :  { %2901 = vst [vmem:[#allocation46_spill] sm:$0xff] %v2187_v51  ;;  %v584_v4 = vmul.f32 %v2187_v51, %v2187_v51  ;;  %2902 = vst [vmem:[#allocation47_spill] sm:$0xff] %v2193_v56  ;;  %v2195_v29 = vmul.f32 0.015625, %v489_v47  ;;  %v569_v10 = vmul.f32 %v2193_v56, %v2193_v56  ;;  %v2211_v47 = vadd.f32 %v1747_v53, %v1865_v50 }
 0x1b1   :  { %v2231_v53 = vadd.f32 %v1782_v7, %v1865_v50  ;;  %v667_v7 = vmul.f32 %v1971_v57, %v1971_v57  ;;  %v2271_v57 = vadd.f32 %v1820_v26, %v1865_v50  ;;  %v669_v56 = vmul.f32 %v2005_v58, %v2005_v58 }
 0x1b2   :  { %2903 = vst [vmem:[#allocation48_spill] sm:$0xff] %v2195_v29  ;;  %646 = vadd.xlane.f32.xlu0 %v584_v4  ;;  %644 = vadd.xlane.f32.xlu1 %v583_v43  ;;  %v2201_v62 = vsub.f32 %v1940_v17, %v2195_v29  ;;  %v2215_v4 = vadd.f32 %v1749_v54, %v1865_v50  ;;  %v684_v48 = vmul.f32 64.0, %v652_v13 }
 0x1b3   :  { %v2219_v17 = vadd.f32 %v1758_v59, %v1865_v50  ;;  %v2223_v43 = vadd.f32 %v1760_v60, %v1865_v50  ;;  %v2235_v54 = vadd.f32 %v1772_v2, %v1865_v50  ;;  %v2239_v59 = vadd.f32 %v1784_v8, %v1865_v50  ;;  %2905 = vst [vmem:[#allocation50_spill] sm:$0xff] %v2271_v57 }
 0x1b4   :  { %2904 = vst [vmem:[#allocation49_spill] sm:$0xff] %v2201_v62  ;;  %v585_v34 = vmul.f32 %v2201_v62, %v2201_v62  ;;  %v666_v60 = vmul.f32 %v1957_v41, %v1957_v41  ;;  %v682_v2 = vmul.f32 64.0, %v650_v35  ;;  %v2259_v8 = vadd.f32 %v1808_v20, %v1865_v50 }
 0x1b5   :  { %v651_v41 = vmul.f32 %v1967_v45, %v1967_v45  ;;  %v2267_v62 = vadd.f32 %v1818_v25, %v1865_v50  ;;  %v2277_v35 = vadd.f32 %v1830_v31, %v1865_v50  ;;  %v653_v45 = vmul.f32 %v1991_v0, %v1991_v0 }
 0x1b6   :  { %616 = vadd.xlane.f32.xlu1 %v569_v10  ;;  %v2227_v10 = vadd.f32 %v1770_v1, %v1865_v50  ;;  %v2249_v1 = vadd.f32 %v1796_v14, %v1865_v50  ;;  %v698_v25 = vmul.f32 64.0, %v666_v60  ;;  %v670_v26 = vmul.f32 %v2013_v52, %v2013_v52 }
 0x1b7   :  { %2906 = vst [vmem:[#allocation51_spill] sm:$0xff] %v2277_v35  ;;  %v656_v31 = vmul.f32 %v2029_v16, %v2029_v16  ;;  %v683_v0 = vmul.f32 64.0, %v651_v41  ;;  %v657_v52 = vmul.f32 %v2053_v37, %v2053_v37  ;;  %v2301_v41 = vmul.f32 64.0, %v669_v56 }
 0x1b8   :  { %v2303_v13 = vmul.f32 64.0, %v670_v26  ;;  %v673_v63 = vmul.f32 %v2069_v38, %v2069_v38  ;;  %v659_v26 = vmul.f32 %v2085_v55, %v2085_v55 }
 0x1ba   :  { %648 = vadd.xlane.f32.xlu1 %v585_v34  ;;  %v2255_v34 = vadd.f32 %v1806_v19, %v1865_v50  ;;  %v668_v19 = vmul.f32 %v1981_v22, %v1981_v22  ;;  %v699_v22 = vmul.f32 64.0, %v667_v7  ;;  %v672_v7 = vmul.f32 %v2045_v42, %v2045_v42 }
 0x1bb   :  { %v2311_v42 = vmul.f32 64.0, %v656_v31  ;;  %v660_v31 = vmul.f32 %v2093_v12, %v2093_v12  ;;  %v2331_v55 = vmul.f32 64.0, %v673_v63  ;;  %v662_v12 = vmul.f32 %v2125_v24, %v2125_v24 }
 0x1bc   :  { %v700_v58 = vmul.f32 64.0, %v668_v19  ;;  %v678_v24 = vmul.f32 %v2141_v27, %v2141_v27  ;;  %v663_v27 = vmul.f32 %v2149_v21, %v2149_v21  ;;  %v679_v21 = vmul.f32 %v2165_v30, %v2165_v30 }
 0x203   :  { %v587_v14 = vpop.xlane.xlu0 %586 }
 0x204   :  { %v714_v20 = vsub.f32 %v587_v14, %v682_v2  ;;  %v655_v2 = vmul.f32 %v2021_v44, %v2021_v44  ;;  %v2299_v44 = vmul.f32 64.0, %v654_v40 }
 0x206   :  { %v746_v51 = vmul.f32 0.015625, %v714_v20  ;;  %v2297_v20 = vmul.f32 64.0, %v653_v45  ;;  %v2309_v19 = vmul.f32 64.0, %v655_v2  ;;  %v674_v45 = vmul.f32 %v2077_v3, %v2077_v3 }
 0x207   :  { %v619_v14 = vpop.xlane.xlu0 %618  ;;  %v675_v2 = vmul.f32 %v2101_v6, %v2101_v6 }
 0x208   :  { %v778_v60 = vadd.f32 1e-05, %v746_v51  ;;  %v730_v50 = vsub.f32 %v619_v14, %v698_v25  ;;  %v658_v51 = vmul.f32 %v2061_v61, %v2061_v61  ;;  %v2315_v25 = vmul.f32 64.0, %v671_v32 }
 0x209   :  { %v2319_v14 = vmul.f32 64.0, %v672_v7  ;;  %v2321_v61 = vmul.f32 64.0, %v657_v52  ;;  %v2343_v63 = vmul.f32 64.0, %v675_v2 }
 0x20a   :  { %1324 = vrsqrt.f32 %v778_v60  ;;  %v762_v16 = vmul.f32 0.015625, %v730_v50 }
 0x20b   :  { %v591_v37 = vpop.xlane.xlu0 %590  ;;  %v589_v50 = vpop.xlane.xlu1 %588 }
 0x20c   :  { %v794_v40 = vadd.f32 1e-05, %v762_v16  ;;  %v716_v56 = vsub.f32 %v591_v37, %v684_v48  ;;  %v715_v38 = vsub.f32 %v589_v50, %v683_v0  ;;  %v676_v48 = vmul.f32 %v2109_v15, %v2109_v15 }
 0x20d   :  { %v2329_v16 = vmul.f32 64.0, %v658_v51  ;;  %v661_v0 = vmul.f32 %v2117_v9, %v2117_v9  ;;  %v2335_v37 = vmul.f32 64.0, %v674_v45  ;;  %v2339_v15 = vmul.f32 64.0, %v659_v26 }
 0x20e   :  { %1326 = vrsqrt.f32 %v794_v40  ;;  %v748_v3 = vmul.f32 0.015625, %v716_v56  ;;  %v747_v32 = vmul.f32 0.015625, %v715_v38  ;;  %v2341_v56 = vmul.f32 64.0, %v660_v31 }
 0x20f   :  { %v623_v60 = vpop.xlane.xlu0 %622  ;;  %v621_v7 = vpop.xlane.xlu1 %620  ;;  %v677_v9 = vmul.f32 %v2133_v18, %v2133_v18  ;;  %v2347_v38 = vmul.f32 64.0, %v676_v48 }
 0x210   :  { %v780_v52 = vadd.f32 1e-05, %v748_v3  ;;  %v732_v6 = vsub.f32 %v623_v60, %v700_v58  ;;  %v779_v40 = vadd.f32 1e-05, %v747_v32  ;;  %v731_v50 = vsub.f32 %v621_v7, %v699_v22  ;;  %v2354_v22 = vld [vmem:[%s2822_s3] ss:$0 sm:$0xff] }
 0x211   :  { %v2357_v32 = vmul.f32 64.0, %v661_v0  ;;  %v664_v7 = vmul.f32 %v2157_v36, %v2157_v36 }
 0x212   :  { %1328 = vrsqrt.f32 %v780_v52  ;;  %v764_v51 = vmul.f32 0.015625, %v732_v6  ;;  %v763_v58 = vmul.f32 0.015625, %v731_v50  ;;  %v2361_v52 = vmul.f32 64.0, %v662_v12  ;;  %v2370_v6 = vld [vmem:[%s2823_s4] ss:$0 sm:$0xff] }
 0x213   :  { %1330 = vrsqrt.f32 %v779_v40  ;;  %v595_v45 = vpop.xlane.xlu0 %594  ;;  %v593_v2 = vpop.xlane.xlu1 %592  ;;  %v2373_v12 = vmul.f32 64.0, %v677_v9 }
 0x214   :  { %v1325_v3 = vpop.eup %1324  ;;  %v796_v26 = vadd.f32 1e-05, %v764_v51  ;;  %v718_v31 = vsub.f32 %v595_v45, %v2299_v44  ;;  %v795_v60 = vadd.f32 1e-05, %v763_v58  ;;  %v717_v48 = vsub.f32 %v593_v2, %v2297_v20 }
 0x215   :  { %v842_v18 = vmul.f32 %v1325_v3, %v1955_v49  ;;  %v2378_v58 = vmul.f32 64.0, %v678_v24 }
 0x216   :  { %1332 = vrsqrt.f32 %v796_v26  ;;  %v750_v44 = vmul.f32 0.015625, %v718_v31  ;;  %v749_v0 = vmul.f32 0.015625, %v717_v48  ;;  %v2385_v31 = vmul.f32 64.0, %v663_v27 }
 0x217   :  { %v881_v49 = vmul.f32 %v2354_v22, %v842_v18  ;;  %1334 = vrsqrt.f32 %v795_v60  ;;  %v627_v20 = vpop.xlane.xlu0 %626  ;;  %v625_v36 = vpop.xlane.xlu1 %624  ;;  %v2387_v18 = vmul.f32 64.0, %v664_v7  ;;  %v2396_v27 = vmul.f32 64.0, %v679_v21 }
 0x218   :  { %v1327_v40 = vpop.eup %1326  ;;  %v782_v50 = vadd.f32 1e-05, %v750_v44  ;;  %v734_v51 = vsub.f32 %v627_v20, %v2303_v13  ;;  %v781_v26 = vadd.f32 1e-05, %v749_v0  ;;  %v733_v2 = vsub.f32 %v625_v36, %v2301_v41 }
 0x219   :  { %v2381_v45 = vadd.f32 %v2370_v6, %v881_v49  ;;  %v858_v3 = vmul.f32 %v1327_v40, %v1963_v11  ;;  %v2393_v11 = vmul.f32 %v2181_v33, %v2181_v33 }
 0x21a   :  { %1336 = vrsqrt.f32 %v782_v50  ;;  %v766_v9 = vmul.f32 0.015625, %v734_v51  ;;  %v765_v24 = vmul.f32 0.015625, %v733_v2  ;;  %v2907_v50 = vld [vmem:[#allocation20_spill] sm:$0xff] }
 0x21b   :  { %v1279_v30 = vmul.f32 -1.442695, %v2381_v45  ;;  %v897_v13 = vmul.f32 %v2354_v22, %v858_v3  ;;  %1338 = vrsqrt.f32 %v781_v26  ;;  %v599_v60 = vpop.xlane.xlu0 %598  ;;  %v597_v41 = vpop.xlane.xlu1 %596  ;;  %v2406_v3 = vmul.f32 %v2173_v39, %v2173_v39  ;;  %v2908_v39 = vld [vmem:[#allocation22_spill] sm:$0xff] }
 0x21c   :  { %v1329_v48 = vpop.eup %1328  ;;  %v798_v44 = vadd.f32 1e-05, %v766_v9  ;;  %v720_v49 = vsub.f32 %v599_v60, %v2311_v42  ;;  %v797_v40 = vadd.f32 1e-05, %v765_v24  ;;  %v719_v33 = vsub.f32 %v597_v41, %v2309_v19 }
 0x21d   :  { %v1331_v7 = vpop.eup %1330  ;;  %1340 = vpow2.f32 %v1279_v30  ;;  %v2399_v0 = vadd.f32 %v2370_v6, %v897_v13  ;;  %v844_v20 = vmul.f32 %v1329_v48, %v1975_v5 }
 0x21e   :  { %v843_v36 = vmul.f32 %v1331_v7, %v2907_v50  ;;  %1342 = vrsqrt.f32 %v798_v44  ;;  %v752_v51 = vmul.f32 0.015625, %v720_v49  ;;  %v751_v9 = vmul.f32 0.015625, %v719_v33  ;;  %v2909_v49 = vld [vmem:[#allocation21_spill] sm:$0xff] }
 0x21f   :  { %v1295_v42 = vmul.f32 -1.442695, %v2399_v0  ;;  %v883_v21 = vmul.f32 %v2354_v22, %v844_v20  ;;  %1344 = vrsqrt.f32 %v797_v40  ;;  %v631_v26 = vpop.xlane.xlu0 %630  ;;  %v629_v13 = vpop.xlane.xlu1 %628 }
 0x220   :  { %v1333_v2 = vpop.eup %1332  ;;  %v882_v5 = vmul.f32 %v2354_v22, %v843_v36  ;;  %v784_v30 = vadd.f32 1e-05, %v752_v51  ;;  %v736_v24 = vsub.f32 %v631_v26, %v2319_v14  ;;  %v735_v44 = vsub.f32 %v629_v13, %v2315_v25 }
 0x221   :  { %v1335_v19 = vpop.eup %1334  ;;  %1346 = vpow2.f32 %v1295_v42  ;;  %v2413_v60 = vadd.f32 %v2370_v6, %v883_v21  ;;  %v860_v48 = vmul.f32 %v1333_v2, %v2908_v39  ;;  %v783_v20 = vadd.f32 1e-05, %v751_v9  ;;  %v2910_v9 = vld [vmem:[#allocation24_spill] sm:$0xff] }
 0x222   :  { %v2418_v41 = vadd.f32 %v2370_v6, %v882_v5  ;;  %v859_v7 = vmul.f32 %v1335_v19, %v2909_v49  ;;  %1348 = vrsqrt.f32 %v784_v30  ;;  %v767_v50 = vmul.f32 0.015625, %v735_v44  ;;  %v2911_v19 = vld [vmem:[#allocation23_spill] sm:$0xff] }
 0x223   :  { %v1281_v40 = vmul.f32 -1.442695, %v2413_v60  ;;  %v899_v14 = vmul.f32 %v2354_v22, %v860_v48  ;;  %v768_v36 = vmul.f32 0.015625, %v736_v24  ;;  %v603_v33 = vpop.xlane.xlu0 %602  ;;  %1350 = vrsqrt.f32 %v783_v20  ;;  %v601_v25 = vpop.xlane.xlu1 %600 }
 0x224   :  { %v1337_v51 = vpop.eup %1336  ;;  %v1280_v42 = vmul.f32 -1.442695, %v2418_v41  ;;  %v898_v21 = vmul.f32 %v2354_v22, %v859_v7  ;;  %v722_v26 = vsub.f32 %v603_v33, %v2329_v16  ;;  %v799_v13 = vadd.f32 1e-05, %v767_v50 }
 0x225   :  { %v1339_v2 = vpop.eup %1338  ;;  %1352 = vpow2.f32 %v1281_v40  ;;  %v2427_v5 = vadd.f32 %v2370_v6, %v899_v14  ;;  %v846_v30 = vmul.f32 %v1337_v51, %v2910_v9  ;;  %v800_v48 = vadd.f32 1e-05, %v768_v36 }
 0x226   :  { %1354 = vpow2.f32 %v1280_v42  ;;  %v2431_v24 = vadd.f32 %v2370_v6, %v898_v21  ;;  %v845_v39 = vmul.f32 %v1339_v2, %v2911_v19  ;;  %v721_v7 = vsub.f32 %v601_v25, %v2321_v61  ;;  %v2912_v42 = vld [vmem:[#allocation26_spill] sm:$0xff]  ;;  %v2913_v25 = vld [vmem:[#allocation25_spill] sm:$0xff] }
 0x227   :  { %v1341_v44 = vpop.eup %1340  ;;  %v1297_v49 = vmul.f32 -1.442695, %v2427_v5  ;;  %v885_v16 = vmul.f32 %v2354_v22, %v846_v30  ;;  %1356 = vrsqrt.f32 %v799_v13  ;;  %v633_v33 = vpop.xlane.xlu1 %632  ;;  %v754_v13 = vmul.f32 0.015625, %v722_v26  ;;  %v2914_v26 = vld [vmem:[#allocation28_spill] sm:$0xff] }
 0x228   :  { %v1343_v20 = vpop.eup %1342  ;;  %v1048_v40 = vadd.f32 1.0, %v1341_v44  ;;  %v1296_v14 = vmul.f32 -1.442695, %v2431_v24  ;;  %v884_v50 = vmul.f32 %v2354_v22, %v845_v39  ;;  %1358 = vrsqrt.f32 %v800_v48  ;;  %v635_v9 = vpop.xlane.xlu0 %634 }
 0x229   :  { %v1345_v51 = vpop.eup %1344  ;;  %1360 = vpow2.f32 %v1297_v49  ;;  %v2440_v36 = vadd.f32 %v2370_v6, %v885_v16  ;;  %v862_v21 = vmul.f32 %v1343_v20, %v2912_v42  ;;  %v753_v2 = vmul.f32 0.015625, %v721_v7 }
 0x22a   :  { %1362 = vrcp.f32 %v1048_v40  ;;  %v2444_v61 = vadd.f32 %v2370_v6, %v884_v50  ;;  %v861_v30 = vmul.f32 %v1345_v51, %v2913_v25  ;;  %v2451_v40 = vadd.f32 1e-05, %v754_v13 }
 0x22b   :  { %v1347_v19 = vpop.eup %1346  ;;  %1364 = vpow2.f32 %v1296_v14  ;;  %v1283_v39 = vmul.f32 -1.442695, %v2440_v36  ;;  %v901_v48 = vmul.f32 %v2354_v22, %v862_v21  ;;  %v785_v44 = vadd.f32 1e-05, %v753_v2  ;;  %v605_v50 = vpop.xlane.xlu1 %604 }
 0x22c   :  { %v1349_v49 = vpop.eup %1348  ;;  %v1064_v16 = vadd.f32 1.0, %v1347_v19  ;;  %v1282_v20 = vmul.f32 -1.442695, %v2444_v61  ;;  %v900_v7 = vmul.f32 %v2354_v22, %v861_v30  ;;  %v737_v42 = vsub.f32 %v633_v33, %v2331_v55 }
 0x22d   :  { %1366 = vpow2.f32 %v1283_v39  ;;  %v2454_v51 = vadd.f32 %v2370_v6, %v901_v48  ;;  %v848_v14 = vmul.f32 %v1349_v49, %v2914_v26  ;;  %v1351_v25 = vpop.eup %1350  ;;  %v738_v2 = vsub.f32 %v635_v9, %v2335_v37  ;;  %v2915_v39 = vld [vmem:[#allocation27_spill] sm:$0xff]  ;;  %v607_v26 = vpop.xlane.xlu0 %606 }
 0x22e   :  { %1368 = vrcp.f32 %v1064_v16  ;;  %v2459_v21 = vadd.f32 %v2370_v6, %v900_v7  ;;  %v723_v30 = vsub.f32 %v605_v50, %v2339_v15  ;;  %v847_v48 = vmul.f32 %v1351_v25, %v2915_v39 }
 0x22f   :  { %v1353_v13 = vpop.eup %1352  ;;  %1370 = vpow2.f32 %v1282_v20  ;;  %v1299_v19 = vmul.f32 -1.442695, %v2454_v51  ;;  %v887_v49 = vmul.f32 %v2354_v22, %v848_v14  ;;  %v769_v7 = vmul.f32 0.015625, %v737_v42  ;;  %v2916_v20 = vld [vmem:[#allocation29_spill] sm:$0xff] }
 0x230   :  { %v1355_v55 = vpop.eup %1354  ;;  %v1050_v33 = vadd.f32 1.0, %v1353_v13  ;;  %v1298_v16 = vmul.f32 -1.442695, %v2459_v21  ;;  %1372 = vrsqrt.f32 %v785_v44  ;;  %v886_v37 = vmul.f32 %v2354_v22, %v847_v48  ;;  %v637_v48 = vpop.xlane.xlu1 %636 }
 0x231   :  { %v1357_v46 = vpop.eup %1356  ;;  %v1049_v35 = vadd.f32 1.0, %v1355_v55  ;;  %1374 = vpow2.f32 %v1299_v19  ;;  %v2469_v15 = vadd.f32 %v2370_v6, %v887_v49  ;;  %v2472_v14 = vadd.f32 1e-05, %v769_v7  ;;  %v2917_v19 = vld [vmem:[#allocation30_spill] sm:$0xff] }
 0x232   :  { %v1359_v9 = vpop.eup %1358  ;;  %1376 = vrcp.f32 %v1050_v33  ;;  %v863_v50 = vmul.f32 %v1357_v46, %v2916_v20  ;;  %v770_v25 = vmul.f32 0.015625, %v738_v2  ;;  %v2475_v44 = vadd.f32 %v2370_v6, %v886_v37  ;;  %v639_v37 = vpop.xlane.xlu0 %638 }
 0x233   :  { %v1361_v13 = vpop.eup %1360  ;;  %1378 = vrcp.f32 %v1049_v35  ;;  %v1285_v42 = vmul.f32 -1.442695, %v2469_v15  ;;  %v864_v39 = vmul.f32 %v1359_v9, %v2917_v19 }
 0x234   :  { %v1363_v55 = vpop.eup %1362  ;;  %v1066_v49 = vadd.f32 1.0, %v1361_v13  ;;  %1380 = vpow2.f32 %v1298_v16  ;;  %v902_v33 = vmul.f32 %v2354_v22, %v863_v50  ;;  %v2480_v23 = vadd.f32 1e-05, %v770_v25 }
 0x235   :  { %v1365_v46 = vpop.eup %1364  ;;  %v1144_v2 = vmul.f32 %v1363_v55, %v2381_v45  ;;  %v1284_v35 = vmul.f32 -1.442695, %v2475_v44  ;;  %1382 = vpow2.f32 %v1285_v42  ;;  %v903_v7 = vmul.f32 %v2354_v22, %v864_v39 }
 0x236   :  { %v1065_v20 = vadd.f32 1.0, %v1365_v46  ;;  %1384 = vrcp.f32 %v1066_v49  ;;  %v2486_v9 = vadd.f32 %v2370_v6, %v902_v33  ;;  %v755_v13 = vmul.f32 0.015625, %v723_v30 }
 0x237   :  { %v1367_v16 = vpop.eup %1366  ;;  %v1176_v50 = vadd.f32 %v1144_v2, %v2211_v47  ;;  %1386 = vpow2.f32 %v1284_v35  ;;  %v2490_v25 = vadd.f32 %v2370_v6, %v903_v7  ;;  %v724_v45 = vsub.f32 %v607_v26, %v2341_v56  ;;  %v609_v26 = vpop.xlane.xlu1 %608 }
 0x238   :  { %v1369_v19 = vpop.eup %1368  ;;  %1388 = vrcp.f32 %v1065_v20  ;;  %v1052_v42 = vadd.f32 1.0, %v1367_v16  ;;  %v1300_v39 = vmul.f32 -1.442695, %v2486_v9  ;;  %v2494_v55 = vadd.f32 1e-05, %v755_v13  ;;  %v2918_v13 = vld [vmem:[#allocation31_spill] sm:$0xff] }
 0x239   :  { %v1371_v49 = vpop.eup %1370  ;;  %1209 = vst.msk [vmem:[%s2824_s5] sm:$0xff] %vm1208_vm1, %v1176_v50  ;;  %v1160_v47 = vmul.f32 %v1369_v19, %v2399_v0  ;;  %v1301_v30 = vmul.f32 -1.442695, %v2490_v25  ;;  %1390 = vrsqrt.f32 %v2451_v40  ;;  %v756_v56 = vmul.f32 0.015625, %v724_v45  ;;  %v611_v50 = vpop.xlane.xlu0 %610 }
 0x23a   :  { %v1373_v33 = vpop.eup %1372  ;;  %v1051_v46 = vadd.f32 1.0, %v1371_v49  ;;  %1392 = vrcp.f32 %v1052_v42  ;;  %v739_v2 = vsub.f32 %v637_v48, %v2343_v63  ;;  %v740_v35 = vsub.f32 %v639_v37, %v2347_v38 }
 0x23b   :  { %v1375_v7 = vpop.eup %1374  ;;  %v1192_v20 = vadd.f32 %v1160_v47, %v2215_v4  ;;  %1394 = vpow2.f32 %v1300_v39  ;;  %v849_v16 = vmul.f32 %v1373_v33, %v2918_v13  ;;  %v788_v0 = vadd.f32 1e-05, %v756_v56 }
 0x23c   :  { %v1377_v19 = vpop.eup %1376  ;;  %1396 = vrcp.f32 %v1051_v46  ;;  %v1068_v40 = vadd.f32 1.0, %v1375_v7  ;;  %v771_v45 = vmul.f32 0.015625, %v739_v2  ;;  %v772_v57 = vmul.f32 0.015625, %v740_v35 }
 0x23d   :  { %v1379_v29 = vpop.eup %1378  ;;  %1225 = vst.msk [vmem:[%s2824_s5 + $0x80] sm:$0xff] %vm1208_vm1, %v1192_v20  ;;  %v1146_v63 = vmul.f32 %v1377_v19, %v2413_v60  ;;  %1398 = vpow2.f32 %v1301_v30  ;;  %v888_v4 = vmul.f32 %v2354_v22, %v849_v16  ;;  %v725_v38 = vsub.f32 %v609_v26, %v2357_v32  ;;  %v641_v60 = vpop.xlane.xlu1 %640  ;;  %v2919_v16 = vld [vmem:[#allocation32_spill] sm:$0xff] }
 0x23e   :  { %v1381_v48 = vpop.eup %1380  ;;  %v1145_v37 = vmul.f32 %v1379_v29, %v2418_v41  ;;  %1400 = vrcp.f32 %v1068_v40  ;;  %v803_v42 = vadd.f32 1e-05, %v771_v45  ;;  %v2515_v39 = vadd.f32 1e-05, %v772_v57  ;;  %v643_v46 = vpop.xlane.xlu0 %642 }
 0x23f   :  { %v1383_v49 = vpop.eup %1382  ;;  %v1178_v47 = vadd.f32 %v1146_v63, %v2227_v10  ;;  %v1067_v56 = vadd.f32 1.0, %v1381_v48  ;;  %v2519_v33 = vadd.f32 %v2370_v6, %v888_v4  ;;  %1402 = vrsqrt.f32 %v2472_v14 }
 0x240   :  { %v1385_v30 = vpop.eup %1384  ;;  %v1177_v32 = vadd.f32 %v1145_v37, %v2219_v17  ;;  %v1054_v26 = vadd.f32 1.0, %v1383_v49  ;;  %1404 = vrsqrt.f32 %v2480_v23  ;;  %v757_v29 = vmul.f32 0.015625, %v725_v38 }
 0x241   :  { %v1387_v41 = vpop.eup %1386  ;;  %1211 = vst.msk [vmem:[%s2824_s5 + $0x10] sm:$0xff] %vm1208_vm1, %v1178_v47  ;;  %v1162_v10 = vmul.f32 %v1385_v30, %v2427_v5  ;;  %1406 = vrcp.f32 %v1067_v56  ;;  %v1286_v57 = vmul.f32 -1.442695, %v2519_v33  ;;  %v726_v14 = vsub.f32 %v611_v50, %v2361_v52 }
 0x242   :  { %v1389_v2 = vpop.eup %1388  ;;  %1210 = vst.msk [vmem:[%s2824_s5 + $0x8] sm:$0xff] %vm1208_vm1, %v1177_v32  ;;  %v1053_v23 = vadd.f32 1.0, %v1387_v41  ;;  %1408 = vrcp.f32 %v1054_v26  ;;  %v789_v17 = vadd.f32 1e-05, %v757_v29  ;;  %v741_v35 = vsub.f32 %v641_v60, %v2373_v12  ;;  %v615_v60 = vpop.xlane.xlu0 %614  ;;  %v2920_v29 = vld [vmem:[#allocation33_spill] sm:$0xff] }
 0x243   :  { %v1391_v7 = vpop.eup %1390  ;;  %v1161_v5 = vmul.f32 %v1389_v2, %v2431_v24  ;;  %v1194_v20 = vadd.f32 %v1162_v10, %v2235_v54  ;;  %1410 = vpow2.f32 %v1286_v57  ;;  %v758_v13 = vmul.f32 0.015625, %v726_v14  ;;  %v613_v24 = vpop.xlane.xlu1 %612  ;;  %v2921_v57 = vld [vmem:[#allocation34_spill] sm:$0xff] }
 0x244   :  { %v1393_v52 = vpop.eup %1392  ;;  %1412 = vrcp.f32 %v1053_v23  ;;  %v850_v50 = vmul.f32 %v1391_v7, %v2919_v16  ;;  %v773_v19 = vmul.f32 0.015625, %v741_v35  ;;  %v742_v40 = vsub.f32 %v643_v46, %v2378_v58 }
 0x245   :  { %v1395_v45 = vpop.eup %1394  ;;  %v1193_v63 = vadd.f32 %v1161_v5, %v2223_v43  ;;  %1227 = vst.msk [vmem:[%s2824_s5 + $0x90] sm:$0xff] %vm1208_vm1, %v1194_v20  ;;  %v1148_v12 = vmul.f32 %v1393_v52, %v2440_v36  ;;  %1414 = vrsqrt.f32 %v2494_v55  ;;  %v790_v54 = vadd.f32 1e-05, %v758_v13 }
 0x246   :  { %v1397_v4 = vpop.eup %1396  ;;  %v1069_v38 = vadd.f32 1.0, %v1395_v45  ;;  %v889_v48 = vmul.f32 %v2354_v22, %v850_v50  ;;  %1416 = vrsqrt.f32 %v788_v0  ;;  %v805_v58 = vadd.f32 1e-05, %v773_v19  ;;  %v2922_v19 = vld [vmem:[#allocation35_spill] sm:$0xff] }
 0x247   :  { %v1399_v37 = vpop.eup %1398  ;;  %1226 = vst.msk [vmem:[%s2824_s5 + $0x88] sm:$0xff] %vm1208_vm1, %v1193_v63  ;;  %v1147_v43 = vmul.f32 %v1397_v4, %v2444_v61  ;;  %v1180_v36 = vadd.f32 %v1148_v12, %v2245_v28  ;;  %1418 = vrsqrt.f32 %v803_v42  ;;  %v774_v55 = vmul.f32 0.015625, %v742_v40  ;;  %v2923_v12 = vld [vmem:[#allocation36_spill] sm:$0xff] }
 0x248   :  { %v1401_v49 = vpop.eup %1400  ;;  %1420 = vrcp.f32 %v1069_v38  ;;  %v1070_v47 = vadd.f32 1.0, %v1399_v37  ;;  %v2555_v56 = vadd.f32 %v2370_v6, %v889_v48  ;;  %v727_v0 = vsub.f32 %v613_v24, %v2385_v31  ;;  %v2924_v38 = vld [vmem:[#allocation37_spill] sm:$0xff] }
 0x249   :  { %v1403_v30 = vpop.eup %1402  ;;  %v1179_v32 = vadd.f32 %v1147_v43, %v2231_v53  ;;  %1213 = vst.msk [vmem:[%s2824_s5 + $0x20] sm:$0xff] %vm1208_vm1, %v1180_v36  ;;  %v1164_v28 = vmul.f32 %v1401_v49, %v2454_v51  ;;  %1422 = vrsqrt.f32 %v2515_v39  ;;  %v806_v61 = vadd.f32 1e-05, %v774_v55 }
 0x24a   :  { %v1405_v42 = vpop.eup %1404  ;;  %1424 = vrcp.f32 %v1070_v47  ;;  %v1287_v26 = vmul.f32 -1.442695, %v2555_v56  ;;  %v865_v31 = vmul.f32 %v1403_v30, %v2920_v29  ;;  %v759_v41 = vmul.f32 0.015625, %v727_v0  ;;  %v2925_v0 = vld [vmem:[#allocation38_spill] sm:$0xff] }
 0x24b   :  { %v1407_v10 = vpop.eup %1406  ;;  %1212 = vst.msk [vmem:[%s2824_s5 + $0x18] sm:$0xff] %vm1208_vm1, %v1179_v32  ;;  %v1196_v53 = vadd.f32 %v1164_v28, %v2249_v1  ;;  %v866_v51 = vmul.f32 %v1405_v42, %v2921_v57  ;;  %1426 = vrsqrt.f32 %v789_v17  ;;  %v728_v39 = vsub.f32 %v615_v60, %v2387_v18 }
 0x24c   :  { %v1409_v14 = vpop.eup %1408  ;;  %v1163_v46 = vmul.f32 %v1407_v10, %v2459_v21  ;;  %1428 = vpow2.f32 %v1287_v26  ;;  %v904_v2 = vmul.f32 %v2354_v22, %v865_v31  ;;  %v791_v23 = vadd.f32 1e-05, %v759_v41  ;;  %v2926_v31 = vld [vmem:[#allocation39_spill] sm:$0xff] }
 0x24d   :  { %v1411_v35 = vpop.eup %1410  ;;  %1229 = vst.msk [vmem:[%s2824_s5 + $0xa0] sm:$0xff] %vm1208_vm1, %v1196_v53  ;;  %v1150_v1 = vmul.f32 %v1409_v14, %v2469_v15  ;;  %v905_v7 = vmul.f32 %v2354_v22, %v866_v51  ;;  %1430 = vrsqrt.f32 %v790_v54  ;;  %v760_v17 = vmul.f32 0.015625, %v728_v39  ;;  %v2927_v53 = vld [vmem:[#allocation48_spill] sm:$0xff] }
 0x24e   :  { %v1413_v18 = vpop.eup %1412  ;;  %v1195_v5 = vadd.f32 %v1163_v46, %v2239_v59  ;;  %v1055_v21 = vadd.f32 1.0, %v1411_v35  ;;  %v2584_v20 = vadd.f32 %v2370_v6, %v904_v2  ;;  %1432 = vrsqrt.f32 %v805_v58  ;;  %v645_v58 = vpop.xlane.xlu1 %644  ;;  %v2929_v35 = vld [vmem:[#allocation40_spill] sm:$0xff] }
 0x24f   :  { %v1415_v13 = vpop.eup %1414  ;;  %v1149_v52 = vmul.f32 %v1413_v18, %v2475_v44  ;;  %v1182_v16 = vadd.f32 %v1150_v1, %v2267_v62  ;;  %v2589_v50 = vadd.f32 %v2370_v6, %v905_v7  ;;  %1434 = vrsqrt.f32 %v806_v61  ;;  %v2930_v7 = vld [vmem:[#allocation41_spill] sm:$0xff] }
 0x250   :  { %v1417_v15 = vpop.eup %1416  ;;  %1228 = vst.msk [vmem:[%s2824_s5 + $0x98] sm:$0xff] %vm1208_vm1, %v1195_v5  ;;  %1436 = vrcp.f32 %v1055_v21  ;;  %v1302_v59 = vmul.f32 -1.442695, %v2584_v20  ;;  %v851_v40 = vmul.f32 %v1415_v13, %v2922_v19  ;;  %v792_v45 = vadd.f32 1e-05, %v760_v17 }
 0x251   :  { %v1419_v63 = vpop.eup %1418  ;;  %v1181_v44 = vadd.f32 %v1149_v52, %v2255_v34  ;;  %1215 = vst.msk [vmem:[%s2824_s5 + $0x30] sm:$0xff] %vm1208_vm1, %v1182_v16  ;;  %v1303_v62 = vmul.f32 -1.442695, %v2589_v50  ;;  %v852_v54 = vmul.f32 %v1417_v15, %v2923_v12  ;;  %1438 = vrsqrt.f32 %v791_v23  ;;  %v2931_v52 = vld [vmem:[#allocation42_spill] sm:$0xff] }
 0x252   :  { %v1421_v24 = vpop.eup %1420  ;;  %1440 = vpow2.f32 %v1302_v59  ;;  %v890_v4 = vmul.f32 %v2354_v22, %v851_v40  ;;  %v867_v48 = vmul.f32 %v1419_v63, %v2924_v38  ;;  %v2607_v37 = vmul.f32 64.0, %v2406_v3 }
 0x253   :  { %v1423_v34 = vpop.eup %1422  ;;  %1214 = vst.msk [vmem:[%s2824_s5 + $0x28] sm:$0xff] %vm1208_vm1, %v1181_v44  ;;  %v1165_v43 = vmul.f32 %v1421_v24, %v2486_v9  ;;  %1442 = vpow2.f32 %v1303_v62  ;;  %v891_v36 = vmul.f32 %v2354_v22, %v852_v54  ;;  %v2616_v55 = vmul.f32 64.0, %v2393_v11  ;;  %v2932_v62 = vld [vmem:[#allocation43_spill] sm:$0xff]  ;;  %v617_v54 = vpop.xlane.xlu1 %616 }
 0x254   :  { %v1425_v49 = vpop.eup %1424  ;;  %v2619_v47 = vadd.f32 %v2370_v6, %v890_v4  ;;  %v906_v3 = vmul.f32 %v2354_v22, %v867_v48  ;;  %v868_v60 = vmul.f32 %v1423_v34, %v2925_v0  ;;  %1444 = vrsqrt.f32 %v792_v45  ;;  %v2933_v4 = vld [vmem:[#allocation51_spill] sm:$0xff]  ;;  %v647_v34 = vpop.xlane.xlu0 %646 }
 0x255   :  { %v1427_v30 = vpop.eup %1426  ;;  %v1197_v32 = vadd.f32 %v1165_v43, %v2259_v8  ;;  %v1166_v9 = vmul.f32 %v1425_v49, %v2490_v25  ;;  %v2626_v28 = vadd.f32 %v2370_v6, %v891_v36  ;;  %v743_v11 = vsub.f32 %v645_v58, %v2396_v27  ;;  %v2928_v27 = vld [vmem:[#allocation50_spill] sm:$0xff] }
 0x256   :  { %v1429_v61 = vpop.eup %1428  ;;  %v1288_v42 = vmul.f32 -1.442695, %v2619_v47  ;;  %v2631_v26 = vadd.f32 %v2370_v6, %v906_v3  ;;  %v907_v29 = vmul.f32 %v2354_v22, %v868_v60  ;;  %v853_v41 = vmul.f32 %v1427_v30, %v2926_v31  ;;  %v2934_v30 = vld [vmem:[#allocation44_spill] sm:$0xff] }
 0x257   :  { %v1431_v10 = vpop.eup %1430  ;;  %v2637_v8 = vmul.f32 %v2927_v53, %v2927_v53  ;;  %1230 = vst.msk [vmem:[%s2824_s5 + $0xa8] sm:$0xff] %vm1208_vm1, %v1197_v32  ;;  %v1198_v25 = vadd.f32 %v1166_v9, %v2928_v27  ;;  %v1056_v57 = vadd.f32 1.0, %v1429_v61  ;;  %v1289_v51 = vmul.f32 -1.442695, %v2626_v28  ;;  %v649_v53 = vpop.xlane.xlu1 %648 }
 0x258   :  { %v1433_v39 = vpop.eup %1432  ;;  %1446 = vpow2.f32 %v1288_v42  ;;  %v1304_v14 = vmul.f32 -1.442695, %v2631_v26  ;;  %v2647_v46 = vadd.f32 %v2370_v6, %v907_v29  ;;  %v892_v2 = vmul.f32 %v2354_v22, %v853_v41 }
 0x259   :  { %v1435_v23 = vpop.eup %1434  ;;  %1231 = vst.msk [vmem:[%s2824_s5 + $0xb0] sm:$0xff] %vm1208_vm1, %v1198_v25  ;;  %1448 = vrcp.f32 %v1056_v57  ;;  %v854_v1 = vmul.f32 %v1431_v10, %v2929_v35  ;;  %v869_v17 = vmul.f32 %v1433_v39, %v2930_v7  ;;  %v775_v18 = vmul.f32 0.015625, %v743_v11  ;;  %v2935_v39 = vld [vmem:[#allocation7_spill] sm:$0xff] }
 0x25a   :  { %v1437_v5 = vpop.eup %1436  ;;  %1450 = vpow2.f32 %v1289_v51  ;;  %v1305_v21 = vmul.f32 -1.442695, %v2647_v46  ;;  %v2658_v13 = vadd.f32 %v2370_v6, %v892_v2  ;;  %v870_v16 = vmul.f32 %v1435_v23, %v2931_v52 }
 0x25b   :  { %v1439_v15 = vpop.eup %1438  ;;  %v1151_v59 = vmul.f32 %v1437_v5, %v2519_v33  ;;  %1452 = vpow2.f32 %v1304_v14  ;;  %v893_v19 = vmul.f32 %v2354_v22, %v854_v1  ;;  %v908_v40 = vmul.f32 %v2354_v22, %v869_v17  ;;  %v2936_v14 = vld [vmem:[#allocation3_spill] sm:$0xff] }
 0x25c   :  { %v1441_v45 = vpop.eup %1440  ;;  %1454 = vpow2.f32 %v1305_v21  ;;  %v1290_v63 = vmul.f32 -1.442695, %v2658_v13  ;;  %v909_v44 = vmul.f32 %v2354_v22, %v870_v16  ;;  %v855_v12 = vmul.f32 %v1439_v15, %v2932_v62 }
 0x25d   :  { %v1443_v24 = vpop.eup %1442  ;;  %v1183_v38 = vadd.f32 %v1151_v59, %v2933_v4  ;;  %v1071_v48 = vadd.f32 1.0, %v1441_v45  ;;  %v2669_v33 = vadd.f32 %v2370_v6, %v893_v19  ;;  %v2672_v58 = vadd.f32 %v2370_v6, %v908_v40  ;;  %v2937_v45 = vld [vmem:[#allocation2_spill] sm:$0xff] }
 0x25e   :  { %v1445_v43 = vpop.eup %1444  ;;  %v1072_v36 = vadd.f32 1.0, %v1443_v24  ;;  %1456 = vpow2.f32 %v1290_v63  ;;  %v2675_v49 = vadd.f32 %v2370_v6, %v909_v44  ;;  %v894_v3 = vmul.f32 %v2354_v22, %v855_v12 }
 0x25f   :  { %1216 = vst.msk [vmem:[%s2824_s5 + $0x38] sm:$0xff] %vm1208_vm1, %v1183_v38  ;;  %1458 = vrcp.f32 %v1071_v48  ;;  %v1291_v0 = vmul.f32 -1.442695, %v2669_v33  ;;  %v1306_v60 = vmul.f32 -1.442695, %v2672_v58  ;;  %v856_v32 = vmul.f32 %v1445_v43, %v2934_v30 }
 0x260   :  { %1460 = vrcp.f32 %v1072_v36  ;;  %v1307_v9 = vmul.f32 -1.442695, %v2675_v49  ;;  %v2687_v11 = vadd.f32 %v2370_v6, %v894_v3  ;;  %v744_v61 = vsub.f32 %v647_v34, %v2607_v37 }
 0x261   :  { %1462 = vpow2.f32 %v1291_v0  ;;  %v895_v42 = vmul.f32 %v2354_v22, %v856_v32  ;;  %v729_v29 = vsub.f32 %v617_v54, %v2616_v55  ;;  %v807_v10 = vadd.f32 1e-05, %v775_v18  ;;  %v2938_v54 = vld [vmem:[#allocation4_spill] sm:$0xff] }
 0x262   :  { %v1447_v31 = vpop.eup %1446  ;;  %1464 = vpow2.f32 %v1306_v60  ;;  %v1292_v41 = vmul.f32 -1.442695, %v2687_v11  ;;  %v713_v51 = vmul.f32 64.0, %v2637_v8  ;;  %v286_v2 = vadd.f32 %v2936_v14, %v2935_v39  ;;  %v2942_v14 = vld [vmem:[#allocation6_spill] sm:$0xff] }
 0x263   :  { %v1449_v27 = vpop.eup %1448  ;;  %v1057_v25 = vadd.f32 1.0, %v1447_v31  ;;  %1466 = vpow2.f32 %v1307_v9  ;;  %v2694_v57 = vadd.f32 %v2370_v6, %v895_v42  ;;  %v776_v23 = vmul.f32 0.015625, %v744_v61  ;;  %v2939_v9 = vld [vmem:[#allocation5_spill] sm:$0xff] }
 0x264   :  { %v1451_v37 = vpop.eup %1450  ;;  %v1152_v55 = vmul.f32 %v1449_v27, %v2555_v56  ;;  %1468 = vpow2.f32 %v1292_v41  ;;  %v761_v7 = vmul.f32 0.015625, %v729_v29  ;;  %v745_v17 = vsub.f32 %v649_v53, %v713_v51  ;;  %v2940_v31 = vld [vmem:[#allocation45_spill] sm:$0xff]  ;;  %v2941_v53 = vld [vmem:[#allocation8_spill] sm:$0xff] }
 0x265   :  { %v1453_v35 = vpop.eup %1452  ;;  %1470 = vrcp.f32 %v1057_v25  ;;  %v1058_v1 = vadd.f32 1.0, %v1451_v37  ;;  %v1293_v52 = vmul.f32 -1.442695, %v2694_v57  ;;  %v808_v56 = vadd.f32 1e-05, %v776_v23 }
 0x266   :  { %v1455_v18 = vpop.eup %1454  ;;  %v1184_v5 = vadd.f32 %v1152_v55, %v286_v2  ;;  %v1073_v21 = vadd.f32 1.0, %v1453_v35  ;;  %1472 = vrsqrt.f32 %v807_v10  ;;  %v793_v19 = vadd.f32 1e-05, %v761_v7 }
 0x267   :  { %1474 = vrcp.f32 %v1058_v1  ;;  %v1074_v8 = vadd.f32 1.0, %v1455_v18  ;;  %v376_v63 = vadd.f32 %v2937_v45, %v2935_v39  ;;  %v777_v62 = vmul.f32 0.015625, %v745_v17  ;;  %v1516_v45 = vld [vmem:[%s2822_s3] ss:$0 sm:$0xff] }
 0x268   :  { %v1457_v16 = vpop.eup %1456  ;;  %1217 = vst.msk [vmem:[%s2824_s5 + $0x40] sm:$0xff] %vm1208_vm1, %v1184_v5  ;;  %1476 = vrcp.f32 %v1073_v21  ;;  %v382_v24 = vadd.f32 %v2938_v54, %v2935_v39  ;;  %v292_v61 = vadd.f32 %v2939_v9, %v2935_v39  ;;  %v298_v27 = vadd.f32 %v2941_v53, %v2935_v39 }
 0x269   :  { %v1459_v15 = vpop.eup %1458  ;;  %1478 = vrcp.f32 %v1074_v8  ;;  %v1059_v59 = vadd.f32 1.0, %v1457_v16  ;;  %v809_v60 = vadd.f32 1e-05, %v777_v62  ;;  %v388_v2 = vadd.f32 %v2942_v14, %v2935_v39 }
 0x26a   :  { %v1461_v40 = vpop.eup %1460  ;;  %v1167_v44 = vmul.f32 %v1459_v15, %v2584_v20  ;;  %1480 = vpow2.f32 %v1293_v52  ;;  %v2944_v52 = vld [vmem:[#allocation46_spill] sm:$0xff] }
 0x26b   :  { %v1463_v12 = vpop.eup %1462  ;;  %v1168_v4 = vmul.f32 %v1461_v40, %v2589_v50  ;;  %1482 = vrcp.f32 %v1059_v59 }
 0x26c   :  { %v1465_v38 = vpop.eup %1464  ;;  %v1199_v48 = vadd.f32 %v1167_v44, %v376_v63  ;;  %v1060_v34 = vadd.f32 1.0, %v1463_v12  ;;  %1484 = vrsqrt.f32 %v808_v56  ;;  %v2945_v56 = vld [vmem:[#allocation10_spill] sm:$0xff] }
 0x26d   :  { %v1467_v43 = vpop.eup %1466  ;;  %v1200_v36 = vadd.f32 %v1168_v4, %v382_v24  ;;  %v1075_v3 = vadd.f32 1.0, %v1465_v38  ;;  %1486 = vrsqrt.f32 %v793_v19  ;;  %v2947_v24 = vld [vmem:[#allocation12_spill] sm:$0xff] }
 0x26e   :  { %v1469_v0 = vpop.eup %1468  ;;  %1232 = vst.msk [vmem:[%s2824_s5 + $0xb8] sm:$0xff] %vm1208_vm1, %v1199_v48  ;;  %1488 = vrcp.f32 %v1060_v34  ;;  %v1076_v20 = vadd.f32 1.0, %v1467_v43  ;;  %v2948_v34 = vld [vmem:[#allocation11_spill] sm:$0xff] }
 0x26f   :  { %v1471_v30 = vpop.eup %1470  ;;  %1233 = vst.msk [vmem:[%s2824_s5 + $0xc0] sm:$0xff] %vm1208_vm1, %v1200_v36  ;;  %1490 = vrcp.f32 %v1075_v3  ;;  %v1061_v50 = vadd.f32 1.0, %v1469_v0  ;;  %v1517_v3 = vld [vmem:[%s2823_s4] ss:$0 sm:$0xff] }
 0x270   :  { %v1473_v32 = vpop.eup %1472  ;;  %v1153_v42 = vmul.f32 %v1471_v30, %v2619_v47  ;;  %1492 = vrcp.f32 %v1076_v20 }
 0x271   :  { %v1475_v29 = vpop.eup %1474  ;;  %1494 = vrcp.f32 %v1061_v50  ;;  %v871_v41 = vmul.f32 %v1473_v32, %v2940_v31 }
 0x272   :  { %v1477_v10 = vpop.eup %1476  ;;  %v1185_v25 = vadd.f32 %v1153_v42, %v292_v61  ;;  %v1154_v51 = vmul.f32 %v1475_v29, %v2626_v28  ;;  %1496 = vrsqrt.f32 %v809_v60  ;;  %v2950_v60 = vld [vmem:[#allocation49_spill] sm:$0xff] }
 0x273   :  { %v1479_v37 = vpop.eup %1478  ;;  %v1169_v55 = vmul.f32 %v1477_v10, %v2631_v26  ;;  %v910_v47 = vmul.f32 %v2354_v22, %v871_v41  ;;  %v2943_v22 = vld [vmem:[#allocation9_spill] sm:$0xff]  ;;  %v2952_v41 = vld [vmem:[#allocation16_spill] sm:$0xff] }
 0x274   :  { %v1481_v23 = vpop.eup %1480  ;;  %1218 = vst.msk [vmem:[%s2824_s5 + $0x48] sm:$0xff] %vm1208_vm1, %v1185_v25  ;;  %v1186_v35 = vadd.f32 %v1154_v51, %v298_v27  ;;  %v1170_v1 = vmul.f32 %v1479_v37, %v2647_v46 }
 0x275   :  { %v1483_v7 = vpop.eup %1482  ;;  %v1201_v28 = vadd.f32 %v1169_v55, %v388_v2  ;;  %v1062_v17 = vadd.f32 1.0, %v1481_v23  ;;  %v2736_v18 = vadd.f32 %v2370_v6, %v910_v47  ;;  %v2953_v47 = vld [vmem:[#allocation15_spill] sm:$0xff] }
 0x276   :  { %v1485_v39 = vpop.eup %1484  ;;  %1219 = vst.msk [vmem:[%s2824_s5 + $0x50] sm:$0xff] %vm1208_vm1, %v1186_v35  ;;  %v1202_v26 = vadd.f32 %v1170_v1, %v2943_v22  ;;  %v1155_v5 = vmul.f32 %v1483_v7, %v2658_v13  ;;  %v2946_v13 = vld [vmem:[#allocation47_spill] sm:$0xff]  ;;  %v2955_v22 = vld [vmem:[#allocation18_spill] sm:$0xff] }
 0x277   :  { %v1487_v21 = vpop.eup %1486  ;;  %1234 = vst.msk [vmem:[%s2824_s5 + $0xc8] sm:$0xff] %vm1208_vm1, %v1201_v28  ;;  %1498 = vrcp.f32 %v1062_v17  ;;  %v1308_v46 = vmul.f32 -1.442695, %v2736_v18  ;;  %v872_v8 = vmul.f32 %v1485_v39, %v2944_v52  ;;  %v2954_v17 = vld [vmem:[#allocation17_spill] sm:$0xff] }
 0x278   :  { %v1489_v16 = vpop.eup %1488  ;;  %1235 = vst.msk [vmem:[%s2824_s5 + $0xd0] sm:$0xff] %vm1208_vm1, %v1202_v26  ;;  %v1187_v15 = vadd.f32 %v1155_v5, %v2945_v56  ;;  %v857_v59 = vmul.f32 %v1487_v21, %v2946_v13  ;;  %v2956_v21 = vld [vmem:[#allocation19_spill] sm:$0xff] }
 0x279   :  { %v1491_v19 = vpop.eup %1490  ;;  %v1156_v40 = vmul.f32 %v1489_v16, %v2669_v33  ;;  %1500 = vpow2.f32 %v1308_v46  ;;  %v911_v63 = vmul.f32 %v1516_v45, %v872_v8 }
 0x27a   :  { %v1493_v44 = vpop.eup %1492  ;;  %1220 = vst.msk [vmem:[%s2824_s5 + $0x58] sm:$0xff] %vm1208_vm1, %v1187_v15  ;;  %v1171_v62 = vmul.f32 %v1491_v19, %v2672_v58  ;;  %v896_v12 = vmul.f32 %v1516_v45, %v857_v59  ;;  %v2949_v58 = vld [vmem:[#allocation13_spill] sm:$0xff] }
 0x27b   :  { %v1495_v54 = vpop.eup %1494  ;;  %v1188_v4 = vadd.f32 %v1156_v40, %v2947_v24  ;;  %v1172_v33 = vmul.f32 %v1493_v44, %v2675_v49  ;;  %v950_v38 = vadd.f32 %v2370_v6, %v911_v63 }
 0x27c   :  { %v1497_v48 = vpop.eup %1496  ;;  %v1203_v43 = vadd.f32 %v1171_v62, %v2948_v34  ;;  %v1157_v36 = vmul.f32 %v1495_v54, %v2687_v11  ;;  %v935_v0 = vadd.f32 %v1517_v3, %v896_v12  ;;  %v2951_v11 = vld [vmem:[#allocation14_spill] sm:$0xff] }
 0x27d   :  { %1221 = vst.msk [vmem:[%s2824_s5 + $0x60] sm:$0xff] %vm1208_vm1, %v1188_v4  ;;  %v1204_v20 = vadd.f32 %v1172_v33, %v2949_v58  ;;  %v1309_v49 = vmul.f32 -1.442695, %v950_v38  ;;  %v873_v6 = vmul.f32 %v1497_v48, %v2950_v60 }
 0x27e   :  { %1236 = vst.msk [vmem:[%s2824_s5 + $0xd8] sm:$0xff] %vm1208_vm1, %v1203_v43  ;;  %v1189_v30 = vadd.f32 %v1157_v36, %v2951_v11  ;;  %v1294_v50 = vmul.f32 -1.442695, %v935_v0 }
 0x27f   :  { %1237 = vst.msk [vmem:[%s2824_s5 + $0xe0] sm:$0xff] %vm1208_vm1, %v1204_v20  ;;  %1502 = vpow2.f32 %v1309_v49  ;;  %v912_v32 = vmul.f32 %v1516_v45, %v873_v6 }
 0x280   :  { %1222 = vst.msk [vmem:[%s2824_s5 + $0x68] sm:$0xff] %vm1208_vm1, %v1189_v30  ;;  %1504 = vpow2.f32 %v1294_v50 }
 0x281   :  { %v1499_v9 = vpop.eup %1498  ;;  %v951_v61 = vadd.f32 %v1517_v3, %v912_v32 }
 0x282   :  { %v1158_v42 = vmul.f32 %v1499_v9, %v2694_v57 }
 0x283   :  { %v1501_v29 = vpop.eup %1500  ;;  %v1310_v31 = vmul.f32 -1.442695, %v951_v61 }
 0x284   :  { %v1190_v10 = vadd.f32 %v1158_v42, %v2952_v41  ;;  %v1077_v53 = vadd.f32 1.0, %v1501_v29 }
 0x285   :  { %1506 = vpow2.f32 %v1310_v31 }
 0x286   :  { %1223 = vst.msk [vmem:[%s2824_s5 + $0x70] sm:$0xff] %vm1208_vm1, %v1190_v10  ;;  %1508 = vrcp.f32 %v1077_v53 }
 0x289   :  { %v1503_v27 = vpop.eup %1502 }
 0x28a   :  { %v1505_v25 = vpop.eup %1504  ;;  %v1078_v51 = vadd.f32 1.0, %v1503_v27 }
 0x28b   :  { %v1063_v37 = vadd.f32 1.0, %v1505_v25 }
 0x28c   :  { %1510 = vrcp.f32 %v1078_v51 }
 0x28d   :  { %1512 = vrcp.f32 %v1063_v37 }
 0x28f   :  { %v1507_v14 = vpop.eup %1506 }
 0x290   :  { %v1509_v57 = vpop.eup %1508  ;;  %v1079_v2 = vadd.f32 1.0, %v1507_v14 }
 0x291   :  { %v1173_v55 = vmul.f32 %v1509_v57, %v2736_v18 }
 0x292   :  { %1514 = vrcp.f32 %v1079_v2 }
 0x293   :  { %v1205_v23 = vadd.f32 %v1173_v55, %v2953_v47 }
 0x295   :  { %1238 = vst.msk [vmem:[%s2824_s5 + $0xe8] sm:$0xff] %vm1208_vm1, %v1205_v23 }
 0x296   :  { %v1511_v35 = vpop.eup %1510 }
 0x297   :  { %v1513_v1 = vpop.eup %1512  ;;  %v1174_v7 = vmul.f32 %v1511_v35, %v950_v38 }
 0x298   :  { %v1159_v28 = vmul.f32 %v1513_v1, %v935_v0 }
 0x299   :  { %v1206_v39 = vadd.f32 %v1174_v7, %v2954_v17 }
 0x29a   :  { %v1191_v26 = vadd.f32 %v1159_v28, %v2955_v22 }
 0x29b   :  { %1239 = vst.msk [vmem:[%s2824_s5 + $0xf0] sm:$0xff] %vm1208_vm1, %v1206_v39 }
 0x29c   :  { %v1515_v18 = vpop.eup %1514  ;;  %1224 = vst.msk [vmem:[%s2824_s5 + $0x78] sm:$0xff] %vm1208_vm1, %v1191_v26 }
 0x29d   :  { %v1175_v5 = vmul.f32 %v1515_v18, %v951_v61 }
 0x29f   :  { %v1207_v46 = vadd.f32 %v1175_v5, %v2956_v21 }
 0x2a1   :  { %1240 = vst.msk [vmem:[%s2824_s5 + $0xf8] sm:$0xff] %vm1208_vm1, %v1207_v46 }

</bundles_post_ra>
